<compile_context>
chip_gen: v7x
topology: tpu7x:2x2x1
jax: 0.10.0
libtpu: 0.0.40
codegen_flags: <defaults>
</compile_context>

<pallas_src>
import functools

import jax
import jax.numpy as jnp
import numpy as np
from jax.experimental import pallas as pl
from jax.experimental.pallas import tpu as pltpu

EPS = 1e-5
LANE = 128


def _round_up(x, m):
    return (x + m - 1) // m * m


# ----------------------------- Pallas kernels ------------------------------ #

def _write_stats(st_ref, y):
    """Write per-tile [sum(y); sum(y*y)] into a (1, 2, C) stats block."""
    ss = jnp.sum(y, axis=0, keepdims=True)
    sq = jnp.sum(y * y, axis=0, keepdims=True)
    st_ref[0] = jnp.concatenate([ss, sq], axis=0)


def _conv1_stats_kernel(x_ref, w_ref, y_ref, st_ref):
    # conv1 (1x1 as matmul, bf16 MXU / f32 acc) + bn1 partial stats.
    y = jnp.dot(x_ref[...], w_ref[...], preferred_element_type=jnp.float32)
    y_ref[...] = y.astype(y_ref.dtype)
    _write_stats(st_ref, y)


def _conv3x3_stats_kernel(t1_ref, w2_ref, y_ref, st_ref, *, th, W):
    # conv2 (3x3 / pad=1) as 9 shifted matmuls on a (th+2, W+2, Cmid) halo tile.
    t1 = t1_ref[0]                                   # (th+2, W+2, Cmid) bf16
    cmid = t1.shape[-1]
    cout = w2_ref.shape[-1]
    acc = jnp.zeros((th * W, cout), jnp.float32)
    for dy in range(3):
        for dx in range(3):
            win = t1[dy:dy + th, dx:dx + W, :].reshape(th * W, cmid)
            acc = acc + jnp.dot(win, w2_ref[dy * 3 + dx],
                                preferred_element_type=jnp.float32)
    y_ref[...] = acc.astype(y_ref.dtype)
    _write_stats(st_ref, acc)


def _bn_conv_stats_kernel(a_ref, s_ref, b_ref, w_ref, y_ref, st_ref):
    # folded-BN (y*scale+shift) -> ReLU -> 1x1 conv -> partial stats of result.
    t = jnp.maximum(a_ref[...].astype(jnp.float32) * s_ref[...] + b_ref[...], 0.0)
    y = jnp.dot(t.astype(w_ref.dtype), w_ref[...],
                preferred_element_type=jnp.float32)
    y_ref[...] = y.astype(y_ref.dtype)
    _write_stats(st_ref, y)


def _bn_conv_res_stats_kernel(a_ref, s_ref, b_ref, w_ref, c2_ref, r_ref, st_ref):
    # bn3 -> relu3 -> conv4 (1x1) -> residual add (conv2_x) -> bn4 partial stats.
    t = jnp.maximum(a_ref[...].astype(jnp.float32) * s_ref[...] + b_ref[...], 0.0)
    y = jnp.dot(t.astype(w_ref.dtype), w_ref[...],
                preferred_element_type=jnp.float32)
    r = c2_ref[...].astype(jnp.float32) + y
    r_ref[...] = r.astype(r_ref.dtype)
    _write_stats(st_ref, r)


def _bn_relu_kernel(a_ref, s_ref, b_ref, o_ref):
    # final bn4 apply + relu4.
    o_ref[...] = jnp.maximum(
        a_ref[...].astype(jnp.float32) * s_ref[...] + b_ref[...], 0.0)


# ------------------------------ Helpers ------------------------------------ #

def _cp(n_grid_axes):
    return pltpu.CompilerParams(
        dimension_semantics=("parallel",) * n_grid_axes,
        vmem_limit_bytes=32 * 1024 * 1024)


def _pick_row_tile(rows):
    cap = rows if rows <= 256 else rows // 2
    for t in (2048, 1024, 512, 256, 128, 64, 32, 16, 8):
        if t <= cap and rows % t == 0:
            return t
    return rows


def _fold_bn(stats, gamma, beta, count):
    # stats: (tiles, 2, Cpad) with [sum, sum_sq]; var = E[y^2] - E[y]^2.
    s = jnp.sum(stats, axis=0)
    mu = s[0] / count
    var = jnp.maximum(s[1] / count - mu * mu, 0.0)
    scale = gamma * jax.lax.rsqrt(var + EPS)
    shift = beta - mu * scale
    return scale.reshape(1, -1), shift.reshape(1, -1)


def _pad2(w, r, c):
    return jnp.pad(w, ((0, r - w.shape[0]), (0, c - w.shape[1])))


# ------------------------------- Wrapper ----------------------------------- #

def res_block_forward(x_nchw, p):
    N, Cin, H, W = x_nchw.shape
    w1, w2, w3, w4 = p["w1"], p["w2"], p["w3"], p["w4"]
    Cmid = w1.shape[0]            # outplanes // 2
    Cout = w2.shape[0]            # outplanes

    f32, bf16 = jnp.float32, jnp.bfloat16
    cin_p = _round_up(Cin, LANE)
    cmid_p = _round_up(Cmid, LANE)
    cout_p = _round_up(Cout, LANE)

    R = N * H * W
    tr = _pick_row_tile(R)
    nt = R // tr
    assert R % tr == 0

    th = next(t for t in (8, 4, 2, 1) if H % t == 0)   # H tile for the 3x3 conv
    nhb = H // th
    nb = N * nhb
    assert (th * W) % 8 == 0, "conv2 output row block must be sublane aligned"

    # ---- weight / BN-parameter prep (lane-dense, bf16 for the MXU) ---- #
    w1m = _pad2(w1.reshape(Cmid, Cin).T, cin_p, cmid_p).astype(bf16)
    w2m = jnp.transpose(w2, (2, 3, 1, 0)).reshape(9, Cmid, Cout)
    w2m = jnp.pad(w2m, ((0, 0), (0, cmid_p - Cmid), (0, cout_p - Cout))).astype(bf16)
    w3m = _pad2(w3.reshape(Cmid, Cout).T, cout_p, cmid_p).astype(bf16)
    w4m = _pad2(w4.reshape(Cout, Cmid).T, cmid_p, cout_p).astype(bf16)

    def gpad(k, n):   # gamma padded with 1 (padded channels stay exactly 0)
        return jnp.pad(p[k].astype(f32), (0, n - p[k].shape[0]), constant_values=1.0)

    def bpad(k, n):   # beta padded with 0
        return jnp.pad(p[k].astype(f32), (0, n - p[k].shape[0]))

    g1, b1 = gpad("g1", cmid_p), bpad("b1", cmid_p)
    g2, b2 = gpad("g2", cout_p), bpad("b2", cout_p)
    g3, b3 = gpad("g3", cmid_p), bpad("b3", cmid_p)
    g4, b4 = gpad("g4", cout_p), bpad("b4", cout_p)
    count = jnp.asarray(R, f32)

    # ---- layout: NCHW -> (N*H*W, Cin_pad) bf16, channels on the lane axis ---- #
    x2d = jnp.transpose(x_nchw, (0, 2, 3, 1)).reshape(R, Cin)
    x2d = jnp.pad(x2d, ((0, 0), (0, cin_p - Cin))).astype(bf16)

    # ---------------- Pass A: conv1 + bn1 partial stats ---------------- #
    y1, st1 = pl.pallas_call(
        _conv1_stats_kernel,
        grid=(nt,),
        in_specs=[
            pl.BlockSpec((tr, cin_p), lambda i: (i, 0)),
            pl.BlockSpec((cin_p, cmid_p), lambda i: (0, 0)),
        ],
        out_specs=[
            pl.BlockSpec((tr, cmid_p), lambda i: (i, 0)),
            pl.BlockSpec((1, 2, cmid_p), lambda i: (i, 0, 0)),
        ],
        out_shape=[
            jax.ShapeDtypeStruct((R, cmid_p), bf16),
            jax.ShapeDtypeStruct((nt, 2, cmid_p), f32),
        ],
        compiler_params=_cp(1),
    )(x2d, w1m)
    s1, sh1 = _fold_bn(st1, g1, b1, count)

    # bn1 + relu1 applied here (fused by XLA into the halo-slab construction);
    # the 3x3 conv's zero padding must happen AFTER bn1+relu1.
    t1 = jnp.maximum(y1.astype(f32) * s1 + sh1, 0.0).astype(bf16)
    t1 = t1.reshape(N, H, W, cmid_p)
    t1p = jnp.pad(t1, ((0, 0), (1, 1), (1, 1), (0, 0)))
    t1e = jnp.stack([t1p[:, hb * th:hb * th + th + 2] for hb in range(nhb)], axis=1)
    t1e = t1e.reshape(nb, th + 2, W + 2, cmid_p)      # (N*nhb, th+2, W+2, Cmid)

    # ---------------- Pass B: conv2 (3x3 halo matmuls) + bn2 stats ---------------- #
    conv2_x, st2 = pl.pallas_call(
        functools.partial(_conv3x3_stats_kernel, th=th, W=W),
        grid=(nb,),
        in_specs=[
            pl.BlockSpec((1, th + 2, W + 2, cmid_p), lambda i: (i, 0, 0, 0)),
            pl.BlockSpec((9, cmid_p, cout_p), lambda i: (0, 0, 0)),
        ],
        out_specs=[
            pl.BlockSpec((th * W, cout_p), lambda i: (i, 0)),
            pl.BlockSpec((1, 2, cout_p), lambda i: (i, 0, 0)),
        ],
        out_shape=[
            jax.ShapeDtypeStruct((R, cout_p), bf16),
            jax.ShapeDtypeStruct((nb, 2, cout_p), f32),
        ],
        compiler_params=_cp(1),
    )(t1e, w2m)
    s2, sh2 = _fold_bn(st2, g2, b2, count)

    # ---------------- Pass C: bn2 + relu2 + conv3 + bn3 stats ---------------- #
    y3, st3 = pl.pallas_call(
        _bn_conv_stats_kernel,
        grid=(nt,),
        in_specs=[
            pl.BlockSpec((tr, cout_p), lambda i: (i, 0)),
            pl.BlockSpec((1, cout_p), lambda i: (0, 0)),
            pl.BlockSpec((1, cout_p), lambda i: (0, 0)),
            pl.BlockSpec((cout_p, cmid_p), lambda i: (0, 0)),
        ],
        out_specs=[
            pl.BlockSpec((tr, cmid_p), lambda i: (i, 0)),
            pl.BlockSpec((1, 2, cmid_p), lambda i: (i, 0, 0)),
        ],
        out_shape=[
            jax.ShapeDtypeStruct((R, cmid_p), bf16),
            jax.ShapeDtypeStruct((nt, 2, cmid_p), f32),
        ],
        compiler_params=_cp(1),
    )(conv2_x, s2, sh2, w3m)
    s3, sh3 = _fold_bn(st3, g3, b3, count)

    # ------- Pass D: bn3 + relu3 + conv4 + residual add + bn4 stats ------- #
    r, st4 = pl.pallas_call(
        _bn_conv_res_stats_kernel,
        grid=(nt,),
        in_specs=[
            pl.BlockSpec((tr, cmid_p), lambda i: (i, 0)),     # y3
            pl.BlockSpec((1, cmid_p), lambda i: (0, 0)),      # scale3
            pl.BlockSpec((1, cmid_p), lambda i: (0, 0)),      # shift3
            pl.BlockSpec((cmid_p, cout_p), lambda i: (0, 0)), # w4
            pl.BlockSpec((tr, cout_p), lambda i: (i, 0)),     # conv2_x (residual)
        ],
        out_specs=[
            pl.BlockSpec((tr, cout_p), lambda i: (i, 0)),
            pl.BlockSpec((1, 2, cout_p), lambda i: (i, 0, 0)),
        ],
        out_shape=[
            jax.ShapeDtypeStruct((R, cout_p), bf16),
            jax.ShapeDtypeStruct((nt, 2, cout_p), f32),
        ],
        compiler_params=_cp(1),
    )(y3, s3, sh3, w4m, conv2_x)
    s4, sh4 = _fold_bn(st4, g4, b4, count)

    # ---------------- Pass E: bn4 + relu4 ---------------- #
    out2d = pl.pallas_call(
        _bn_relu_kernel,
        grid=(nt,),
        in_specs=[
            pl.BlockSpec((tr, cout_p), lambda i: (i, 0)),
            pl.BlockSpec((1, cout_p), lambda i: (0, 0)),
            pl.BlockSpec((1, cout_p), lambda i: (0, 0)),
        ],
        out_specs=pl.BlockSpec((tr, cout_p), lambda i: (i, 0)),
        out_shape=jax.ShapeDtypeStruct((R, cout_p), f32),
        compiler_params=_cp(1),
    )(r, s4, sh4)

    # strip channel padding, back to NCHW
    out = out2d.reshape(N, H, W, cout_p)[:, :, :, :Cout]
    return jnp.transpose(out, (0, 3, 1, 2))


# --------------------------- Pure-JAX reference ----------------------------- #

def _bn_relu_ref(y, gamma, beta):
    mu = y.mean(axis=(0, 2, 3), keepdims=True)
    var = ((y - mu) ** 2).mean(axis=(0, 2, 3), keepdims=True)
    yn = (y - mu) / jnp.sqrt(var + EPS)
    return jnp.maximum(yn * gamma.reshape(1, -1, 1, 1) + beta.reshape(1, -1, 1, 1), 0.0)


def reference_forward(x, p):
    dn = ("NCHW", "OIHW", "NCHW")
    conv = lambda v, w, pad: jax.lax.conv_general_dilated(
        v, w, (1, 1), pad, dimension_numbers=dn)
    t = _bn_relu_ref(conv(x, p["w1"], "VALID"), p["g1"], p["b1"])
    conv2_x = conv(t, p["w2"], ((1, 1), (1, 1)))
    t = _bn_relu_ref(conv2_x, p["g2"], p["b2"])
    t = _bn_relu_ref(conv(t, p["w3"], "VALID"), p["g3"], p["b3"])
    conv4_x = conv(t, p["w4"], "VALID")
    return _bn_relu_ref(conv2_x + conv4_x, p["g4"], p["b4"])


# --------------------------------- Main ------------------------------------ #

def make_params(key, inplanes, outplanes):
    cmid = outplanes // 2
    k1, k2, k3, k4 = jax.random.split(key, 4)
    return {
        "w1": jax.random.normal(k1, (cmid, inplanes, 1, 1), jnp.float32) / np.sqrt(inplanes),
        "w2": jax.random.normal(k2, (outplanes, cmid, 3, 3), jnp.float32) / np.sqrt(cmid * 9),
        "w3": jax.random.normal(k3, (cmid, outplanes, 1, 1), jnp.float32) / np.sqrt(outplanes),
        "w4": jax.random.normal(k4, (outplanes, cmid, 1, 1), jnp.float32) / np.sqrt(cmid),
        "g1": jnp.ones((cmid,), jnp.float32), "b1": jnp.zeros((cmid,), jnp.float32),
        "g2": jnp.ones((outplanes,), jnp.float32), "b2": jnp.zeros((outplanes,), jnp.float32),
        "g3": jnp.ones((cmid,), jnp.float32), "b3": jnp.zeros((cmid,), jnp.float32),
        "g4": jnp.ones((outplanes,), jnp.float32), "b4": jnp.zeros((outplanes,), jnp.float32),
    }


if __name__ == "__main__":
    N, INPLANES, OUTPLANES, H, W = 2, 4, 8, 16, 16

    key = jax.random.PRNGKey(0)
    kx, kp = jax.random.split(key)
    x = jax.random.normal(kx, (N, INPLANES, H, W), jnp.float32)
    params = make_params(kp, INPLANES, OUTPLANES)

    out = jax.jit(res_block_forward)(x, params)
    out = jax.block_until_ready(out)

    ref = reference_forward(x, params)
    np.testing.assert_allclose(np.asarray(out), np.asarray(ref), rtol=5e-2, atol=5e-2)
    assert out.shape == (N, OUTPLANES, H, W)

    print("KERNEL_OK")
</pallas_src>

<mosaic_0001>
module attributes {stable_mosaic.version = 11 : i64} {
  func.func @_conv1_stats_kernel(%arg0: i32, %arg1: memref<256x128xbf16, #tpu.memory_space<vmem>>, %arg2: memref<128x128xbf16, #tpu.memory_space<vmem>>, %arg3: memref<256x128xbf16, #tpu.memory_space<vmem>>, %arg4: memref<1x2x128xf32, #tpu.memory_space<vmem>>) attributes {dimension_semantics = [#tpu.dimension_semantics<parallel>], iteration_bounds = array<i64: 2>, scalar_prefetch = 0 : i64, scratch_operands = 0 : i64, tpu.core_type = #tpu.core_type<tc>, window_params = [{transform_indices = @transform_0, window_bounds = array<i64: 256, 128>}, {pipeline_mode = #tpu.pipeline_mode<synchronous>, transform_indices = @transform_1, window_bounds = array<i64: 128, 128>}, {transform_indices = @transform_2, window_bounds = array<i64: 256, 128>}, {transform_indices = @transform_3, window_bounds = array<i64: 1, 2, 128>}]} {
    %c0 = arith.constant 0 : index
    %c0_0 = arith.constant 0 : index
    %0 = vector.load %arg1[%c0, %c0_0] : memref<256x128xbf16, #tpu.memory_space<vmem>>, vector<256x128xbf16>
    %c0_1 = arith.constant 0 : index
    %c0_2 = arith.constant 0 : index
    %1 = vector.load %arg2[%c0_1, %c0_2] : memref<128x128xbf16, #tpu.memory_space<vmem>>, vector<128x128xbf16>
    %cst = arith.constant dense<0.000000e+00> : vector<256x128xf32>
    %2 = tpu.matmul %0, %1, %cst {dimension_numbers = #tpu.dot_dimension_numbers<[1], [0], [0], [1], [0, 0, 1, 1], [], []>} : vector<256x128xbf16>, vector<128x128xbf16>, vector<256x128xf32> -> vector<256x128xf32>
    %3 = arith.truncf %2 : vector<256x128xf32> to vector<256x128xbf16>
    %c0_3 = arith.constant 0 : index
    %c0_4 = arith.constant 0 : index
    %4 = vector.load %arg3[%c0_3, %c0_4] : memref<256x128xbf16, #tpu.memory_space<vmem>>, vector<256x128xbf16>
    tpu.vector_store %arg3[%c0_3, %c0_4], %3 {strides = array<i32>} : memref<256x128xbf16, #tpu.memory_space<vmem>>, vector<256x128xbf16>,
    %cst_5 = arith.constant dense<0.000000e+00> : vector<128xf32>
    %5 = vector.multi_reduction <add>, %2, %cst_5 [0] : vector<256x128xf32> to vector<128xf32>
    %6 = vector.shape_cast %5 : vector<128xf32> to vector<1x128xf32>
    %7 = arith.mulf %2, %2 : vector<256x128xf32>
    %cst_6 = arith.constant dense<0.000000e+00> : vector<128xf32>
    %8 = vector.multi_reduction <add>, %7, %cst_6 [0] : vector<256x128xf32> to vector<128xf32>
    %9 = vector.shape_cast %8 : vector<128xf32> to vector<1x128xf32>
    %10 = tpu.concatenate %6, %9 in 0 : vector<1x128xf32>, vector<1x128xf32> -> vector<2x128xf32>
    %c0_7 = arith.constant 0 : index
    %c0_8 = arith.constant 0 : index
    %c0_9 = arith.constant 0 : index
    %11 = vector.load %arg4[%c0_7, %c0_8, %c0_9] : memref<1x2x128xf32, #tpu.memory_space<vmem>>, vector<1x2x128xf32>
    %12 = vector.shape_cast %11 : vector<1x2x128xf32> to vector<2x128xf32>
    %13 = vector.shape_cast %10 : vector<2x128xf32> to vector<1x2x128xf32>
    tpu.vector_store %arg4[%c0_7, %c0_8, %c0_9], %13 {strides = array<i32>} : memref<1x2x128xf32, #tpu.memory_space<vmem>>, vector<1x2x128xf32>,
    return
  }
  func.func @transform_0(%arg0: i32) -> (i32, i32) {
    %c0_i32 = arith.constant 0 : i32
    %c0_i32_0 = arith.constant 0 : i32
    return %arg0, %c0_i32 : i32, i32
  }
  func.func @transform_1(%arg0: i32) -> (i32, i32) {
    %c0_i32 = arith.constant 0 : i32
    %c0_i32_0 = arith.constant 0 : i32
    %c0_i32_1 = arith.constant 0 : i32
    return %c0_i32, %c0_i32_0 : i32, i32
  }
  func.func @transform_2(%arg0: i32) -> (i32, i32) {
    %c0_i32 = arith.constant 0 : i32
    %c0_i32_0 = arith.constant 0 : i32
    return %arg0, %c0_i32 : i32, i32
  }
  func.func @transform_3(%arg0: i32) -> (i32, i32, i32) {
    %c0_i32 = arith.constant 0 : i32
    %c0_i32_0 = arith.constant 0 : i32
    %c0_i32_1 = arith.constant 0 : i32
    return %arg0, %c0_i32, %c0_i32_0 : i32, i32, i32
  }
}

module attributes {stable_mosaic.version = 11 : i64} {
  func.func @_conv3x3_stats_kernel(%arg0: i32, %arg1: memref<1x10x18x128xbf16, #tpu.memory_space<vmem>>, %arg2: memref<9x128x128xbf16, #tpu.memory_space<vmem>>, %arg3: memref<128x128xbf16, #tpu.memory_space<vmem>>, %arg4: memref<1x2x128xf32, #tpu.memory_space<vmem>>) attributes {dimension_semantics = [#tpu.dimension_semantics<parallel>], iteration_bounds = array<i64: 4>, scalar_prefetch = 0 : i64, scratch_operands = 0 : i64, tpu.core_type = #tpu.core_type<tc>, window_params = [{transform_indices = @transform_0, window_bounds = array<i64: 1, 10, 18, 128>}, {pipeline_mode = #tpu.pipeline_mode<synchronous>, transform_indices = @transform_1, window_bounds = array<i64: 9, 128, 128>}, {transform_indices = @transform_2, window_bounds = array<i64: 128, 128>}, {transform_indices = @transform_3, window_bounds = array<i64: 1, 2, 128>}]} {
    %c0 = arith.constant 0 : index
    %c0_0 = arith.constant 0 : index
    %c0_1 = arith.constant 0 : index
    %c0_2 = arith.constant 0 : index
    %0 = vector.load %arg1[%c0, %c0_0, %c0_1, %c0_2] : memref<1x10x18x128xbf16, #tpu.memory_space<vmem>>, vector<1x10x18x128xbf16>
    %1 = vector.shape_cast %0 : vector<1x10x18x128xbf16> to vector<10x18x128xbf16>
    %cst = arith.constant 0.000000e+00 : f32
    %2 = vector.broadcast %cst : f32 to vector<128x128xf32>
    %3 = vector.extract_strided_slice %1 {offsets = [0, 0, 0], sizes = [8, 16, 128], strides = [1, 1, 1]} : vector<10x18x128xbf16> to vector<8x16x128xbf16>
    %4 = vector.shape_cast %3 : vector<8x16x128xbf16> to vector<128x128xbf16>
    %c0_3 = arith.constant 0 : index
    %c0_4 = arith.constant 0 : index
    %c0_5 = arith.constant 0 : index
    %5 = vector.load %arg2[%c0_3, %c0_4, %c0_5] : memref<9x128x128xbf16, #tpu.memory_space<vmem>>, vector<1x128x128xbf16>
    %6 = vector.shape_cast %5 : vector<1x128x128xbf16> to vector<128x128xbf16>
    %cst_6 = arith.constant dense<0.000000e+00> : vector<128x128xf32>
    %7 = tpu.matmul %4, %6, %cst_6 {dimension_numbers = #tpu.dot_dimension_numbers<[1], [0], [0], [1], [0, 0, 1, 1], [], []>} : vector<128x128xbf16>, vector<128x128xbf16>, vector<128x128xf32> -> vector<128x128xf32>
    %8 = arith.addf %2, %7 : vector<128x128xf32>
    %9 = vector.extract_strided_slice %1 {offsets = [0, 1, 0], sizes = [8, 16, 128], strides = [1, 1, 1]} : vector<10x18x128xbf16> to vector<8x16x128xbf16>
    %10 = vector.shape_cast %9 : vector<8x16x128xbf16> to vector<128x128xbf16>
    %c1 = arith.constant 1 : index
    %c0_7 = arith.constant 0 : index
    %c0_8 = arith.constant 0 : index
    %11 = vector.load %arg2[%c1, %c0_7, %c0_8] : memref<9x128x128xbf16, #tpu.memory_space<vmem>>, vector<1x128x128xbf16>
    %12 = vector.shape_cast %11 : vector<1x128x128xbf16> to vector<128x128xbf16>
    %cst_9 = arith.constant dense<0.000000e+00> : vector<128x128xf32>
    %13 = tpu.matmul %10, %12, %cst_9 {dimension_numbers = #tpu.dot_dimension_numbers<[1], [0], [0], [1], [0, 0, 1, 1], [], []>} : vector<128x128xbf16>, vector<128x128xbf16>, vector<128x128xf32> -> vector<128x128xf32>
    %14 = arith.addf %8, %13 : vector<128x128xf32>
    %15 = vector.extract_strided_slice %1 {offsets = [0, 2, 0], sizes = [8, 16, 128], strides = [1, 1, 1]} : vector<10x18x128xbf16> to vector<8x16x128xbf16>
    %16 = vector.shape_cast %15 : vector<8x16x128xbf16> to vector<128x128xbf16>
    %c2 = arith.constant 2 : index
    %c0_10 = arith.constant 0 : index
    %c0_11 = arith.constant 0 : index
    %17 = vector.load %arg2[%c2, %c0_10, %c0_11] : memref<9x128x128xbf16, #tpu.memory_space<vmem>>, vector<1x128x128xbf16>
    %18 = vector.shape_cast %17 : vector<1x128x128xbf16> to vector<128x128xbf16>
    %cst_12 = arith.constant dense<0.000000e+00> : vector<128x128xf32>
    %19 = tpu.matmul %16, %18, %cst_12 {dimension_numbers = #tpu.dot_dimension_numbers<[1], [0], [0], [1], [0, 0, 1, 1], [], []>} : vector<128x128xbf16>, vector<128x128xbf16>, vector<128x128xf32> -> vector<128x128xf32>
    %20 = arith.addf %14, %19 : vector<128x128xf32>
    %21 = vector.extract_strided_slice %1 {offsets = [1, 0, 0], sizes = [8, 16, 128], strides = [1, 1, 1]} : vector<10x18x128xbf16> to vector<8x16x128xbf16>
    %22 = vector.shape_cast %21 : vector<8x16x128xbf16> to vector<128x128xbf16>
    %c3 = arith.constant 3 : index
    %c0_13 = arith.constant 0 : index
    %c0_14 = arith.constant 0 : index
    %23 = vector.load %arg2[%c3, %c0_13, %c0_14] : memref<9x128x128xbf16, #tpu.memory_space<vmem>>, vector<1x128x128xbf16>
    %24 = vector.shape_cast %23 : vector<1x128x128xbf16> to vector<128x128xbf16>
    %cst_15 = arith.constant dense<0.000000e+00> : vector<128x128xf32>
    %25 = tpu.matmul %22, %24, %cst_15 {dimension_numbers = #tpu.dot_dimension_numbers<[1], [0], [0], [1], [0, 0, 1, 1], [], []>} : vector<128x128xbf16>, vector<128x128xbf16>, vector<128x128xf32> -> vector<128x128xf32>
    %26 = arith.addf %20, %25 : vector<128x128xf32>
    %27 = vector.extract_strided_slice %1 {offsets = [1, 1, 0], sizes = [8, 16, 128], strides = [1, 1, 1]} : vector<10x18x128xbf16> to vector<8x16x128xbf16>
    %28 = vector.shape_cast %27 : vector<8x16x128xbf16> to vector<128x128xbf16>
    %c4 = arith.constant 4 : index
    %c0_16 = arith.constant 0 : index
    %c0_17 = arith.constant 0 : index
    %29 = vector.load %arg2[%c4, %c0_16, %c0_17] : memref<9x128x128xbf16, #tpu.memory_space<vmem>>, vector<1x128x128xbf16>
    %30 = vector.shape_cast %29 : vector<1x128x128xbf16> to vector<128x128xbf16>
    %cst_18 = arith.constant dense<0.000000e+00> : vector<128x128xf32>
    %31 = tpu.matmul %28, %30, %cst_18 {dimension_numbers = #tpu.dot_dimension_numbers<[1], [0], [0], [1], [0, 0, 1, 1], [], []>} : vector<128x128xbf16>, vector<128x128xbf16>, vector<128x128xf32> -> vector<128x128xf32>
    %32 = arith.addf %26, %31 : vector<128x128xf32>
    %33 = vector.extract_strided_slice %1 {offsets = [1, 2, 0], sizes = [8, 16, 128], strides = [1, 1, 1]} : vector<10x18x128xbf16> to vector<8x16x128xbf16>
    %34 = vector.shape_cast %33 : vector<8x16x128xbf16> to vector<128x128xbf16>
    %c5 = arith.constant 5 : index
    %c0_19 = arith.constant 0 : index
    %c0_20 = arith.constant 0 : index
    %35 = vector.load %arg2[%c5, %c0_19, %c0_20] : memref<9x128x128xbf16, #tpu.memory_space<vmem>>, vector<1x128x128xbf16>
    %36 = vector.shape_cast %35 : vector<1x128x128xbf16> to vector<128x128xbf16>
    %cst_21 = arith.constant dense<0.000000e+00> : vector<128x128xf32>
    %37 = tpu.matmul %34, %36, %cst_21 {dimension_numbers = #tpu.dot_dimension_numbers<[1], [0], [0], [1], [0, 0, 1, 1], [], []>} : vector<128x128xbf16>, vector<128x128xbf16>, vector<128x128xf32> -> vector<128x128xf32>
    %38 = arith.addf %32, %37 : vector<128x128xf32>
    %39 = vector.extract_strided_slice %1 {offsets = [2, 0, 0], sizes = [8, 16, 128], strides = [1, 1, 1]} : vector<10x18x128xbf16> to vector<8x16x128xbf16>
    %40 = vector.shape_cast %39 : vector<8x16x128xbf16> to vector<128x128xbf16>
    %c6 = arith.constant 6 : index
    %c0_22 = arith.constant 0 : index
    %c0_23 = arith.constant 0 : index
    %41 = vector.load %arg2[%c6, %c0_22, %c0_23] : memref<9x128x128xbf16, #tpu.memory_space<vmem>>, vector<1x128x128xbf16>
    %42 = vector.shape_cast %41 : vector<1x128x128xbf16> to vector<128x128xbf16>
    %cst_24 = arith.constant dense<0.000000e+00> : vector<128x128xf32>
    %43 = tpu.matmul %40, %42, %cst_24 {dimension_numbers = #tpu.dot_dimension_numbers<[1], [0], [0], [1], [0, 0, 1, 1], [], []>} : vector<128x128xbf16>, vector<128x128xbf16>, vector<128x128xf32> -> vector<128x128xf32>
    %44 = arith.addf %38, %43 : vector<128x128xf32>
    %45 = vector.extract_strided_slice %1 {offsets = [2, 1, 0], sizes = [8, 16, 128], strides = [1, 1, 1]} : vector<10x18x128xbf16> to vector<8x16x128xbf16>
    %46 = vector.shape_cast %45 : vector<8x16x128xbf16> to vector<128x128xbf16>
    %c7 = arith.constant 7 : index
    %c0_25 = arith.constant 0 : index
    %c0_26 = arith.constant 0 : index
    %47 = vector.load %arg2[%c7, %c0_25, %c0_26] : memref<9x128x128xbf16, #tpu.memory_space<vmem>>, vector<1x128x128xbf16>
    %48 = vector.shape_cast %47 : vector<1x128x128xbf16> to vector<128x128xbf16>
    %cst_27 = arith.constant dense<0.000000e+00> : vector<128x128xf32>
    %49 = tpu.matmul %46, %48, %cst_27 {dimension_numbers = #tpu.dot_dimension_numbers<[1], [0], [0], [1], [0, 0, 1, 1], [], []>} : vector<128x128xbf16>, vector<128x128xbf16>, vector<128x128xf32> -> vector<128x128xf32>
    %50 = arith.addf %44, %49 : vector<128x128xf32>
    %51 = vector.extract_strided_slice %1 {offsets = [2, 2, 0], sizes = [8, 16, 128], strides = [1, 1, 1]} : vector<10x18x128xbf16> to vector<8x16x128xbf16>
    %52 = vector.shape_cast %51 : vector<8x16x128xbf16> to vector<128x128xbf16>
    %c8 = arith.constant 8 : index
    %c0_28 = arith.constant 0 : index
    %c0_29 = arith.constant 0 : index
    %53 = vector.load %arg2[%c8, %c0_28, %c0_29] : memref<9x128x128xbf16, #tpu.memory_space<vmem>>, vector<1x128x128xbf16>
    %54 = vector.shape_cast %53 : vector<1x128x128xbf16> to vector<128x128xbf16>
    %cst_30 = arith.constant dense<0.000000e+00> : vector<128x128xf32>
    %55 = tpu.matmul %52, %54, %cst_30 {dimension_numbers = #tpu.dot_dimension_numbers<[1], [0], [0], [1], [0, 0, 1, 1], [], []>} : vector<128x128xbf16>, vector<128x128xbf16>, vector<128x128xf32> -> vector<128x128xf32>
    %56 = arith.addf %50, %55 : vector<128x128xf32>
    %57 = arith.truncf %56 : vector<128x128xf32> to vector<128x128xbf16>
    %c0_31 = arith.constant 0 : index
    %c0_32 = arith.constant 0 : index
    %58 = vector.load %arg3[%c0_31, %c0_32] : memref<128x128xbf16, #tpu.memory_space<vmem>>, vector<128x128xbf16>
    tpu.vector_store %arg3[%c0_31, %c0_32], %57 {strides = array<i32>} : memref<128x128xbf16, #tpu.memory_space<vmem>>, vector<128x128xbf16>,
    %cst_33 = arith.constant dense<0.000000e+00> : vector<128xf32>
    %59 = vector.multi_reduction <add>, %56, %cst_33 [0] : vector<128x128xf32> to vector<128xf32>
    %60 = vector.shape_cast %59 : vector<128xf32> to vector<1x128xf32>
    %61 = arith.mulf %56, %56 : vector<128x128xf32>
    %cst_34 = arith.constant dense<0.000000e+00> : vector<128xf32>
    %62 = vector.multi_reduction <add>, %61, %cst_34 [0] : vector<128x128xf32> to vector<128xf32>
    %63 = vector.shape_cast %62 : vector<128xf32> to vector<1x128xf32>
    %64 = tpu.concatenate %60, %63 in 0 : vector<1x128xf32>, vector<1x128xf32> -> vector<2x128xf32>
    %c0_35 = arith.constant 0 : index
    %c0_36 = arith.constant 0 : index
    %c0_37 = arith.constant 0 : index
    %65 = vector.load %arg4[%c0_35, %c0_36, %c0_37] : memref<1x2x128xf32, #tpu.memory_space<vmem>>, vector<1x2x128xf32>
    %66 = vector.shape_cast %65 : vector<1x2x128xf32> to vector<2x128xf32>
    %67 = vector.shape_cast %64 : vector<2x128xf32> to vector<1x2x128xf32>
    tpu.vector_store %arg4[%c0_35, %c0_36, %c0_37], %67 {strides = array<i32>} : memref<1x2x128xf32, #tpu.memory_space<vmem>>, vector<1x2x128xf32>,
    return
  }
  func.func @transform_0(%arg0: i32) -> (i32, i32, i32, i32) {
    %c0_i32 = arith.constant 0 : i32
    %c0_i32_0 = arith.constant 0 : i32
    %c0_i32_1 = arith.constant 0 : i32
    %c0_i32_2 = arith.constant 0 : i32
    return %arg0, %c0_i32, %c0_i32_0, %c0_i32_1 : i32, i32, i32, i32
  }
  func.func @transform_1(%arg0: i32) -> (i32, i32, i32) {
    %c0_i32 = arith.constant 0 : i32
    %c0_i32_0 = arith.constant 0 : i32
    %c0_i32_1 = arith.constant 0 : i32
    %c0_i32_2 = arith.constant 0 : i32
    return %c0_i32, %c0_i32_0, %c0_i32_1 : i32, i32, i32
  }
  func.func @transform_2(%arg0: i32) -> (i32, i32) {
    %c0_i32 = arith.constant 0 : i32
    %c0_i32_0 = arith.constant 0 : i32
    return %arg0, %c0_i32 : i32, i32
  }
  func.func @transform_3(%arg0: i32) -> (i32, i32, i32) {
    %c0_i32 = arith.constant 0 : i32
    %c0_i32_0 = arith.constant 0 : i32
    %c0_i32_1 = arith.constant 0 : i32
    return %arg0, %c0_i32, %c0_i32_0 : i32, i32, i32
  }
}

module attributes {stable_mosaic.version = 11 : i64} {
  func.func @_bn_conv_stats_kernel(%arg0: i32, %arg1: memref<256x128xbf16, #tpu.memory_space<vmem>>, %arg2: memref<1x128xf32, #tpu.memory_space<vmem>>, %arg3: memref<1x128xf32, #tpu.memory_space<vmem>>, %arg4: memref<128x128xbf16, #tpu.memory_space<vmem>>, %arg5: memref<256x128xbf16, #tpu.memory_space<vmem>>, %arg6: memref<1x2x128xf32, #tpu.memory_space<vmem>>) attributes {dimension_semantics = [#tpu.dimension_semantics<parallel>], iteration_bounds = array<i64: 2>, scalar_prefetch = 0 : i64, scratch_operands = 0 : i64, tpu.core_type = #tpu.core_type<tc>, window_params = [{transform_indices = @transform_0, window_bounds = array<i64: 256, 128>}, {pipeline_mode = #tpu.pipeline_mode<synchronous>, transform_indices = @transform_1, window_bounds = array<i64: 1, 128>}, {pipeline_mode = #tpu.pipeline_mode<synchronous>, transform_indices = @transform_2, window_bounds = array<i64: 1, 128>}, {pipeline_mode = #tpu.pipeline_mode<synchronous>, transform_indices = @transform_3, window_bounds = array<i64: 128, 128>}, {transform_indices = @transform_4, window_bounds = array<i64: 256, 128>}, {transform_indices = @transform_5, window_bounds = array<i64: 1, 2, 128>}]} {
    %c0 = arith.constant 0 : index
    %c0_0 = arith.constant 0 : index
    %0 = vector.load %arg1[%c0, %c0_0] : memref<256x128xbf16, #tpu.memory_space<vmem>>, vector<256x128xbf16>
    %1 = arith.extf %0 : vector<256x128xbf16> to vector<256x128xf32>
    %c0_1 = arith.constant 0 : index
    %c0_2 = arith.constant 0 : index
    %2 = vector.load %arg2[%c0_1, %c0_2] : memref<1x128xf32, #tpu.memory_space<vmem>>, vector<1x128xf32>
    %3 = vector.broadcast %2 : vector<1x128xf32> to vector<256x128xf32>
    %4 = arith.mulf %1, %3 : vector<256x128xf32>
    %c0_3 = arith.constant 0 : index
    %c0_4 = arith.constant 0 : index
    %5 = vector.load %arg3[%c0_3, %c0_4] : memref<1x128xf32, #tpu.memory_space<vmem>>, vector<1x128xf32>
    %6 = vector.broadcast %5 : vector<1x128xf32> to vector<256x128xf32>
    %7 = arith.addf %4, %6 : vector<256x128xf32>
    %cst = arith.constant 0.000000e+00 : f32
    %8 = vector.broadcast %cst : f32 to vector<256x128xf32>
    %9 = arith.maximumf %7, %8 : vector<256x128xf32>
    %10 = arith.truncf %9 : vector<256x128xf32> to vector<256x128xbf16>
    %c0_5 = arith.constant 0 : index
    %c0_6 = arith.constant 0 : index
    %11 = vector.load %arg4[%c0_5, %c0_6] : memref<128x128xbf16, #tpu.memory_space<vmem>>, vector<128x128xbf16>
    %cst_7 = arith.constant dense<0.000000e+00> : vector<256x128xf32>
    %12 = tpu.matmul %10, %11, %cst_7 {dimension_numbers = #tpu.dot_dimension_numbers<[1], [0], [0], [1], [0, 0, 1, 1], [], []>} : vector<256x128xbf16>, vector<128x128xbf16>, vector<256x128xf32> -> vector<256x128xf32>
    %13 = arith.truncf %12 : vector<256x128xf32> to vector<256x128xbf16>
    %c0_8 = arith.constant 0 : index
    %c0_9 = arith.constant 0 : index
    %14 = vector.load %arg5[%c0_8, %c0_9] : memref<256x128xbf16, #tpu.memory_space<vmem>>, vector<256x128xbf16>
    tpu.vector_store %arg5[%c0_8, %c0_9], %13 {strides = array<i32>} : memref<256x128xbf16, #tpu.memory_space<vmem>>, vector<256x128xbf16>,
    %cst_10 = arith.constant dense<0.000000e+00> : vector<128xf32>
    %15 = vector.multi_reduction <add>, %12, %cst_10 [0] : vector<256x128xf32> to vector<128xf32>
    %16 = vector.shape_cast %15 : vector<128xf32> to vector<1x128xf32>
    %17 = arith.mulf %12, %12 : vector<256x128xf32>
    %cst_11 = arith.constant dense<0.000000e+00> : vector<128xf32>
    %18 = vector.multi_reduction <add>, %17, %cst_11 [0] : vector<256x128xf32> to vector<128xf32>
    %19 = vector.shape_cast %18 : vector<128xf32> to vector<1x128xf32>
    %20 = tpu.concatenate %16, %19 in 0 : vector<1x128xf32>, vector<1x128xf32> -> vector<2x128xf32>
    %c0_12 = arith.constant 0 : index
    %c0_13 = arith.constant 0 : index
    %c0_14 = arith.constant 0 : index
    %21 = vector.load %arg6[%c0_12, %c0_13, %c0_14] : memref<1x2x128xf32, #tpu.memory_space<vmem>>, vector<1x2x128xf32>
    %22 = vector.shape_cast %21 : vector<1x2x128xf32> to vector<2x128xf32>
    %23 = vector.shape_cast %20 : vector<2x128xf32> to vector<1x2x128xf32>
    tpu.vector_store %arg6[%c0_12, %c0_13, %c0_14], %23 {strides = array<i32>} : memref<1x2x128xf32, #tpu.memory_space<vmem>>, vector<1x2x128xf32>,
    return
  }
  func.func @transform_0(%arg0: i32) -> (i32, i32) {
    %c0_i32 = arith.constant 0 : i32
    %c0_i32_0 = arith.constant 0 : i32
    return %arg0, %c0_i32 : i32, i32
  }
  func.func @transform_1(%arg0: i32) -> (i32, i32) {
    %c0_i32 = arith.constant 0 : i32
    %c0_i32_0 = arith.constant 0 : i32
    %c0_i32_1 = arith.constant 0 : i32
    return %c0_i32, %c0_i32_0 : i32, i32
  }
  func.func @transform_2(%arg0: i32) -> (i32, i32) {
    %c0_i32 = arith.constant 0 : i32
    %c0_i32_0 = arith.constant 0 : i32
    %c0_i32_1 = arith.constant 0 : i32
    return %c0_i32, %c0_i32_0 : i32, i32
  }
  func.func @transform_3(%arg0: i32) -> (i32, i32) {
    %c0_i32 = arith.constant 0 : i32
    %c0_i32_0 = arith.constant 0 : i32
    %c0_i32_1 = arith.constant 0 : i32
    return %c0_i32, %c0_i32_0 : i32, i32
  }
  func.func @transform_4(%arg0: i32) -> (i32, i32) {
    %c0_i32 = arith.constant 0 : i32
    %c0_i32_0 = arith.constant 0 : i32
    return %arg0, %c0_i32 : i32, i32
  }
  func.func @transform_5(%arg0: i32) -> (i32, i32, i32) {
    %c0_i32 = arith.constant 0 : i32
    %c0_i32_0 = arith.constant 0 : i32
    %c0_i32_1 = arith.constant 0 : i32
    return %arg0, %c0_i32, %c0_i32_0 : i32, i32, i32
  }
}

module attributes {stable_mosaic.version = 11 : i64} {
  func.func @_bn_conv_res_stats_kernel(%arg0: i32, %arg1: memref<256x128xbf16, #tpu.memory_space<vmem>>, %arg2: memref<1x128xf32, #tpu.memory_space<vmem>>, %arg3: memref<1x128xf32, #tpu.memory_space<vmem>>, %arg4: memref<128x128xbf16, #tpu.memory_space<vmem>>, %arg5: memref<256x128xbf16, #tpu.memory_space<vmem>>, %arg6: memref<256x128xbf16, #tpu.memory_space<vmem>>, %arg7: memref<1x2x128xf32, #tpu.memory_space<vmem>>) attributes {dimension_semantics = [#tpu.dimension_semantics<parallel>], iteration_bounds = array<i64: 2>, scalar_prefetch = 0 : i64, scratch_operands = 0 : i64, tpu.core_type = #tpu.core_type<tc>, window_params = [{transform_indices = @transform_0, window_bounds = array<i64: 256, 128>}, {pipeline_mode = #tpu.pipeline_mode<synchronous>, transform_indices = @transform_1, window_bounds = array<i64: 1, 128>}, {pipeline_mode = #tpu.pipeline_mode<synchronous>, transform_indices = @transform_2, window_bounds = array<i64: 1, 128>}, {pipeline_mode = #tpu.pipeline_mode<synchronous>, transform_indices = @transform_3, window_bounds = array<i64: 128, 128>}, {transform_indices = @transform_4, window_bounds = array<i64: 256, 128>}, {transform_indices = @transform_5, window_bounds = array<i64: 256, 128>}, {transform_indices = @transform_6, window_bounds = array<i64: 1, 2, 128>}]} {
    %c0 = arith.constant 0 : index
    %c0_0 = arith.constant 0 : index
    %0 = vector.load %arg1[%c0, %c0_0] : memref<256x128xbf16, #tpu.memory_space<vmem>>, vector<256x128xbf16>
    %1 = arith.extf %0 : vector<256x128xbf16> to vector<256x128xf32>
    %c0_1 = arith.constant 0 : index
    %c0_2 = arith.constant 0 : index
    %2 = vector.load %arg2[%c0_1, %c0_2] : memref<1x128xf32, #tpu.memory_space<vmem>>, vector<1x128xf32>
    %3 = vector.broadcast %2 : vector<1x128xf32> to vector<256x128xf32>
    %4 = arith.mulf %1, %3 : vector<256x128xf32>
    %c0_3 = arith.constant 0 : index
    %c0_4 = arith.constant 0 : index
    %5 = vector.load %arg3[%c0_3, %c0_4] : memref<1x128xf32, #tpu.memory_space<vmem>>, vector<1x128xf32>
    %6 = vector.broadcast %5 : vector<1x128xf32> to vector<256x128xf32>
    %7 = arith.addf %4, %6 : vector<256x128xf32>
    %cst = arith.constant 0.000000e+00 : f32
    %8 = vector.broadcast %cst : f32 to vector<256x128xf32>
    %9 = arith.maximumf %7, %8 : vector<256x128xf32>
    %10 = arith.truncf %9 : vector<256x128xf32> to vector<256x128xbf16>
    %c0_5 = arith.constant 0 : index
    %c0_6 = arith.constant 0 : index
    %11 = vector.load %arg4[%c0_5, %c0_6] : memref<128x128xbf16, #tpu.memory_space<vmem>>, vector<128x128xbf16>
    %cst_7 = arith.constant dense<0.000000e+00> : vector<256x128xf32>
    %12 = tpu.matmul %10, %11, %cst_7 {dimension_numbers = #tpu.dot_dimension_numbers<[1], [0], [0], [1], [0, 0, 1, 1], [], []>} : vector<256x128xbf16>, vector<128x128xbf16>, vector<256x128xf32> -> vector<256x128xf32>
    %c0_8 = arith.constant 0 : index
    %c0_9 = arith.constant 0 : index
    %13 = vector.load %arg5[%c0_8, %c0_9] : memref<256x128xbf16, #tpu.memory_space<vmem>>, vector<256x128xbf16>
    %14 = arith.extf %13 : vector<256x128xbf16> to vector<256x128xf32>
    %15 = arith.addf %14, %12 : vector<256x128xf32>
    %16 = arith.truncf %15 : vector<256x128xf32> to vector<256x128xbf16>
    %c0_10 = arith.constant 0 : index
    %c0_11 = arith.constant 0 : index
    %17 = vector.load %arg6[%c0_10, %c0_11] : memref<256x128xbf16, #tpu.memory_space<vmem>>, vector<256x128xbf16>
    tpu.vector_store %arg6[%c0_10, %c0_11], %16 {strides = array<i32>} : memref<256x128xbf16, #tpu.memory_space<vmem>>, vector<256x128xbf16>,
    %cst_12 = arith.constant dense<0.000000e+00> : vector<128xf32>
    %18 = vector.multi_reduction <add>, %15, %cst_12 [0] : vector<256x128xf32> to vector<128xf32>
    %19 = vector.shape_cast %18 : vector<128xf32> to vector<1x128xf32>
    %20 = arith.mulf %15, %15 : vector<256x128xf32>
    %cst_13 = arith.constant dense<0.000000e+00> : vector<128xf32>
    %21 = vector.multi_reduction <add>, %20, %cst_13 [0] : vector<256x128xf32> to vector<128xf32>
    %22 = vector.shape_cast %21 : vector<128xf32> to vector<1x128xf32>
    %23 = tpu.concatenate %19, %22 in 0 : vector<1x128xf32>, vector<1x128xf32> -> vector<2x128xf32>
    %c0_14 = arith.constant 0 : index
    %c0_15 = arith.constant 0 : index
    %c0_16 = arith.constant 0 : index
    %24 = vector.load %arg7[%c0_14, %c0_15, %c0_16] : memref<1x2x128xf32, #tpu.memory_space<vmem>>, vector<1x2x128xf32>
    %25 = vector.shape_cast %24 : vector<1x2x128xf32> to vector<2x128xf32>
    %26 = vector.shape_cast %23 : vector<2x128xf32> to vector<1x2x128xf32>
    tpu.vector_store %arg7[%c0_14, %c0_15, %c0_16], %26 {strides = array<i32>} : memref<1x2x128xf32, #tpu.memory_space<vmem>>, vector<1x2x128xf32>,
    return
  }
  func.func @transform_0(%arg0: i32) -> (i32, i32) {
    %c0_i32 = arith.constant 0 : i32
    %c0_i32_0 = arith.constant 0 : i32
    return %arg0, %c0_i32 : i32, i32
  }
  func.func @transform_1(%arg0: i32) -> (i32, i32) {
    %c0_i32 = arith.constant 0 : i32
    %c0_i32_0 = arith.constant 0 : i32
    %c0_i32_1 = arith.constant 0 : i32
    return %c0_i32, %c0_i32_0 : i32, i32
  }
  func.func @transform_2(%arg0: i32) -> (i32, i32) {
    %c0_i32 = arith.constant 0 : i32
    %c0_i32_0 = arith.constant 0 : i32
    %c0_i32_1 = arith.constant 0 : i32
    return %c0_i32, %c0_i32_0 : i32, i32
  }
  func.func @transform_3(%arg0: i32) -> (i32, i32) {
    %c0_i32 = arith.constant 0 : i32
    %c0_i32_0 = arith.constant 0 : i32
    %c0_i32_1 = arith.constant 0 : i32
    return %c0_i32, %c0_i32_0 : i32, i32
  }
  func.func @transform_4(%arg0: i32) -> (i32, i32) {
    %c0_i32 = arith.constant 0 : i32
    %c0_i32_0 = arith.constant 0 : i32
    return %arg0, %c0_i32 : i32, i32
  }
  func.func @transform_5(%arg0: i32) -> (i32, i32) {
    %c0_i32 = arith.constant 0 : i32
    %c0_i32_0 = arith.constant 0 : i32
    return %arg0, %c0_i32 : i32, i32
  }
  func.func @transform_6(%arg0: i32) -> (i32, i32, i32) {
    %c0_i32 = arith.constant 0 : i32
    %c0_i32_0 = arith.constant 0 : i32
    %c0_i32_1 = arith.constant 0 : i32
    return %arg0, %c0_i32, %c0_i32_0 : i32, i32, i32
  }
}

module attributes {stable_mosaic.version = 11 : i64} {
  func.func @_bn_relu_kernel(%arg0: i32, %arg1: memref<256x128xbf16, #tpu.memory_space<vmem>>, %arg2: memref<1x128xf32, #tpu.memory_space<vmem>>, %arg3: memref<1x128xf32, #tpu.memory_space<vmem>>, %arg4: memref<256x128xf32, #tpu.memory_space<vmem>>) attributes {dimension_semantics = [#tpu.dimension_semantics<parallel>], iteration_bounds = array<i64: 2>, scalar_prefetch = 0 : i64, scratch_operands = 0 : i64, tpu.core_type = #tpu.core_type<tc>, window_params = [{transform_indices = @transform_0, window_bounds = array<i64: 256, 128>}, {pipeline_mode = #tpu.pipeline_mode<synchronous>, transform_indices = @transform_1, window_bounds = array<i64: 1, 128>}, {pipeline_mode = #tpu.pipeline_mode<synchronous>, transform_indices = @transform_2, window_bounds = array<i64: 1, 128>}, {transform_indices = @transform_3, window_bounds = array<i64: 256, 128>}]} {
    %c0 = arith.constant 0 : index
    %c0_0 = arith.constant 0 : index
    %0 = vector.load %arg1[%c0, %c0_0] : memref<256x128xbf16, #tpu.memory_space<vmem>>, vector<256x128xbf16>
    %1 = arith.extf %0 : vector<256x128xbf16> to vector<256x128xf32>
    %c0_1 = arith.constant 0 : index
    %c0_2 = arith.constant 0 : index
    %2 = vector.load %arg2[%c0_1, %c0_2] : memref<1x128xf32, #tpu.memory_space<vmem>>, vector<1x128xf32>
    %3 = vector.broadcast %2 : vector<1x128xf32> to vector<256x128xf32>
    %4 = arith.mulf %1, %3 : vector<256x128xf32>
    %c0_3 = arith.constant 0 : index
    %c0_4 = arith.constant 0 : index
    %5 = vector.load %arg3[%c0_3, %c0_4] : memref<1x128xf32, #tpu.memory_space<vmem>>, vector<1x128xf32>
    %6 = vector.broadcast %5 : vector<1x128xf32> to vector<256x128xf32>
    %7 = arith.addf %4, %6 : vector<256x128xf32>
    %cst = arith.constant 0.000000e+00 : f32
    %8 = vector.broadcast %cst : f32 to vector<256x128xf32>
    %9 = arith.maximumf %7, %8 : vector<256x128xf32>
    %c0_5 = arith.constant 0 : index
    %c0_6 = arith.constant 0 : index
    %10 = vector.load %arg4[%c0_5, %c0_6] : memref<256x128xf32, #tpu.memory_space<vmem>>, vector<256x128xf32>
    tpu.vector_store %arg4[%c0_5, %c0_6], %9 {strides = array<i32>} : memref<256x128xf32, #tpu.memory_space<vmem>>, vector<256x128xf32>,
    return
  }
  func.func @transform_0(%arg0: i32) -> (i32, i32) {
    %c0_i32 = arith.constant 0 : i32
    %c0_i32_0 = arith.constant 0 : i32
    return %arg0, %c0_i32 : i32, i32
  }
  func.func @transform_1(%arg0: i32) -> (i32, i32) {
    %c0_i32 = arith.constant 0 : i32
    %c0_i32_0 = arith.constant 0 : i32
    %c0_i32_1 = arith.constant 0 : i32
    return %c0_i32, %c0_i32_0 : i32, i32
  }
  func.func @transform_2(%arg0: i32) -> (i32, i32) {
    %c0_i32 = arith.constant 0 : i32
    %c0_i32_0 = arith.constant 0 : i32
    %c0_i32_1 = arith.constant 0 : i32
    return %c0_i32, %c0_i32_0 : i32, i32
  }
  func.func @transform_3(%arg0: i32) -> (i32, i32) {
    %c0_i32 = arith.constant 0 : i32
    %c0_i32_0 = arith.constant 0 : i32
    return %arg0, %c0_i32 : i32, i32
  }
}

</mosaic_0001>

<bundles_post_ra>
// kernel: res_block_forward.5
= control target key start
LH: loop header
LB: loop body
LE: loop exit
PB: predicated region body
PF: predicated region fallthrough
CT: control target
= control target key end

     0   :  { %s1238_s12 = smov 0   ;;  %s1414_s0 = inlined_call_operand.vmem [shape: bf16[512,128], index: 0, kind: input, shape index: {}]   ;;  %s1415_s1 = inlined_call_operand.vmem [shape: bf16[128,128], index: 1, kind: input, shape index: {}]   ;;  %s1416_s2 = inlined_call_operand.vmem [shape: bf16[512,128], index: 2, kind: output, shape index: {0}]   ;;  %s1417_s3 = inlined_call_operand.vmem [shape: f32[2,2,128], index: 3, kind: output, shape index: {1}]  }
   0x1 LB: > { %s1244_s13 = sadd.s32 4294967295, %s1216_s12   ;;  %p899_p0 = scmp.ge.s32.totalorder %s1216_s12, 1  ;;  %s1216_s12 = sphi %s1238_s12, %s14_s12  }
   0x2   : > { %p141_p1 = scmp.lt.s32.totalorder %s1216_s12, 3 }
   0x4   : > { %p142_p2 = pnand %p899_p0, %p141_p1 }
   0x5   : > { %v1186_v0 = vld [vmem:[%s1415_s1] sm:$0xff] (!%p142_p2)   ;;  %s900_s16 = sshll.u32 (!%p142_p2), %s1244_s13, 5  ;;  %v1187_v1 = vld [vmem:[%s1415_s1 + $0x8] sm:$0xff] (!%p142_p2)   ;;  %v1188_v2 = vld [vmem:[%s1415_s1 + $0x10] sm:$0xff] (!%p142_p2)   ;;  %p181_p4 = scmp.lt.s32.totalorder (!%p142_p2), %s1244_s13, 1  ;;  %vm805_vm0 = vcmask (!%p142_p2), 1040384  }
   0x6   : > { %145 = sbr.rel (%p142_p2) target bundleno = 331 (0x14b), region = 28  ;;  %p170_p3 = scmp.lt.s32.totalorder (!%p142_p2), %s900_s16, 63  ;;  %1114 = vmatprep.subr.bf16.mxu0 (!%p142_p2), %v1186_v0  ;;  %1162 = vmatprep.subr.bf16.mxu1 (!%p142_p2), %v1186_v0  ;;  %v1189_v3 = vld [vmem:[%s1415_s1 + $0x18] sm:$0xff] (!%p142_p2)   ;;  %v1190_v5 = vld [vmem:[%s1415_s1 + $0x20] sm:$0xff] (!%p142_p2)   ;;  %v1191_v6 = vld [vmem:[%s1415_s1 + $0x28] sm:$0xff] (!%p142_p2)  }
   0x7   : > { %1115 = vmatpush3.bf16.msra.mxu0 (!%p142_p2), %v1186_v0  ;;  %1170 = vmatpush3.bf16.msra.mxu1 (!%p142_p2), %v1186_v0  ;;  %v1192_v8 = vld [vmem:[%s1415_s1 + $0x30] sm:$0xff] (!%p142_p2)   ;;  %v1193_v9 = vld [vmem:[%s1415_s1 + $0x38] sm:$0xff] (!%p142_p2)  }
   0x8   : > { %1116 = vmatprep.subr.bf16.mxu0 (!%p142_p2), %v1187_v1  ;;  %1163 = vmatprep.subr.bf16.mxu1 (!%p142_p2), %v1187_v1 }
   0xb   : > { %1117 = vmatpush3.bf16.msra.mxu0 (!%p142_p2), %v1187_v1  ;;  %1171 = vmatpush3.bf16.msra.mxu1 (!%p142_p2), %v1187_v1 }
   0xc   : > { %1118 = vmatprep.subr.bf16.mxu0 (!%p142_p2), %v1188_v2  ;;  %1164 = vmatprep.subr.bf16.mxu1 (!%p142_p2), %v1188_v2 }
   0xd   : > { %s1419_s16 = smov (!%p170_p3, %s900_s16), 63  ;;  %s1421_s13 = smov (!%p181_p4, %s1244_s13), 1 }
   0xe   : > { %s901_s21 = sshll.u32 %s1419_s16, 2  ;;  %s904_s11 = sshll.u32 %s1421_s13, 1 }
   0xf   : > { %s1266_s24 = scalar_lea.vmem %s1414_s0, %s901_s21  ;;  %1119 = vmatpush3.bf16.msra.mxu0 %v1188_v2  ;;  %1172 = vmatpush3.bf16.msra.mxu1 %v1188_v2  ;;  %s1308_s10 = scalar_lea.vmem %s1416_s2, %s901_s21 }
  0x10   : > { %v1194_v4 = vld [vmem:[%s1266_s24] sm:$0xff]   ;;  %1120 = vmatprep.subr.bf16.mxu0 %v1189_v3  ;;  %1165 = vmatprep.subr.bf16.mxu1 %v1189_v3  ;;  %v1195_v10 = vld [vmem:[%s1266_s24 + $0x8] sm:$0xff]   ;;  %v1196_v12 = vld [vmem:[%s1266_s24 + $0x10] sm:$0xff]   ;;  %s184_s16 = scalar_lea.vmem %s1417_s3, %s904_s11 }
  0x11   : > { %1130 = vmatprep.mubr.bf16.mxu0 %v1194_v4  ;;  %v1202_v7 = vld [vmem:[%s1266_s24 + $0x40] sm:$0xff]   ;;  %v1203_v11 = vld [vmem:[%s1266_s24 + $0x48] sm:$0xff]   ;;  %v1204_v13 = vld [vmem:[%s1266_s24 + $0x50] sm:$0xff]  }
  0x12   : > { %1146 = vmatprep.mubr.bf16.mxu1 %v1202_v7  ;;  %v1197_v14 = vld [vmem:[%s1266_s24 + $0x18] sm:$0xff]   ;;  %v1198_v16 = vld [vmem:[%s1266_s24 + $0x20] sm:$0xff]   ;;  %v1199_v18 = vld [vmem:[%s1266_s24 + $0x28] sm:$0xff]  }
  0x13   : > { %1121 = vmatpush3.bf16.msra.mxu0 %v1189_v3  ;;  %1173 = vmatpush3.bf16.msra.mxu1 %v1189_v3  ;;  %v1205_v15 = vld [vmem:[%s1266_s24 + $0x58] sm:$0xff]   ;;  %v1206_v17 = vld [vmem:[%s1266_s24 + $0x60] sm:$0xff]   ;;  %v1207_v19 = vld [vmem:[%s1266_s24 + $0x68] sm:$0xff]  }
  0x14   : > { %1122 = vmatprep.subr.bf16.mxu0 %v1190_v5  ;;  %1166 = vmatprep.subr.bf16.mxu1 %v1190_v5  ;;  %v1200_v20 = vld [vmem:[%s1266_s24 + $0x30] sm:$0xff]   ;;  %v1201_v22 = vld [vmem:[%s1266_s24 + $0x38] sm:$0xff]  }
  0x15   : > { %v1208_v21 = vld [vmem:[%s1266_s24 + $0x70] sm:$0xff]   ;;  %v1209_v23 = vld [vmem:[%s1266_s24 + $0x78] sm:$0xff]  }
  0x17   : > { %1123 = vmatpush3.bf16.msra.mxu0 %v1190_v5  ;;  %1174 = vmatpush3.bf16.msra.mxu1 %v1190_v5 }
  0x18   : > { %1124 = vmatprep.subr.bf16.mxu0 %v1191_v6  ;;  %1167 = vmatprep.subr.bf16.mxu1 %v1191_v6 }
  0x1b   : > { %1125 = vmatpush3.bf16.msra.mxu0 %v1191_v6  ;;  %1175 = vmatpush3.bf16.msra.mxu1 %v1191_v6 }
  0x1c   : > { %1126 = vmatprep.subr.bf16.mxu0 %v1192_v8  ;;  %1168 = vmatprep.subr.bf16.mxu1 %v1192_v8 }
  0x1f   : > { %1127 = vmatpush3.bf16.msra.mxu0 %v1192_v8  ;;  %1176 = vmatpush3.bf16.msra.mxu1 %v1192_v8 }
  0x20   : > { %1128 = vmatprep.subr.bf16.mxu0 %v1193_v9  ;;  %1169 = vmatprep.subr.bf16.mxu1 %v1193_v9 }
  0x23   : > { %1129 = vmatpush3.bf16.msra.mxu0 %v1193_v9  ;;  %1177 = vmatpush3.bf16.msra.mxu1 %v1193_v9 }
  0x26   : > { %1131 = vmatmul.mubr.bf16.vlgmr.msra.gmra.mrb[0].mxu0 %v1195_v10  ;;  %1147 = vmatmul.mubr.bf16.vlgmr.msra.gmra.mrb[0].mxu1 %v1203_v11 }
  0x27   : > { %1134 = vmatprep.mubr.bf16.mxu0 %v1196_v12  ;;  %1150 = vmatprep.mubr.bf16.mxu1 %v1204_v13 }
  0x2e   : > { %1135 = vmatmul.mubr.bf16.gmra.mrb[4].mxu0 %v1197_v14  ;;  %1151 = vmatmul.mubr.bf16.gmra.mrb[4].mxu1 %v1205_v15 }
  0x2f   : > { %1138 = vmatprep.mubr.bf16.mxu0 %v1198_v16  ;;  %1154 = vmatprep.mubr.bf16.mxu1 %v1206_v17 }
  0x36   : > { %1139 = vmatmul.mubr.bf16.gmra.mrb[8].mxu0 %v1199_v18  ;;  %1155 = vmatmul.mubr.bf16.gmra.mrb[8].mxu1 %v1207_v19 }
  0x37   : > { %1142 = vmatprep.mubr.bf16.mxu0 %v1200_v20  ;;  %1158 = vmatprep.mubr.bf16.mxu1 %v1208_v21 }
  0x3e   : > { %1143 = vmatmul.mubr.bf16.gmra.mrb[12].mxu0 %v1201_v22  ;;  %1159 = vmatmul.mubr.bf16.gmra.mrb[12].mxu1 %v1209_v23 }
  0xf9   : > { %v1132_v24 = vpop.f32.mrb[0].mxu0  ;;  %v1299_v25 = vpop.f32.mrb[0].mxu1 }
  0xfa   : > { %v412_v26 = vpop.f32.mrb[1].mxu0  ;;  %v1301_v27 = vpop.f32.mrb[1].mxu1  ;;  %v738_v39 = vmul.f32 %v1132_v24, %v1132_v24 }
  0xfb   : > { %v1133_v28 = vpop.f32.mrb[2].mxu0  ;;  %v1310_v29 = vpop.f32.mrb[2].mxu1  ;;  %v736_v30 = vmul.f32 %v412_v26, %v412_v26 }
  0xfc   : > { %v1003_v31 = vpack.c.bf16 %v1133_v28, %v1132_v24  ;;  %v415_v32 = vpop.f32.mrb[3].mxu0  ;;  %v1043_v33 = vpack.c.bf16 %v1310_v29, %v1299_v25  ;;  %v1314_v34 = vpop.f32.mrb[3].mxu1  ;;  %v739_v42 = vmul.f32 %v1133_v28, %v1133_v28 }
  0xfd   : > { %v998_v35 = vpack.c.bf16 %v415_v32, %v412_v26  ;;  %v699_v36 = vadd.f32 %v415_v32, %v412_v26  ;;  %v737_v37 = vmul.f32 %v415_v32, %v415_v32  ;;  %v1038_v38 = vpack.c.bf16 %v1314_v34, %v1301_v27 }
  0xfe   : > { %1075 = vst [vmem:[%s1308_s10 + $0x8] sm:$0xff] %v1003_v31   ;;  %1083 = vst [vmem:[%s1308_s10 + $0x48] sm:$0xff] %v1043_v33  }
  0xff   : > { %999 = vst [vmem:[%s1308_s10] sm:$0xff] %v998_v35   ;;  %v700_v40 = vadd.f32 %v1132_v24, %v699_v36  ;;  %v768_v41 = vadd.f32 %v737_v37, %v736_v30  ;;  %1082 = vst [vmem:[%s1308_s10 + $0x40] sm:$0xff] %v1038_v38  }
 0x101   : > { %v769_v43 = vadd.f32 %v768_v41, %v738_v39  ;;  %v1136_v44 = vpop.f32.mrb[4].mxu0  ;;  %v701_v45 = vadd.f32 %v1133_v28, %v700_v40  ;;  %v1322_v46 = vpop.f32.mrb[4].mxu1 }
 0x102   : > { %v428_v47 = vpop.f32.mrb[5].mxu0  ;;  %v1324_v48 = vpop.f32.mrb[5].mxu1  ;;  %v742_v63 = vmul.f32 %v1136_v44, %v1136_v44 }
 0x103   : > { %v702_v49 = vadd.f32 %v701_v45, %v428_v47  ;;  %v740_v50 = vmul.f32 %v428_v47, %v428_v47  ;;  %v770_v51 = vadd.f32 %v769_v43, %v739_v42  ;;  %v1137_v52 = vpop.f32.mrb[6].mxu0  ;;  %v1326_v53 = vpop.f32.mrb[6].mxu1 }
 0x104   : > { %v1013_v54 = vpack.c.bf16 %v1137_v52, %v1136_v44  ;;  %v431_v55 = vpop.f32.mrb[7].mxu0  ;;  %v1053_v56 = vpack.c.bf16 %v1326_v53, %v1322_v46  ;;  %v1330_v57 = vpop.f32.mrb[7].mxu1  ;;  %v743_v2 = vmul.f32 %v1137_v52, %v1137_v52 }
 0x105   : > { %v771_v58 = vadd.f32 %v770_v51, %v740_v50  ;;  %v1008_v59 = vpack.c.bf16 %v431_v55, %v428_v47  ;;  %v703_v60 = vadd.f32 %v702_v49, %v431_v55  ;;  %v741_v61 = vmul.f32 %v431_v55, %v431_v55 }
 0x106   : > { %1077 = vst [vmem:[%s1308_s10 + $0x18] sm:$0xff] %v1013_v54   ;;  %1085 = vst [vmem:[%s1308_s10 + $0x58] sm:$0xff] %v1053_v56   ;;  %v1048_v62 = vpack.c.bf16 %v1330_v57, %v1324_v48 }
 0x107   : > { %1076 = vst [vmem:[%s1308_s10 + $0x10] sm:$0xff] %v1008_v59   ;;  %v704_v0 = vadd.f32 %v1136_v44, %v703_v60  ;;  %v772_v1 = vadd.f32 %v771_v58, %v741_v61  ;;  %v752_v61 = vmul.f32 %v1301_v27, %v1301_v27 }
 0x108   : > { %1084 = vst [vmem:[%s1308_s10 + $0x50] sm:$0xff] %v1048_v62  }
 0x109   : > { %v773_v3 = vadd.f32 %v772_v1, %v742_v63  ;;  %v1140_v4 = vpop.f32.mrb[8].mxu0  ;;  %v705_v5 = vadd.f32 %v1137_v52, %v704_v0  ;;  %v1338_v6 = vpop.f32.mrb[8].mxu1 }
 0x10a   : > { %v444_v7 = vpop.f32.mrb[9].mxu0  ;;  %v1340_v8 = vpop.f32.mrb[9].mxu1  ;;  %v746_v23 = vmul.f32 %v1140_v4, %v1140_v4 }
 0x10b   : > { %v706_v9 = vadd.f32 %v705_v5, %v444_v7  ;;  %v744_v10 = vmul.f32 %v444_v7, %v444_v7  ;;  %v774_v11 = vadd.f32 %v773_v3, %v743_v2  ;;  %v1141_v12 = vpop.f32.mrb[10].mxu0  ;;  %v1342_v13 = vpop.f32.mrb[10].mxu1  ;;  %v753_v2 = vmul.f32 %v1314_v34, %v1314_v34 }
 0x10c   : > { %v1023_v14 = vpack.c.bf16 %v1141_v12, %v1140_v4  ;;  %v447_v15 = vpop.f32.mrb[11].mxu0  ;;  %v1063_v16 = vpack.c.bf16 %v1342_v13, %v1338_v6  ;;  %v1346_v17 = vpop.f32.mrb[11].mxu1  ;;  %v747_v28 = vmul.f32 %v1141_v12, %v1141_v12  ;;  %v754_v3 = vmul.f32 %v1299_v25, %v1299_v25 }
 0x10d   : > { %v775_v18 = vadd.f32 %v774_v11, %v744_v10  ;;  %v1018_v19 = vpack.c.bf16 %v447_v15, %v444_v7  ;;  %v707_v20 = vadd.f32 %v706_v9, %v447_v15  ;;  %v745_v21 = vmul.f32 %v447_v15, %v447_v15 }
 0x10e   : > { %1079 = vst [vmem:[%s1308_s10 + $0x28] sm:$0xff] %v1023_v14   ;;  %1087 = vst [vmem:[%s1308_s10 + $0x68] sm:$0xff] %v1063_v16   ;;  %v1058_v22 = vpack.c.bf16 %v1346_v17, %v1340_v8  ;;  %v755_v7 = vmul.f32 %v1310_v29, %v1310_v29  ;;  %v757_v15 = vmul.f32 %v1330_v57, %v1330_v57 }
 0x10f   : > { %1078 = vst [vmem:[%s1308_s10 + $0x20] sm:$0xff] %v1018_v19   ;;  %v708_v24 = vadd.f32 %v1140_v4, %v707_v20  ;;  %v776_v26 = vadd.f32 %v775_v18, %v745_v21 }
 0x110   : > { %1086 = vst [vmem:[%s1308_s10 + $0x60] sm:$0xff] %v1058_v22  }
 0x111   : > { %v777_v30 = vadd.f32 %v776_v26, %v746_v23  ;;  %v1144_v31 = vpop.f32.mrb[12].mxu0  ;;  %v709_v32 = vadd.f32 %v1141_v12, %v708_v24  ;;  %v1354_v33 = vpop.f32.mrb[12].mxu1  ;;  %v761_v24 = vmul.f32 %v1346_v17, %v1346_v17 }
 0x112   : > { %v460_v35 = vpop.f32.mrb[13].mxu0  ;;  %v524_v36 = vpop.f32.mrb[13].mxu1  ;;  %v750_v54 = vmul.f32 %v1144_v31, %v1144_v31 }
 0x113   : > { %v710_v37 = vadd.f32 %v709_v32, %v460_v35  ;;  %v748_v38 = vmul.f32 %v460_v35, %v460_v35  ;;  %v778_v39 = vadd.f32 %v777_v30, %v747_v28  ;;  %v1145_v40 = vpop.f32.mrb[14].mxu0  ;;  %v1356_v41 = vpop.f32.mrb[14].mxu1 }
 0x114   : > { %v1033_v42 = vpack.c.bf16 %v1145_v40, %v1144_v31  ;;  %v463_v43 = vpop.f32.mrb[15].mxu0  ;;  %v1073_v44 = vpack.c.bf16 %v1356_v41, %v1354_v33  ;;  %v527_v45 = vpop.f32.mrb[15].mxu1  ;;  %v751_v58 = vmul.f32 %v1145_v40, %v1145_v40 }
 0x115   : > { %v779_v47 = vadd.f32 %v778_v39, %v748_v38  ;;  %v1028_v49 = vpack.c.bf16 %v463_v43, %v460_v35  ;;  %v711_v50 = vadd.f32 %v710_v37, %v463_v43  ;;  %v749_v51 = vmul.f32 %v463_v43, %v463_v43 }
 0x116   : > { %1081 = vst [vmem:[%s1308_s10 + $0x38] sm:$0xff] %v1033_v42   ;;  %1089 = vst [vmem:[%s1308_s10 + $0x78] sm:$0xff] %v1073_v44   ;;  %v1068_v52 = vpack.c.bf16 %v527_v45, %v524_v36  ;;  %v766_v39 = vmul.f32 %v1354_v33, %v1354_v33  ;;  %v767_v42 = vmul.f32 %v1356_v41, %v1356_v41 }
 0x117   : > { %1080 = vst [vmem:[%s1308_s10 + $0x30] sm:$0xff] %v1028_v49   ;;  %v712_v55 = vadd.f32 %v1144_v31, %v711_v50  ;;  %v780_v56 = vadd.f32 %v779_v47, %v749_v51  ;;  %v764_v31 = vmul.f32 %v524_v36, %v524_v36 }
 0x118   : > { %1088 = vst [vmem:[%s1308_s10 + $0x70] sm:$0xff] %v1068_v52  }
 0x119   : > { %v781_v59 = vadd.f32 %v780_v56, %v750_v54  ;;  %v713_v60 = vadd.f32 %v1145_v40, %v712_v55 }
 0x11b   : > { %v714_v62 = vadd.f32 %v713_v60, %v1301_v27  ;;  %v782_v63 = vadd.f32 %v781_v59, %v751_v58  ;;  %v756_v27 = vmul.f32 %v1324_v48, %v1324_v48 }
 0x11d   : > { %v783_v0 = vadd.f32 %v782_v63, %v752_v61  ;;  %v715_v1 = vadd.f32 %v714_v62, %v1314_v34 }
 0x11f   : > { %v716_v4 = vadd.f32 %v1299_v25, %v715_v1  ;;  %v784_v5 = vadd.f32 %v783_v0, %v753_v2  ;;  %v758_v25 = vmul.f32 %v1322_v46, %v1322_v46 }
 0x121   : > { %v785_v9 = vadd.f32 %v784_v5, %v754_v3  ;;  %v717_v10 = vadd.f32 %v1310_v29, %v716_v4  ;;  %v759_v29 = vmul.f32 %v1326_v53, %v1326_v53 }
 0x123   : > { %v718_v11 = vadd.f32 %v717_v10, %v1324_v48  ;;  %v786_v12 = vadd.f32 %v785_v9, %v755_v7  ;;  %v760_v48 = vmul.f32 %v1340_v8, %v1340_v8 }
 0x125   : > { %v787_v14 = vadd.f32 %v786_v12, %v756_v27  ;;  %v719_v34 = vadd.f32 %v718_v11, %v1330_v57 }
 0x127   : > { %v720_v16 = vadd.f32 %v1322_v46, %v719_v34  ;;  %v788_v18 = vadd.f32 %v787_v14, %v757_v15  ;;  %v762_v46 = vmul.f32 %v1338_v6, %v1338_v6 }
 0x129   : > { %v789_v19 = vadd.f32 %v788_v18, %v758_v25  ;;  %v721_v20 = vadd.f32 %v1326_v53, %v720_v16  ;;  %v763_v53 = vmul.f32 %v1342_v13, %v1342_v13 }
 0x12b   : > { %v722_v21 = vadd.f32 %v721_v20, %v1340_v8  ;;  %v790_v22 = vadd.f32 %v789_v19, %v759_v29 }
 0x12d   : > { %v791_v23 = vadd.f32 %v790_v22, %v760_v48  ;;  %v723_v57 = vadd.f32 %v722_v21, %v1346_v17  ;;  %v765_v17 = vmul.f32 %v527_v45, %v527_v45 }
 0x12f   : > { %v724_v26 = vadd.f32 %v1338_v6, %v723_v57  ;;  %v792_v28 = vadd.f32 %v791_v23, %v761_v24 }
 0x131   : > { %v793_v30 = vadd.f32 %v792_v28, %v762_v46  ;;  %v725_v8 = vadd.f32 %v1342_v13, %v724_v26 }
 0x133   : > { %v726_v32 = vadd.f32 %v725_v8, %v524_v36  ;;  %v794_v35 = vadd.f32 %v793_v30, %v763_v53 }
 0x135   : > { %v795_v37 = vadd.f32 %v794_v35, %v764_v31  ;;  %v727_v38 = vadd.f32 %v726_v32, %v527_v45 }
 0x137   : > { %v728_v6 = vadd.f32 %v1354_v33, %v727_v38  ;;  %v796_v40 = vadd.f32 %v795_v37, %v765_v17 }
 0x139   : > { %v729_v43 = vadd.f32 %v1356_v41, %v728_v6  ;;  %v797_v44 = vadd.f32 %v796_v40, %v766_v39 }
 0x13b   : > { %v730_v13 = vrot.slane %v729_v43, 4  ;;  %v798_v47 = vadd.f32 %v797_v44, %v767_v42 }
 0x13d   : > { %v731_v36 = vadd.f32 %v730_v13, %v729_v43  ;;  %v799_v49 = vrot.slane %v798_v47, 4 }
 0x13f   : > { %v732_v50 = vrot.slane %v731_v36, 2  ;;  %v800_v51 = vadd.f32 %v799_v49, %v798_v47 }
 0x141   : > { %v733_v45 = vadd.f32 %v732_v50, %v731_v36  ;;  %v801_v52 = vrot.slane %v800_v51, 2 }
 0x143   : > { %v734_v54 = vrot.slane %v733_v45, 1  ;;  %v802_v55 = vadd.f32 %v801_v52, %v800_v51 }
 0x145   : > { %v803_v33 = vrot.slane %v802_v55, 1  ;;  %v735_v41 = vadd.f32 %v734_v54, %v733_v45 }
 0x147   : > { %v804_v56 = vadd.f32 %v803_v33, %v802_v55 }
 0x149   : > { %v806_v58 = vsel %vm805_vm0, %v735_v41, %v804_v56 }
 0x14a   : > { %807 = vst [vmem:[%s184_s16] sm:$0x3] %v806_v58 }
 0x14b PF: > { %s14_s12 = sadd.s32 1, %s1216_s12  }
 0x14c   : > { %p11_p5 = scmp.ge.s32.totalorder %s14_s12, 4  }
 0x14e   :  { %13 = sbr.rel (!%p11_p5) target bundleno = 1 (0x1), region = 70 }

// kernel: res_block_forward.7
= control target key start
LH: loop header
LB: loop body
LE: loop exit
PB: predicated region body
PF: predicated region fallthrough
CT: control target
= control target key end

     0   :  { %s1413_s18 = smov 0   ;;  %s1681_s0 = inlined_call_operand.vmem [shape: bf16[512,128], index: 0, kind: input, shape index: {}]   ;;  %s1682_s1 = inlined_call_operand.vmem [shape: f32[1,128], index: 1, kind: input, shape index: {}]   ;;  %s1683_s2 = inlined_call_operand.vmem [shape: f32[1,128], index: 2, kind: input, shape index: {}]   ;;  %s1684_s3 = inlined_call_operand.vmem [shape: bf16[128,128], index: 3, kind: input, shape index: {}]   ;;  %s1685_s4 = inlined_call_operand.vmem [shape: bf16[512,128], index: 4, kind: output, shape index: {0}]   ;;  %s1686_s5 = inlined_call_operand.vmem [shape: f32[2,2,128], index: 5, kind: output, shape index: {1}]  }
   0x1 LB: > { %s1419_s19 = sadd.s32 4294967295, %s1381_s18   ;;  %p1015_p0 = scmp.ge.s32.totalorder %s1381_s18, 1  ;;  %s1381_s18 = sphi %s1413_s18, %s16_s18  }
   0x2   : > { %p191_p1 = scmp.lt.s32.totalorder %s1381_s18, 3 }
   0x4   : > { %p192_p2 = pnand %p1015_p0, %p191_p1 }
   0x5   : > { %v1367_v0 = vld [vmem:[%s1684_s3] sm:$0xff] (!%p192_p2)   ;;  %s1016_s22 = sshll.u32 (!%p192_p2), %s1419_s19, 5  ;;  %v1368_v1 = vld [vmem:[%s1684_s3 + $0x8] sm:$0xff] (!%p192_p2)   ;;  %v1369_v2 = vld [vmem:[%s1684_s3 + $0x10] sm:$0xff] (!%p192_p2)   ;;  %p235_p4 = scmp.lt.s32.totalorder (!%p192_p2), %s1419_s19, 1  ;;  %vm921_vm0 = vcmask (!%p192_p2), 1040384  }
   0x6   : > { %195 = sbr.rel (%p192_p2) target bundleno = 331 (0x14b), region = 36  ;;  %p224_p3 = scmp.lt.s32.totalorder (!%p192_p2), %s1016_s22, 63  ;;  %1295 = vmatprep.subr.bf16.mxu0 (!%p192_p2), %v1367_v0  ;;  %1343 = vmatprep.subr.bf16.mxu1 (!%p192_p2), %v1367_v0  ;;  %v1370_v3 = vld [vmem:[%s1684_s3 + $0x18] sm:$0xff] (!%p192_p2)   ;;  %v1450_v5 = vld [vmem:[%s1682_s1] ss:$0 sm:$0xff] (!%p192_p2)  ;;  %v1372_v34 = vld [vmem:[%s1684_s3 + $0x28] sm:$0xff] (!%p192_p2)  }
   0x7   : > { %1296 = vmatpush3.bf16.msra.mxu0 (!%p192_p2), %v1367_v0  ;;  %1351 = vmatpush3.bf16.msra.mxu1 (!%p192_p2), %v1367_v0  ;;  %v1458_v11 = vld [vmem:[%s1683_s2] ss:$0 sm:$0xff] (!%p192_p2)  ;;  %v1373_v49 = vld [vmem:[%s1684_s3 + $0x30] sm:$0xff] (!%p192_p2)   ;;  %v1374_v63 = vld [vmem:[%s1684_s3 + $0x38] sm:$0xff] (!%p192_p2)  }
   0x8   : > { %1297 = vmatprep.subr.bf16.mxu0 (!%p192_p2), %v1368_v1  ;;  %1344 = vmatprep.subr.bf16.mxu1 (!%p192_p2), %v1368_v1  ;;  %v1371_v20 = vld [vmem:[%s1684_s3 + $0x20] sm:$0xff] (!%p192_p2)  }
   0xb   : > { %1298 = vmatpush3.bf16.msra.mxu0 (!%p192_p2), %v1368_v1  ;;  %1352 = vmatpush3.bf16.msra.mxu1 (!%p192_p2), %v1368_v1 }
   0xc   : > { %1299 = vmatprep.subr.bf16.mxu0 (!%p192_p2), %v1369_v2  ;;  %1345 = vmatprep.subr.bf16.mxu1 (!%p192_p2), %v1369_v2 }
   0xd   : > { %s1688_s22 = smov (!%p224_p3, %s1016_s22), 63  ;;  %s1690_s19 = smov (!%p235_p4, %s1419_s19), 1 }
   0xe   : > { %s1017_s27 = sshll.u32 %s1688_s22, 2  ;;  %s1020_s22 = sshll.u32 %s1690_s19, 1 }
   0xf   : > { %s1441_s30 = scalar_lea.vmem %s1681_s0, %s1017_s27  ;;  %1300 = vmatpush3.bf16.msra.mxu0 %v1369_v2  ;;  %1353 = vmatpush3.bf16.msra.mxu1 %v1369_v2  ;;  %s1583_s25 = scalar_lea.vmem %s1685_s4, %s1017_s27 }
  0x10   : > { %v1098_v4 = vld [vmem:[%s1441_s30] sm:$0xff]   ;;  %v1241_v8 = vld [vmem:[%s1441_s30 + $0x8] sm:$0xff]   ;;  %v1242_v9 = vld [vmem:[%s1441_s30 + $0x10] sm:$0xff]   ;;  %1301 = vmatprep.subr.bf16.mxu0 %v1370_v3  ;;  %1346 = vmatprep.subr.bf16.mxu1 %v1370_v3  ;;  %s238_s28 = scalar_lea.vmem %s1686_s5, %s1020_s22 }
  0x11   : > { %v1099_v6 = vunpack.c.l.bf16 %v1098_v4  ;;  %v1100_v7 = vunpack.c.h.bf16 %v1098_v4  ;;  %v1243_v10 = vld [vmem:[%s1441_s30 + $0x18] sm:$0xff]   ;;  %v1103_v12 = vunpack.c.l.bf16 %v1241_v8  ;;  %v1104_v13 = vunpack.c.h.bf16 %v1241_v8  ;;  %v1244_v29 = vld [vmem:[%s1441_s30 + $0x20] sm:$0xff]   ;;  %v1245_v33 = vld [vmem:[%s1441_s30 + $0x28] sm:$0xff]  }
  0x12   : > { %v1107_v14 = vunpack.c.l.bf16 %v1242_v9  ;;  %v1108_v15 = vunpack.c.h.bf16 %v1242_v9  ;;  %v1111_v18 = vunpack.c.l.bf16 %v1243_v10  ;;  %v1112_v19 = vunpack.c.h.bf16 %v1243_v10  ;;  %v1246_v42 = vld [vmem:[%s1441_s30 + $0x30] sm:$0xff]   ;;  %v1487_v48 = vld [vmem:[%s1441_s30 + $0x38] sm:$0xff]   ;;  %v1248_v60 = vld [vmem:[%s1441_s30 + $0x40] sm:$0xff]  }
  0x13   : > { %v311_v16 = vmul.f32 %v1099_v6, %v1450_v5  ;;  %v312_v17 = vmul.f32 %v1100_v7, %v1450_v5  ;;  %v313_v21 = vmul.f32 %v1103_v12, %v1450_v5  ;;  %v314_v22 = vmul.f32 %v1104_v13, %v1450_v5  ;;  %1302 = vmatpush3.bf16.msra.mxu0 %v1370_v3  ;;  %v1250_v9 = vld [vmem:[%s1441_s30 + $0x50] sm:$0xff]  }
  0x14   : > { %v315_v23 = vmul.f32 %v1107_v14, %v1450_v5  ;;  %v316_v24 = vmul.f32 %v1108_v15, %v1450_v5  ;;  %v317_v27 = vmul.f32 %v1111_v18, %v1450_v5  ;;  %v318_v28 = vmul.f32 %v1112_v19, %v1450_v5  ;;  %1354 = vmatpush3.bf16.msra.mxu1 %v1370_v3  ;;  %v1249_v3 = vld [vmem:[%s1441_s30 + $0x48] sm:$0xff]   ;;  %v1251_v19 = vld [vmem:[%s1441_s30 + $0x58] sm:$0xff]  }
  0x15   : > { %v350_v25 = vadd.f32 %v1458_v11, %v311_v16  ;;  %v351_v26 = vadd.f32 %v1458_v11, %v312_v17  ;;  %v352_v32 = vadd.f32 %v1458_v11, %v313_v21  ;;  %1303 = vmatprep.subr.bf16.mxu0 %v1371_v20  ;;  %v353_v35 = vadd.f32 %v1458_v11, %v314_v22 }
  0x16   : > { %v354_v36 = vadd.f32 %v1458_v11, %v315_v23  ;;  %v355_v37 = vadd.f32 %v1458_v11, %v316_v24  ;;  %1347 = vmatprep.subr.bf16.mxu1 %v1371_v20  ;;  %v356_v39 = vadd.f32 %v1458_v11, %v317_v27  ;;  %v357_v40 = vadd.f32 %v1458_v11, %v318_v28 }
  0x17   : > { %v382_v30 = vmax.f32 %v350_v25, 0.0  ;;  %v383_v31 = vmax.f32 %v351_v26, 0.0  ;;  %v1115_v41 = vunpack.c.l.bf16 %v1244_v29  ;;  %v1116_v43 = vunpack.c.h.bf16 %v1244_v29  ;;  %1304 = vmatpush3.bf16.msra.mxu0 %v1371_v20 }
  0x18   : > { %v1119_v44 = vunpack.c.l.bf16 %v1245_v33  ;;  %v384_v45 = vmax.f32 %v352_v32, 0.0  ;;  %v1120_v47 = vunpack.c.h.bf16 %v1245_v33  ;;  %1305 = vmatprep.subr.bf16.mxu0 %v1372_v34  ;;  %v385_v50 = vmax.f32 %v353_v35, 0.0  ;;  %1355 = vmatpush3.bf16.msra.mxu1 %v1371_v20  ;;  %v1252_v32 = vld [vmem:[%s1441_s30 + $0x60] sm:$0xff]  }
  0x19   : > { %v414_v38 = vpack.c.bf16 %v383_v31, %v382_v30  ;;  %v319_v46 = vmul.f32 %v1115_v41, %v1450_v5  ;;  %v386_v51 = vmax.f32 %v354_v36, 0.0  ;;  %v387_v52 = vmax.f32 %v355_v37, 0.0  ;;  %1348 = vmatprep.subr.bf16.mxu1 %v1372_v34 }
  0x1a   : > { %v1123_v53 = vunpack.c.l.bf16 %v1246_v42  ;;  %v388_v54 = vmax.f32 %v356_v39, 0.0  ;;  %v389_v55 = vmax.f32 %v357_v40, 0.0  ;;  %v320_v56 = vmul.f32 %v1116_v43, %v1450_v5 }
  0x1b   : > { %1311 = vmatprep.mubr.bf16.mxu0 %v414_v38  ;;  %v321_v57 = vmul.f32 %v1119_v44, %v1450_v5  ;;  %v1124_v58 = vunpack.c.h.bf16 %v1246_v42  ;;  %v1127_v59 = vunpack.c.l.bf16 %v1487_v48  ;;  %1306 = vmatpush3.bf16.msra.mxu0 %v1372_v34  ;;  %v1497_v61 = vadd.f32 %v1458_v11, %v319_v46 }
  0x1c   : > { %v322_v62 = vmul.f32 %v1120_v47, %v1450_v5  ;;  %1307 = vmatprep.subr.bf16.mxu0 %v1373_v49  ;;  %v415_v0 = vpack.c.bf16 %v385_v50, %v384_v45  ;;  %v416_v1 = vpack.c.bf16 %v387_v52, %v386_v51  ;;  %1356 = vmatpush3.bf16.msra.mxu1 %v1372_v34  ;;  %v1128_v7 = vunpack.c.h.bf16 %v1487_v48  ;;  %v1253_v45 = vld [vmem:[%s1441_s30 + $0x68] sm:$0xff]  }
  0x1d   : > { %v323_v2 = vmul.f32 %v1123_v53, %v1450_v5  ;;  %v1505_v4 = vpack.c.bf16 %v389_v55, %v388_v54  ;;  %v1508_v6 = vadd.f32 %v1458_v11, %v320_v56  ;;  %1349 = vmatprep.subr.bf16.mxu1 %v1373_v49  ;;  %v1131_v8 = vunpack.c.l.bf16 %v1248_v60  ;;  %v1254_v55 = vld [vmem:[%s1441_s30 + $0x70] sm:$0xff]  }
  0x1e   : > { %v1513_v10 = vadd.f32 %v1458_v11, %v321_v57  ;;  %v1516_v12 = vmul.f32 %v1124_v58, %v1450_v5  ;;  %v1519_v13 = vmul.f32 %v1127_v59, %v1450_v5  ;;  %v1132_v14 = vunpack.c.h.bf16 %v1248_v60 }
  0x1f   : > { %1308 = vmatpush3.bf16.msra.mxu0 %v1373_v49  ;;  %v390_v15 = vmax.f32 %v1497_v61, 0.0  ;;  %v1523_v16 = vadd.f32 %v1458_v11, %v322_v62  ;;  %v327_v17 = vmul.f32 %v1131_v8, %v1450_v5  ;;  %v1135_v18 = vunpack.c.l.bf16 %v1249_v3 }
  0x20   : > { %1309 = vmatprep.subr.bf16.mxu0 %v1374_v63  ;;  %1357 = vmatpush3.bf16.msra.mxu1 %v1373_v49  ;;  %v1528_v20 = vadd.f32 %v1458_v11, %v323_v2  ;;  %v328_v21 = vmul.f32 %v1132_v14, %v1450_v5  ;;  %v1136_v22 = vunpack.c.h.bf16 %v1249_v3  ;;  %v1139_v23 = vunpack.c.l.bf16 %v1250_v9 }
  0x21   : > { %v391_v24 = vmax.f32 %v1508_v6, 0.0  ;;  %1350 = vmatprep.subr.bf16.mxu1 %v1374_v63  ;;  %v366_v25 = vadd.f32 %v1458_v11, %v327_v17  ;;  %v329_v26 = vmul.f32 %v1135_v18, %v1450_v5  ;;  %v1140_v27 = vunpack.c.h.bf16 %v1250_v9  ;;  %v1255_v17 = vld [vmem:[%s1441_s30 + $0x78] sm:$0xff]  }
  0x22   : > { %v367_v28 = vadd.f32 %v1458_v11, %v328_v21  ;;  %v330_v29 = vmul.f32 %v1136_v22, %v1450_v5  ;;  %v331_v30 = vmul.f32 %v1139_v23, %v1450_v5  ;;  %v1143_v31 = vunpack.c.l.bf16 %v1251_v19 }
  0x23   : > { %1310 = vmatpush3.bf16.msra.mxu0 %v1374_v63  ;;  %v398_v33 = vmax.f32 %v366_v25, 0.0  ;;  %v368_v34 = vadd.f32 %v1458_v11, %v329_v26  ;;  %v332_v35 = vmul.f32 %v1140_v27, %v1450_v5  ;;  %v1144_v36 = vunpack.c.h.bf16 %v1251_v19 }
  0x24   : > { %1358 = vmatpush3.bf16.msra.mxu1 %v1374_v63  ;;  %v399_v37 = vmax.f32 %v367_v28, 0.0  ;;  %v369_v38 = vadd.f32 %v1458_v11, %v330_v29  ;;  %v370_v39 = vadd.f32 %v1458_v11, %v331_v30  ;;  %v333_v40 = vmul.f32 %v1143_v31, %v1450_v5 }
  0x25   : > { %v400_v41 = vmax.f32 %v368_v34, 0.0  ;;  %v371_v42 = vadd.f32 %v1458_v11, %v332_v35  ;;  %v334_v43 = vmul.f32 %v1144_v36, %v1450_v5  ;;  %v1147_v44 = vunpack.c.l.bf16 %v1252_v32 }
  0x26   : > { %1312 = vmatmul.mubr.bf16.vlgmr.msra.gmra.mrb[0].mxu0 %v415_v0  ;;  %v422_v46 = vpack.c.bf16 %v399_v37, %v398_v33  ;;  %v401_v47 = vmax.f32 %v369_v38, 0.0  ;;  %v402_v49 = vmax.f32 %v370_v39, 0.0  ;;  %v372_v50 = vadd.f32 %v1458_v11, %v333_v40 }
  0x27   : > { %1315 = vmatprep.mubr.bf16.mxu0 %v416_v1  ;;  %v403_v51 = vmax.f32 %v371_v42, 0.0  ;;  %v373_v52 = vadd.f32 %v1458_v11, %v334_v43  ;;  %v1148_v53 = vunpack.c.h.bf16 %v1252_v32  ;;  %v335_v54 = vmul.f32 %v1147_v44, %v1450_v5 }
  0x28   : > { %1327 = vmatprep.mubr.bf16.mxu1 %v422_v46  ;;  %v423_v56 = vpack.c.bf16 %v401_v47, %v400_v41  ;;  %v404_v57 = vmax.f32 %v372_v50, 0.0  ;;  %v1151_v58 = vunpack.c.l.bf16 %v1253_v45  ;;  %v1152_v59 = vunpack.c.h.bf16 %v1253_v45 }
  0x29   : > { %v424_v60 = vpack.c.bf16 %v403_v51, %v402_v49  ;;  %v405_v61 = vmax.f32 %v373_v52, 0.0  ;;  %v336_v62 = vmul.f32 %v1148_v53, %v1450_v5  ;;  %v374_v63 = vadd.f32 %v1458_v11, %v335_v54 }
  0x2a   : > { %1328 = vmatmul.mubr.bf16.vlgmr.msra.gmra.mrb[0].mxu1 %v423_v56  ;;  %v337_v0 = vmul.f32 %v1151_v58, %v1450_v5  ;;  %v338_v1 = vmul.f32 %v1152_v59, %v1450_v5  ;;  %v1155_v2 = vunpack.c.l.bf16 %v1254_v55  ;;  %v1156_v3 = vunpack.c.h.bf16 %v1254_v55 }
  0x2b   : > { %v418_v6 = vpack.c.bf16 %v391_v24, %v390_v15  ;;  %v363_v8 = vadd.f32 %v1458_v11, %v1516_v12  ;;  %1331 = vmatprep.mubr.bf16.mxu1 %v424_v60  ;;  %v375_v9 = vadd.f32 %v1458_v11, %v336_v62  ;;  %v406_v14 = vmax.f32 %v374_v63, 0.0 }
  0x2c   : > { %v392_v18 = vmax.f32 %v1513_v10, 0.0  ;;  %v326_v19 = vmul.f32 %v1128_v7, %v1450_v5  ;;  %v339_v21 = vmul.f32 %v1155_v2, %v1450_v5  ;;  %v340_v22 = vmul.f32 %v1156_v3, %v1450_v5 }
  0x2d   : > { %v393_v15 = vmax.f32 %v1523_v16, 0.0  ;;  %v394_v23 = vmax.f32 %v1528_v20, 0.0  ;;  %v425_v12 = vpack.c.bf16 %v405_v61, %v404_v57  ;;  %v407_v24 = vmax.f32 %v375_v9, 0.0 }
  0x2e   : > { %1316 = vmatmul.mubr.bf16.gmra.mrb[4].mxu0 %v1505_v4  ;;  %v376_v25 = vadd.f32 %v1458_v11, %v337_v0  ;;  %v377_v10 = vadd.f32 %v1458_v11, %v338_v1  ;;  %v1159_v26 = vunpack.c.l.bf16 %v1255_v17  ;;  %v1160_v27 = vunpack.c.h.bf16 %v1255_v17 }
  0x2f   : > { %1319 = vmatprep.mubr.bf16.mxu0 %v418_v6  ;;  %v395_v48 = vmax.f32 %v363_v8, 0.0  ;;  %v426_v7 = vpack.c.bf16 %v407_v24, %v406_v14  ;;  %v378_v28 = vadd.f32 %v1458_v11, %v339_v21  ;;  %v379_v29 = vadd.f32 %v1458_v11, %v340_v22 }
  0x30   : > { %v419_v16 = vpack.c.bf16 %v393_v15, %v392_v18  ;;  %v364_v20 = vadd.f32 %v1458_v11, %v1519_v13  ;;  %v365_v30 = vadd.f32 %v1458_v11, %v326_v19  ;;  %v408_v4 = vmax.f32 %v376_v25, 0.0 }
  0x31   : > { %v409_v31 = vmax.f32 %v377_v10, 0.0  ;;  %v341_v32 = vmul.f32 %v1159_v26, %v1450_v5  ;;  %v342_v33 = vmul.f32 %v1160_v27, %v1450_v5  ;;  %v420_v34 = vpack.c.bf16 %v395_v48, %v394_v23 }
  0x32   : > { %1332 = vmatmul.mubr.bf16.gmra.mrb[4].mxu1 %v425_v12  ;;  %v410_v35 = vmax.f32 %v378_v28, 0.0  ;;  %v411_v36 = vmax.f32 %v379_v29, 0.0  ;;  %v396_v37 = vmax.f32 %v364_v20, 0.0  ;;  %v397_v38 = vmax.f32 %v365_v30, 0.0 }
  0x33   : > { %1335 = vmatprep.mubr.bf16.mxu1 %v426_v7  ;;  %v427_v39 = vpack.c.bf16 %v409_v31, %v408_v4  ;;  %v380_v13 = vadd.f32 %v1458_v11, %v341_v32  ;;  %v381_v40 = vadd.f32 %v1458_v11, %v342_v33 }
  0x34   : > { %v428_v41 = vpack.c.bf16 %v411_v36, %v410_v35  ;;  %v421_v42 = vpack.c.bf16 %v397_v38, %v396_v37 }
  0x35   : > { %v412_v43 = vmax.f32 %v380_v13, 0.0  ;;  %v413_v44 = vmax.f32 %v381_v40, 0.0 }
  0x36   : > { %1320 = vmatmul.mubr.bf16.gmra.mrb[8].mxu0 %v419_v16 }
  0x37   : > { %1323 = vmatprep.mubr.bf16.mxu0 %v420_v34  ;;  %v429_v5 = vpack.c.bf16 %v413_v44, %v412_v43 }
  0x3a   : > { %1336 = vmatmul.mubr.bf16.gmra.mrb[8].mxu1 %v427_v39 }
  0x3b   : > { %1339 = vmatprep.mubr.bf16.mxu1 %v428_v41 }
  0x3e   : > { %1324 = vmatmul.mubr.bf16.gmra.mrb[12].mxu0 %v421_v42 }
  0x42   : > { %1340 = vmatmul.mubr.bf16.gmra.mrb[12].mxu1 %v429_v5 }
  0xf9   : > { %v1313_v45 = vpop.f32.mrb[0].mxu0 }
  0xfa   : > { %v528_v46 = vpop.f32.mrb[1].mxu0  ;;  %v854_v56 = vmul.f32 %v1313_v45, %v1313_v45 }
  0xfb   : > { %v1314_v11 = vpop.f32.mrb[2].mxu0  ;;  %v852_v50 = vmul.f32 %v528_v46, %v528_v46 }
  0xfc   : > { %v1169_v47 = vpack.c.bf16 %v1314_v11, %v1313_v45  ;;  %v531_v49 = vpop.f32.mrb[3].mxu0  ;;  %v855_v62 = vmul.f32 %v1314_v11, %v1314_v11 }
  0xfd   : > { %v1164_v51 = vpack.c.bf16 %v531_v49, %v528_v46  ;;  %v815_v52 = vadd.f32 %v531_v49, %v528_v46  ;;  %v853_v53 = vmul.f32 %v531_v49, %v531_v49  ;;  %v1585_v54 = vpop.f32.mrb[0].mxu1 }
  0xfe   : > { %1256 = vst [vmem:[%s1583_s25 + $0x8] sm:$0xff] %v1169_v47   ;;  %v1588_v55 = vpop.f32.mrb[1].mxu1 }
  0xff   : > { %1165 = vst [vmem:[%s1583_s25] sm:$0xff] %v1164_v51   ;;  %v816_v57 = vadd.f32 %v1313_v45, %v815_v52  ;;  %v884_v58 = vadd.f32 %v853_v53, %v852_v50  ;;  %v1591_v59 = vpop.f32.mrb[2].mxu1 }
 0x100   : > { %v1209_v60 = vpack.c.bf16 %v1591_v59, %v1585_v54  ;;  %v1595_v61 = vpop.f32.mrb[3].mxu1 }
 0x101   : > { %v885_v63 = vadd.f32 %v884_v58, %v854_v56  ;;  %v1317_v0 = vpop.f32.mrb[4].mxu0  ;;  %v817_v1 = vadd.f32 %v1314_v11, %v816_v57  ;;  %v1204_v2 = vpack.c.bf16 %v1595_v61, %v1588_v55 }
 0x102   : > { %v544_v3 = vpop.f32.mrb[5].mxu0  ;;  %1264 = vst [vmem:[%s1583_s25 + $0x48] sm:$0xff] %v1209_v60   ;;  %v858_v24 = vmul.f32 %v1317_v0, %v1317_v0 }
 0x103   : > { %v818_v6 = vadd.f32 %v817_v1, %v544_v3  ;;  %v856_v8 = vmul.f32 %v544_v3, %v544_v3  ;;  %v886_v9 = vadd.f32 %v885_v63, %v855_v62  ;;  %v1318_v14 = vpop.f32.mrb[6].mxu0  ;;  %1263 = vst [vmem:[%s1583_s25 + $0x40] sm:$0xff] %v1204_v2  }
 0x104   : > { %v1179_v17 = vpack.c.bf16 %v1318_v14, %v1317_v0  ;;  %v547_v18 = vpop.f32.mrb[7].mxu0  ;;  %v859_v7 = vmul.f32 %v1318_v14, %v1318_v14 }
 0x105   : > { %v887_v19 = vadd.f32 %v886_v9, %v856_v8  ;;  %v1174_v21 = vpack.c.bf16 %v547_v18, %v544_v3  ;;  %v819_v22 = vadd.f32 %v818_v6, %v547_v18  ;;  %v857_v15 = vmul.f32 %v547_v18, %v547_v18  ;;  %v1601_v23 = vpop.f32.mrb[4].mxu1 }
 0x106   : > { %1258 = vst [vmem:[%s1583_s25 + $0x18] sm:$0xff] %v1179_v17   ;;  %v1604_v12 = vpop.f32.mrb[5].mxu1  ;;  %v868_v17 = vmul.f32 %v1588_v55, %v1588_v55 }
 0x107   : > { %1257 = vst [vmem:[%s1583_s25 + $0x10] sm:$0xff] %v1174_v21   ;;  %v820_v25 = vadd.f32 %v1317_v0, %v819_v22  ;;  %v888_v10 = vadd.f32 %v887_v19, %v857_v15  ;;  %v1607_v26 = vpop.f32.mrb[6].mxu1 }
 0x108   : > { %v1219_v27 = vpack.c.bf16 %v1607_v26, %v1601_v23  ;;  %v1611_v48 = vpop.f32.mrb[7].mxu1 }
 0x109   : > { %v889_v28 = vadd.f32 %v888_v10, %v858_v24  ;;  %v1321_v29 = vpop.f32.mrb[8].mxu0  ;;  %v821_v16 = vadd.f32 %v1318_v14, %v820_v25  ;;  %v1214_v20 = vpack.c.bf16 %v1611_v48, %v1604_v12 }
 0x10a   : > { %v560_v30 = vpop.f32.mrb[9].mxu0  ;;  %1266 = vst [vmem:[%s1583_s25 + $0x58] sm:$0xff] %v1219_v27   ;;  %v862_v41 = vmul.f32 %v1321_v29, %v1321_v29 }
 0x10b   : > { %v822_v4 = vadd.f32 %v821_v16, %v560_v30  ;;  %v860_v31 = vmul.f32 %v560_v30, %v560_v30  ;;  %v890_v32 = vadd.f32 %v889_v28, %v859_v7  ;;  %v1322_v33 = vpop.f32.mrb[10].mxu0  ;;  %1265 = vst [vmem:[%s1583_s25 + $0x50] sm:$0xff] %v1214_v20   ;;  %v869_v28 = vmul.f32 %v1595_v61, %v1595_v61 }
 0x10c   : > { %v1189_v34 = vpack.c.bf16 %v1322_v33, %v1321_v29  ;;  %v563_v35 = vpop.f32.mrb[11].mxu0  ;;  %v863_v46 = vmul.f32 %v1322_v33, %v1322_v33 }
 0x10d   : > { %v891_v36 = vadd.f32 %v890_v32, %v860_v31  ;;  %v1184_v37 = vpack.c.bf16 %v563_v35, %v560_v30  ;;  %v823_v38 = vadd.f32 %v822_v4, %v563_v35  ;;  %v861_v39 = vmul.f32 %v563_v35, %v563_v35  ;;  %v1617_v13 = vpop.f32.mrb[8].mxu1 }
 0x10e   : > { %1260 = vst [vmem:[%s1583_s25 + $0x28] sm:$0xff] %v1189_v34   ;;  %v1620_v40 = vpop.f32.mrb[9].mxu1  ;;  %v871_v30 = vmul.f32 %v1591_v59, %v1591_v59  ;;  %v872_v31 = vmul.f32 %v1604_v12, %v1604_v12  ;;  %v873_v35 = vmul.f32 %v1611_v48, %v1611_v48 }
 0x10f   : > { %1259 = vst [vmem:[%s1583_s25 + $0x20] sm:$0xff] %v1184_v37   ;;  %v824_v42 = vadd.f32 %v1321_v29, %v823_v38  ;;  %v892_v43 = vadd.f32 %v891_v36, %v861_v39  ;;  %v1623_v44 = vpop.f32.mrb[10].mxu1  ;;  %v870_v29 = vmul.f32 %v1585_v54, %v1585_v54 }
 0x110   : > { %v1229_v5 = vpack.c.bf16 %v1623_v44, %v1617_v13  ;;  %v1627_v45 = vpop.f32.mrb[11].mxu1 }
 0x111   : > { %v893_v11 = vadd.f32 %v892_v43, %v862_v41  ;;  %v1325_v47 = vpop.f32.mrb[12].mxu0  ;;  %v825_v49 = vadd.f32 %v1322_v33, %v824_v42  ;;  %v1224_v50 = vpack.c.bf16 %v1627_v45, %v1620_v40 }
 0x112   : > { %v576_v51 = vpop.f32.mrb[13].mxu0  ;;  %1268 = vst [vmem:[%s1583_s25 + $0x68] sm:$0xff] %v1229_v5   ;;  %v866_v6 = vmul.f32 %v1325_v47, %v1325_v47  ;;  %v877_v5 = vmul.f32 %v1627_v45, %v1627_v45 }
 0x113   : > { %v826_v52 = vadd.f32 %v825_v49, %v576_v51  ;;  %v864_v53 = vmul.f32 %v576_v51, %v576_v51  ;;  %v894_v56 = vadd.f32 %v893_v11, %v863_v46  ;;  %v1326_v57 = vpop.f32.mrb[14].mxu0  ;;  %1267 = vst [vmem:[%s1583_s25 + $0x60] sm:$0xff] %v1224_v50  }
 0x114   : > { %v1199_v58 = vpack.c.bf16 %v1326_v57, %v1325_v47  ;;  %v579_v60 = vpop.f32.mrb[15].mxu0  ;;  %v867_v21 = vmul.f32 %v1326_v57, %v1326_v57 }
 0x115   : > { %v895_v62 = vadd.f32 %v894_v56, %v864_v53  ;;  %v1194_v63 = vpack.c.bf16 %v579_v60, %v576_v51  ;;  %v827_v0 = vadd.f32 %v826_v52, %v579_v60  ;;  %v865_v1 = vmul.f32 %v579_v60, %v579_v60  ;;  %v1341_v2 = vpop.f32.mrb[12].mxu1 }
 0x116   : > { %1262 = vst [vmem:[%s1583_s25 + $0x38] sm:$0xff] %v1199_v58   ;;  %v640_v3 = vpop.f32.mrb[13].mxu1  ;;  %v882_v56 = vmul.f32 %v1341_v2, %v1341_v2 }
 0x117   : > { %1261 = vst [vmem:[%s1583_s25 + $0x30] sm:$0xff] %v1194_v63   ;;  %v828_v8 = vadd.f32 %v1325_v47, %v827_v0  ;;  %v896_v9 = vadd.f32 %v895_v62, %v865_v1  ;;  %v1342_v14 = vpop.f32.mrb[14].mxu1  ;;  %v880_v49 = vmul.f32 %v640_v3, %v640_v3 }
 0x118   : > { %v1239_v18 = vpack.c.bf16 %v1342_v14, %v1341_v2  ;;  %v643_v19 = vpop.f32.mrb[15].mxu1  ;;  %v883_v60 = vmul.f32 %v1342_v14, %v1342_v14 }
 0x119   : > { %v897_v22 = vadd.f32 %v896_v9, %v866_v6  ;;  %v829_v15 = vadd.f32 %v1326_v57, %v828_v8  ;;  %v1234_v24 = vpack.c.bf16 %v643_v19, %v640_v3 }
 0x11a   : > { %1270 = vst [vmem:[%s1583_s25 + $0x78] sm:$0xff] %v1239_v18  }
 0x11b   : > { %v830_v25 = vadd.f32 %v829_v15, %v1588_v55  ;;  %v898_v10 = vadd.f32 %v897_v22, %v867_v21  ;;  %1269 = vst [vmem:[%s1583_s25 + $0x70] sm:$0xff] %v1234_v24  }
 0x11d   : > { %v899_v27 = vadd.f32 %v898_v10, %v868_v17  ;;  %v831_v7 = vadd.f32 %v830_v25, %v1595_v61 }
 0x11f   : > { %v832_v16 = vadd.f32 %v1585_v54, %v831_v7  ;;  %v900_v20 = vadd.f32 %v899_v27, %v869_v28  ;;  %v874_v54 = vmul.f32 %v1601_v23, %v1601_v23 }
 0x121   : > { %v901_v4 = vadd.f32 %v900_v20, %v870_v29  ;;  %v833_v55 = vadd.f32 %v1591_v59, %v832_v16  ;;  %v875_v59 = vmul.f32 %v1607_v26, %v1607_v26 }
 0x123   : > { %v834_v32 = vadd.f32 %v833_v55, %v1604_v12  ;;  %v902_v33 = vadd.f32 %v901_v4, %v871_v30  ;;  %v876_v12 = vmul.f32 %v1620_v40, %v1620_v40 }
 0x125   : > { %v903_v34 = vadd.f32 %v902_v33, %v872_v31  ;;  %v835_v61 = vadd.f32 %v834_v32, %v1611_v48 }
 0x127   : > { %v836_v36 = vadd.f32 %v1601_v23, %v835_v61  ;;  %v904_v37 = vadd.f32 %v903_v34, %v873_v35  ;;  %v878_v23 = vmul.f32 %v1617_v13, %v1617_v13 }
 0x129   : > { %v905_v38 = vadd.f32 %v904_v37, %v874_v54  ;;  %v837_v39 = vadd.f32 %v1607_v26, %v836_v36  ;;  %v879_v26 = vmul.f32 %v1623_v44, %v1623_v44 }
 0x12b   : > { %v838_v41 = vadd.f32 %v837_v39, %v1620_v40  ;;  %v906_v42 = vadd.f32 %v905_v38, %v875_v59 }
 0x12d   : > { %v907_v43 = vadd.f32 %v906_v42, %v876_v12  ;;  %v839_v48 = vadd.f32 %v838_v41, %v1627_v45  ;;  %v881_v45 = vmul.f32 %v643_v19, %v643_v19 }
 0x12f   : > { %v840_v46 = vadd.f32 %v1617_v13, %v839_v48  ;;  %v908_v11 = vadd.f32 %v907_v43, %v877_v5 }
 0x131   : > { %v909_v47 = vadd.f32 %v908_v11, %v878_v23  ;;  %v841_v40 = vadd.f32 %v1623_v44, %v840_v46 }
 0x133   : > { %v842_v50 = vadd.f32 %v841_v40, %v640_v3  ;;  %v910_v51 = vadd.f32 %v909_v47, %v879_v26 }
 0x135   : > { %v911_v52 = vadd.f32 %v910_v51, %v880_v49  ;;  %v843_v53 = vadd.f32 %v842_v50, %v643_v19 }
 0x137   : > { %v844_v57 = vadd.f32 %v1341_v2, %v843_v53  ;;  %v912_v58 = vadd.f32 %v911_v52, %v881_v45 }
 0x139   : > { %v845_v13 = vadd.f32 %v1342_v14, %v844_v57  ;;  %v913_v62 = vadd.f32 %v912_v58, %v882_v56 }
 0x13b   : > { %v846_v63 = vrot.slane %v845_v13, 4  ;;  %v914_v0 = vadd.f32 %v913_v62, %v883_v60 }
 0x13d   : > { %v847_v1 = vadd.f32 %v846_v63, %v845_v13  ;;  %v915_v6 = vrot.slane %v914_v0, 4 }
 0x13f   : > { %v848_v8 = vrot.slane %v847_v1, 2  ;;  %v916_v44 = vadd.f32 %v915_v6, %v914_v0 }
 0x141   : > { %v849_v3 = vadd.f32 %v848_v8, %v847_v1  ;;  %v917_v9 = vrot.slane %v916_v44, 2 }
 0x143   : > { %v850_v17 = vrot.slane %v849_v3, 1  ;;  %v918_v18 = vadd.f32 %v917_v9, %v916_v44 }
 0x145   : > { %v919_v19 = vrot.slane %v918_v18, 1  ;;  %v851_v2 = vadd.f32 %v850_v17, %v849_v3 }
 0x147   : > { %v920_v14 = vadd.f32 %v919_v19, %v918_v18 }
 0x149   : > { %v922_v21 = vsel %vm921_vm0, %v851_v2, %v920_v14 }
 0x14a   : > { %923 = vst [vmem:[%s238_s28] sm:$0x3] %v922_v21 }
 0x14b PF: > { %s16_s18 = sadd.s32 1, %s1381_s18  }
 0x14c   : > { %p13_p5 = scmp.ge.s32.totalorder %s16_s18, 4  }
 0x14e   :  { %15 = sbr.rel (!%p13_p5) target bundleno = 1 (0x1), region = 78 }

// kernel: res_block_forward.8
= control target key start
LH: loop header
LB: loop body
LE: loop exit
PB: predicated region body
PF: predicated region fallthrough
CT: control target
= control target key end

     0   :  { %s1656_s21 = smov 0   ;;  %s1949_s0 = inlined_call_operand.vmem [shape: bf16[512,128], index: 0, kind: input, shape index: {}]   ;;  %s1950_s1 = inlined_call_operand.vmem [shape: f32[1,128], index: 1, kind: input, shape index: {}]   ;;  %s1951_s2 = inlined_call_operand.vmem [shape: f32[1,128], index: 2, kind: input, shape index: {}]   ;;  %s1952_s3 = inlined_call_operand.vmem [shape: bf16[128,128], index: 3, kind: input, shape index: {}]   ;;  %s1953_s4 = inlined_call_operand.vmem [shape: bf16[512,128], index: 4, kind: input, shape index: {}]   ;;  %s1954_s5 = inlined_call_operand.vmem [shape: bf16[512,128], index: 5, kind: output, shape index: {0}]   ;;  %s1955_s6 = inlined_call_operand.vmem [shape: f32[2,2,128], index: 6, kind: output, shape index: {1}]  }
   0x1 LB: > { %s1662_s22 = sadd.s32 4294967295, %s1619_s21   ;;  %p1172_p0 = scmp.ge.s32.totalorder %s1619_s21, 1  ;;  %s1619_s21 = sphi %s1656_s21, %s17_s21  }
   0x2   : > { %p227_p1 = scmp.lt.s32.totalorder %s1619_s21, 3 }
   0x4   : > { %p228_p2 = pnand %p1172_p0, %p227_p1 }
   0x5   : > { %v1605_v0 = vld [vmem:[%s1952_s3] sm:$0xff] (!%p228_p2)   ;;  %s1173_s25 = sshll.u32 (!%p228_p2), %s1662_s22, 5  ;;  %v1606_v1 = vld [vmem:[%s1952_s3 + $0x8] sm:$0xff] (!%p228_p2)   ;;  %v1607_v2 = vld [vmem:[%s1952_s3 + $0x10] sm:$0xff] (!%p228_p2)   ;;  %p284_p4 = scmp.lt.s32.totalorder (!%p228_p2), %s1662_s22, 1  ;;  %vm1066_vm0 = vcmask (!%p228_p2), 1040384  }
   0x6   : > { %231 = sbr.rel (%p228_p2) target bundleno = 333 (0x14d), region = 40  ;;  %p267_p3 = scmp.lt.s32.totalorder (!%p228_p2), %s1173_s25, 63  ;;  %1533 = vmatprep.subr.bf16.mxu0 (!%p228_p2), %v1605_v0  ;;  %1581 = vmatprep.subr.bf16.mxu1 (!%p228_p2), %v1605_v0  ;;  %v1608_v3 = vld [vmem:[%s1952_s3 + $0x18] sm:$0xff] (!%p228_p2)   ;;  %v1691_v5 = vld [vmem:[%s1950_s1] ss:$0 sm:$0xff] (!%p228_p2)  ;;  %v1610_v34 = vld [vmem:[%s1952_s3 + $0x28] sm:$0xff] (!%p228_p2)  }
   0x7   : > { %1534 = vmatpush3.bf16.msra.mxu0 (!%p228_p2), %v1605_v0  ;;  %1589 = vmatpush3.bf16.msra.mxu1 (!%p228_p2), %v1605_v0  ;;  %v1699_v11 = vld [vmem:[%s1951_s2] ss:$0 sm:$0xff] (!%p228_p2)  ;;  %v1611_v49 = vld [vmem:[%s1952_s3 + $0x30] sm:$0xff] (!%p228_p2)   ;;  %v1612_v63 = vld [vmem:[%s1952_s3 + $0x38] sm:$0xff] (!%p228_p2)  }
   0x8   : > { %1535 = vmatprep.subr.bf16.mxu0 (!%p228_p2), %v1606_v1  ;;  %1582 = vmatprep.subr.bf16.mxu1 (!%p228_p2), %v1606_v1  ;;  %v1609_v20 = vld [vmem:[%s1952_s3 + $0x20] sm:$0xff] (!%p228_p2)  }
   0xb   : > { %1536 = vmatpush3.bf16.msra.mxu0 (!%p228_p2), %v1606_v1  ;;  %1590 = vmatpush3.bf16.msra.mxu1 (!%p228_p2), %v1606_v1 }
   0xc   : > { %1537 = vmatprep.subr.bf16.mxu0 (!%p228_p2), %v1607_v2  ;;  %1583 = vmatprep.subr.bf16.mxu1 (!%p228_p2), %v1607_v2 }
   0xd   : > { %s1957_s25 = smov (!%p267_p3, %s1173_s25), 63  ;;  %s1959_s22 = smov (!%p284_p4, %s1662_s22), 1 }
   0xe   : > { %s1676_s30 = sshll.u32 %s1957_s25, 2 }
   0xf   : > { %s1682_s9 = scalar_lea.vmem %s1949_s0, %s1676_s30  ;;  %1538 = vmatpush3.bf16.msra.mxu0 %v1607_v2  ;;  %1591 = vmatpush3.bf16.msra.mxu1 %v1607_v2  ;;  %s1823_s28 = scalar_lea.vmem %s1953_s4, %s1676_s30 }
  0x10   : > { %v1257_v4 = vld [vmem:[%s1682_s9] sm:$0xff]   ;;  %v1464_v8 = vld [vmem:[%s1682_s9 + $0x8] sm:$0xff]   ;;  %v1465_v9 = vld [vmem:[%s1682_s9 + $0x10] sm:$0xff]   ;;  %1539 = vmatprep.subr.bf16.mxu0 %v1608_v3  ;;  %1584 = vmatprep.subr.bf16.mxu1 %v1608_v3  ;;  %s1834_s8 = scalar_lea.vmem %s1954_s5, %s1676_s30  ;;  %s1179_s30 = sshll.u32 %s1959_s22, 1 }
  0x11   : > { %v1258_v6 = vunpack.c.l.bf16 %v1257_v4  ;;  %v1259_v7 = vunpack.c.h.bf16 %v1257_v4  ;;  %v1466_v10 = vld [vmem:[%s1682_s9 + $0x18] sm:$0xff]   ;;  %v1262_v12 = vunpack.c.l.bf16 %v1464_v8  ;;  %v1263_v13 = vunpack.c.h.bf16 %v1464_v8  ;;  %v1467_v29 = vld [vmem:[%s1682_s9 + $0x20] sm:$0xff]   ;;  %v1468_v33 = vld [vmem:[%s1682_s9 + $0x28] sm:$0xff]   ;;  %s287_s11 = scalar_lea.vmem %s1955_s6, %s1179_s30 }
  0x12   : > { %v1266_v14 = vunpack.c.l.bf16 %v1465_v9  ;;  %v1267_v15 = vunpack.c.h.bf16 %v1465_v9  ;;  %v1270_v18 = vunpack.c.l.bf16 %v1466_v10  ;;  %v1271_v19 = vunpack.c.h.bf16 %v1466_v10  ;;  %v1469_v42 = vld [vmem:[%s1682_s9 + $0x30] sm:$0xff]   ;;  %v1728_v48 = vld [vmem:[%s1682_s9 + $0x38] sm:$0xff]   ;;  %v1471_v60 = vld [vmem:[%s1682_s9 + $0x40] sm:$0xff]  }
  0x13   : > { %v360_v16 = vmul.f32 %v1258_v6, %v1691_v5  ;;  %v361_v17 = vmul.f32 %v1259_v7, %v1691_v5  ;;  %v362_v21 = vmul.f32 %v1262_v12, %v1691_v5  ;;  %v363_v22 = vmul.f32 %v1263_v13, %v1691_v5  ;;  %1540 = vmatpush3.bf16.msra.mxu0 %v1608_v3  ;;  %v1473_v9 = vld [vmem:[%s1682_s9 + $0x50] sm:$0xff]  }
  0x14   : > { %v364_v23 = vmul.f32 %v1266_v14, %v1691_v5  ;;  %v365_v24 = vmul.f32 %v1267_v15, %v1691_v5  ;;  %v366_v27 = vmul.f32 %v1270_v18, %v1691_v5  ;;  %v367_v28 = vmul.f32 %v1271_v19, %v1691_v5  ;;  %1592 = vmatpush3.bf16.msra.mxu1 %v1608_v3  ;;  %v1472_v3 = vld [vmem:[%s1682_s9 + $0x48] sm:$0xff]   ;;  %v1474_v19 = vld [vmem:[%s1682_s9 + $0x58] sm:$0xff]  }
  0x15   : > { %v399_v25 = vadd.f32 %v1699_v11, %v360_v16  ;;  %v400_v26 = vadd.f32 %v1699_v11, %v361_v17  ;;  %v401_v32 = vadd.f32 %v1699_v11, %v362_v21  ;;  %1541 = vmatprep.subr.bf16.mxu0 %v1609_v20  ;;  %v402_v35 = vadd.f32 %v1699_v11, %v363_v22 }
  0x16   : > { %v403_v36 = vadd.f32 %v1699_v11, %v364_v23  ;;  %v404_v37 = vadd.f32 %v1699_v11, %v365_v24  ;;  %1585 = vmatprep.subr.bf16.mxu1 %v1609_v20  ;;  %v405_v39 = vadd.f32 %v1699_v11, %v366_v27  ;;  %v406_v40 = vadd.f32 %v1699_v11, %v367_v28 }
  0x17   : > { %v431_v30 = vmax.f32 %v399_v25, 0.0  ;;  %v432_v31 = vmax.f32 %v400_v26, 0.0  ;;  %v1274_v41 = vunpack.c.l.bf16 %v1467_v29  ;;  %v1275_v43 = vunpack.c.h.bf16 %v1467_v29  ;;  %1542 = vmatpush3.bf16.msra.mxu0 %v1609_v20 }
  0x18   : > { %v1278_v44 = vunpack.c.l.bf16 %v1468_v33  ;;  %v433_v45 = vmax.f32 %v401_v32, 0.0  ;;  %v1279_v47 = vunpack.c.h.bf16 %v1468_v33  ;;  %1543 = vmatprep.subr.bf16.mxu0 %v1610_v34  ;;  %v434_v50 = vmax.f32 %v402_v35, 0.0  ;;  %1593 = vmatpush3.bf16.msra.mxu1 %v1609_v20  ;;  %v1475_v32 = vld [vmem:[%s1682_s9 + $0x60] sm:$0xff]  }
  0x19   : > { %v463_v38 = vpack.c.bf16 %v432_v31, %v431_v30  ;;  %v368_v46 = vmul.f32 %v1274_v41, %v1691_v5  ;;  %v435_v51 = vmax.f32 %v403_v36, 0.0  ;;  %v436_v52 = vmax.f32 %v404_v37, 0.0  ;;  %1586 = vmatprep.subr.bf16.mxu1 %v1610_v34 }
  0x1a   : > { %v1282_v53 = vunpack.c.l.bf16 %v1469_v42  ;;  %v437_v54 = vmax.f32 %v405_v39, 0.0  ;;  %v438_v55 = vmax.f32 %v406_v40, 0.0  ;;  %v369_v56 = vmul.f32 %v1275_v43, %v1691_v5 }
  0x1b   : > { %1549 = vmatprep.mubr.bf16.mxu0 %v463_v38  ;;  %v370_v57 = vmul.f32 %v1278_v44, %v1691_v5  ;;  %v1283_v58 = vunpack.c.h.bf16 %v1469_v42  ;;  %v1286_v59 = vunpack.c.l.bf16 %v1728_v48  ;;  %1544 = vmatpush3.bf16.msra.mxu0 %v1610_v34  ;;  %v1738_v61 = vadd.f32 %v1699_v11, %v368_v46 }
  0x1c   : > { %v371_v62 = vmul.f32 %v1279_v47, %v1691_v5  ;;  %1545 = vmatprep.subr.bf16.mxu0 %v1611_v49  ;;  %v464_v0 = vpack.c.bf16 %v434_v50, %v433_v45  ;;  %v465_v1 = vpack.c.bf16 %v436_v52, %v435_v51  ;;  %1594 = vmatpush3.bf16.msra.mxu1 %v1610_v34  ;;  %v1287_v7 = vunpack.c.h.bf16 %v1728_v48  ;;  %v1476_v45 = vld [vmem:[%s1682_s9 + $0x68] sm:$0xff]  }
  0x1d   : > { %v372_v2 = vmul.f32 %v1282_v53, %v1691_v5  ;;  %v1746_v4 = vpack.c.bf16 %v438_v55, %v437_v54  ;;  %v1749_v6 = vadd.f32 %v1699_v11, %v369_v56  ;;  %1587 = vmatprep.subr.bf16.mxu1 %v1611_v49  ;;  %v1290_v8 = vunpack.c.l.bf16 %v1471_v60  ;;  %v1477_v55 = vld [vmem:[%s1682_s9 + $0x70] sm:$0xff]  }
  0x1e   : > { %v1754_v10 = vadd.f32 %v1699_v11, %v370_v57  ;;  %v1757_v12 = vmul.f32 %v1283_v58, %v1691_v5  ;;  %v1760_v13 = vmul.f32 %v1286_v59, %v1691_v5  ;;  %v1291_v14 = vunpack.c.h.bf16 %v1471_v60 }
  0x1f   : > { %1546 = vmatpush3.bf16.msra.mxu0 %v1611_v49  ;;  %v439_v15 = vmax.f32 %v1738_v61, 0.0  ;;  %v1764_v16 = vadd.f32 %v1699_v11, %v371_v62  ;;  %v376_v17 = vmul.f32 %v1290_v8, %v1691_v5  ;;  %v1294_v18 = vunpack.c.l.bf16 %v1472_v3 }
  0x20   : > { %1547 = vmatprep.subr.bf16.mxu0 %v1612_v63  ;;  %1595 = vmatpush3.bf16.msra.mxu1 %v1611_v49  ;;  %v1769_v20 = vadd.f32 %v1699_v11, %v372_v2  ;;  %v377_v21 = vmul.f32 %v1291_v14, %v1691_v5  ;;  %v1295_v22 = vunpack.c.h.bf16 %v1472_v3  ;;  %v1298_v23 = vunpack.c.l.bf16 %v1473_v9 }
  0x21   : > { %v440_v24 = vmax.f32 %v1749_v6, 0.0  ;;  %1588 = vmatprep.subr.bf16.mxu1 %v1612_v63  ;;  %v415_v25 = vadd.f32 %v1699_v11, %v376_v17  ;;  %v378_v26 = vmul.f32 %v1294_v18, %v1691_v5  ;;  %v1299_v27 = vunpack.c.h.bf16 %v1473_v9  ;;  %v1478_v17 = vld [vmem:[%s1682_s9 + $0x78] sm:$0xff]  }
  0x22   : > { %v416_v28 = vadd.f32 %v1699_v11, %v377_v21  ;;  %v379_v29 = vmul.f32 %v1295_v22, %v1691_v5  ;;  %v380_v30 = vmul.f32 %v1298_v23, %v1691_v5  ;;  %v1302_v31 = vunpack.c.l.bf16 %v1474_v19 }
  0x23   : > { %1548 = vmatpush3.bf16.msra.mxu0 %v1612_v63  ;;  %v447_v33 = vmax.f32 %v415_v25, 0.0  ;;  %v417_v34 = vadd.f32 %v1699_v11, %v378_v26  ;;  %v381_v35 = vmul.f32 %v1299_v27, %v1691_v5  ;;  %v1303_v36 = vunpack.c.h.bf16 %v1474_v19 }
  0x24   : > { %1596 = vmatpush3.bf16.msra.mxu1 %v1612_v63  ;;  %v448_v37 = vmax.f32 %v416_v28, 0.0  ;;  %v418_v38 = vadd.f32 %v1699_v11, %v379_v29  ;;  %v419_v39 = vadd.f32 %v1699_v11, %v380_v30  ;;  %v382_v40 = vmul.f32 %v1302_v31, %v1691_v5 }
  0x25   : > { %v449_v41 = vmax.f32 %v417_v34, 0.0  ;;  %v420_v42 = vadd.f32 %v1699_v11, %v381_v35  ;;  %v383_v43 = vmul.f32 %v1303_v36, %v1691_v5  ;;  %v1306_v44 = vunpack.c.l.bf16 %v1475_v32 }
  0x26   : > { %1550 = vmatmul.mubr.bf16.vlgmr.msra.gmra.mrb[0].mxu0 %v464_v0  ;;  %v471_v46 = vpack.c.bf16 %v448_v37, %v447_v33  ;;  %v450_v47 = vmax.f32 %v418_v38, 0.0  ;;  %v451_v49 = vmax.f32 %v419_v39, 0.0  ;;  %v421_v50 = vadd.f32 %v1699_v11, %v382_v40 }
  0x27   : > { %1553 = vmatprep.mubr.bf16.mxu0 %v465_v1  ;;  %v452_v51 = vmax.f32 %v420_v42, 0.0  ;;  %v422_v52 = vadd.f32 %v1699_v11, %v383_v43  ;;  %v1307_v53 = vunpack.c.h.bf16 %v1475_v32  ;;  %v384_v54 = vmul.f32 %v1306_v44, %v1691_v5 }
  0x28   : > { %1565 = vmatprep.mubr.bf16.mxu1 %v471_v46  ;;  %v472_v56 = vpack.c.bf16 %v450_v47, %v449_v41  ;;  %v453_v57 = vmax.f32 %v421_v50, 0.0  ;;  %v1310_v58 = vunpack.c.l.bf16 %v1476_v45  ;;  %v1311_v59 = vunpack.c.h.bf16 %v1476_v45  ;;  %v1479_v45 = vld [vmem:[%s1823_s28 + $0x8] sm:$0xff]  }
  0x29   : > { %v473_v60 = vpack.c.bf16 %v452_v51, %v451_v49  ;;  %v454_v61 = vmax.f32 %v422_v52, 0.0  ;;  %v385_v62 = vmul.f32 %v1307_v53, %v1691_v5  ;;  %v423_v63 = vadd.f32 %v1699_v11, %v384_v54  ;;  %v1487_v47 = vld [vmem:[%s1823_s28 + $0x48] sm:$0xff]   ;;  %v1486_v51 = vld [vmem:[%s1823_s28 + $0x40] sm:$0xff]  }
  0x2a   : > { %1566 = vmatmul.mubr.bf16.vlgmr.msra.gmra.mrb[0].mxu1 %v472_v56  ;;  %v386_v0 = vmul.f32 %v1310_v58, %v1691_v5  ;;  %v387_v1 = vmul.f32 %v1311_v59, %v1691_v5  ;;  %v1314_v2 = vunpack.c.l.bf16 %v1477_v55  ;;  %v1315_v3 = vunpack.c.h.bf16 %v1477_v55  ;;  %v1480_v58 = vld [vmem:[%s1823_s28 + $0x10] sm:$0xff]  }
  0x2b   : > { %v467_v6 = vpack.c.bf16 %v440_v24, %v439_v15  ;;  %v412_v8 = vadd.f32 %v1699_v11, %v1757_v12  ;;  %1569 = vmatprep.mubr.bf16.mxu1 %v473_v60  ;;  %v424_v9 = vadd.f32 %v1699_v11, %v385_v62  ;;  %v455_v14 = vmax.f32 %v423_v63, 0.0 }
  0x2c   : > { %v441_v18 = vmax.f32 %v1754_v10, 0.0  ;;  %v375_v19 = vmul.f32 %v1287_v7, %v1691_v5  ;;  %v388_v21 = vmul.f32 %v1314_v2, %v1691_v5  ;;  %v389_v22 = vmul.f32 %v1315_v3, %v1691_v5 }
  0x2d   : > { %v442_v15 = vmax.f32 %v1764_v16, 0.0  ;;  %v443_v23 = vmax.f32 %v1769_v20, 0.0  ;;  %v474_v12 = vpack.c.bf16 %v454_v61, %v453_v57  ;;  %v456_v24 = vmax.f32 %v424_v9, 0.0 }
  0x2e   : > { %1554 = vmatmul.mubr.bf16.gmra.mrb[4].mxu0 %v1746_v4  ;;  %v425_v25 = vadd.f32 %v1699_v11, %v386_v0  ;;  %v426_v10 = vadd.f32 %v1699_v11, %v387_v1  ;;  %v1318_v26 = vunpack.c.l.bf16 %v1478_v17  ;;  %v1319_v27 = vunpack.c.h.bf16 %v1478_v17  ;;  %v1481_v1 = vld [vmem:[%s1823_s28 + $0x18] sm:$0xff]  }
  0x2f   : > { %1557 = vmatprep.mubr.bf16.mxu0 %v467_v6  ;;  %v444_v48 = vmax.f32 %v412_v8, 0.0  ;;  %v475_v7 = vpack.c.bf16 %v456_v24, %v455_v14  ;;  %v427_v28 = vadd.f32 %v1699_v11, %v388_v21  ;;  %v428_v29 = vadd.f32 %v1699_v11, %v389_v22 }
  0x30   : > { %v468_v16 = vpack.c.bf16 %v442_v15, %v441_v18  ;;  %v413_v20 = vadd.f32 %v1699_v11, %v1760_v13  ;;  %v414_v30 = vadd.f32 %v1699_v11, %v375_v19  ;;  %v457_v4 = vmax.f32 %v425_v25, 0.0 }
  0x31   : > { %v458_v31 = vmax.f32 %v426_v10, 0.0  ;;  %v390_v32 = vmul.f32 %v1318_v26, %v1691_v5  ;;  %v391_v33 = vmul.f32 %v1319_v27, %v1691_v5  ;;  %v469_v34 = vpack.c.bf16 %v444_v48, %v443_v23  ;;  %v1489_v23 = vld [vmem:[%s1823_s28 + $0x58] sm:$0xff]  }
  0x32   : > { %1570 = vmatmul.mubr.bf16.gmra.mrb[4].mxu1 %v474_v12  ;;  %v459_v35 = vmax.f32 %v427_v28, 0.0  ;;  %v460_v36 = vmax.f32 %v428_v29, 0.0  ;;  %v445_v37 = vmax.f32 %v413_v20, 0.0  ;;  %v446_v38 = vmax.f32 %v414_v30, 0.0  ;;  %v1488_v12 = vld [vmem:[%s1823_s28 + $0x50] sm:$0xff]  }
  0x33   : > { %1573 = vmatprep.mubr.bf16.mxu1 %v475_v7  ;;  %v476_v39 = vpack.c.bf16 %v458_v31, %v457_v4  ;;  %v429_v13 = vadd.f32 %v1699_v11, %v390_v32  ;;  %v430_v40 = vadd.f32 %v1699_v11, %v391_v33  ;;  %v1321_v11 = vld [vmem:[%s1823_s28] sm:$0xff]   ;;  %v1326_v49 = vunpack.c.l.bf16 %v1479_v45 }
  0x34   : > { %v477_v41 = vpack.c.bf16 %v460_v36, %v459_v35  ;;  %v470_v42 = vpack.c.bf16 %v446_v38, %v445_v37  ;;  %v1322_v46 = vunpack.c.l.bf16 %v1321_v11  ;;  %v1327_v50 = vunpack.c.h.bf16 %v1479_v45  ;;  %v1483_v37 = vld [vmem:[%s1823_s28 + $0x28] sm:$0xff]   ;;  %v1482_v38 = vld [vmem:[%s1823_s28 + $0x20] sm:$0xff]  }
  0x35   : > { %v461_v43 = vmax.f32 %v429_v13, 0.0  ;;  %v462_v44 = vmax.f32 %v430_v40, 0.0  ;;  %v1323_v53 = vunpack.c.h.bf16 %v1321_v11  ;;  %v1358_v55 = vunpack.c.l.bf16 %v1487_v47 }
  0x36   : > { %1558 = vmatmul.mubr.bf16.gmra.mrb[8].mxu0 %v468_v16  ;;  %v1354_v59 = vunpack.c.l.bf16 %v1486_v51  ;;  %v1359_v63 = vunpack.c.h.bf16 %v1487_v47  ;;  %v1355_v3 = vunpack.c.h.bf16 %v1486_v51  ;;  %v1330_v9 = vunpack.c.l.bf16 %v1480_v58 }
  0x37   : > { %1561 = vmatprep.mubr.bf16.mxu0 %v469_v34  ;;  %v478_v5 = vpack.c.bf16 %v462_v44, %v461_v43  ;;  %v1334_v24 = vunpack.c.l.bf16 %v1481_v1  ;;  %v1335_v25 = vunpack.c.h.bf16 %v1481_v1  ;;  %v1331_v10 = vunpack.c.h.bf16 %v1480_v58  ;;  %v1491_v58 = vld [vmem:[%s1823_s28 + $0x68] sm:$0xff]  }
  0x38   : > { %v1366_v31 = vunpack.c.l.bf16 %v1489_v23  ;;  %v1362_v32 = vunpack.c.l.bf16 %v1488_v12  ;;  %v1363_v43 = vunpack.c.h.bf16 %v1488_v12 }
  0x3a   : > { %1574 = vmatmul.mubr.bf16.gmra.mrb[8].mxu1 %v476_v39 }
  0x3b   : > { %1577 = vmatprep.mubr.bf16.mxu1 %v477_v41 }
  0x3e   : > { %1562 = vmatmul.mubr.bf16.gmra.mrb[12].mxu0 %v470_v42  ;;  %v1367_v42 = vunpack.c.h.bf16 %v1489_v23 }
  0x42   : > { %1578 = vmatmul.mubr.bf16.gmra.mrb[12].mxu1 %v478_v5 }
  0xf9   : > { %v1551_v52 = vpop.f32.mrb[0].mxu0 }
  0xfa   : > { %v577_v54 = vpop.f32.mrb[1].mxu0  ;;  %v770_v60 = vadd.f32 %v1551_v52, %v1326_v49  ;;  %v1342_v49 = vunpack.c.l.bf16 %v1483_v37 }
  0xfb   : > { %v768_v56 = vadd.f32 %v1322_v46, %v577_v54  ;;  %v1552_v57 = vpop.f32.mrb[2].mxu0 }
  0xfc   : > { %v771_v61 = vadd.f32 %v1552_v57, %v1327_v50  ;;  %v580_v62 = vpop.f32.mrb[3].mxu0  ;;  %v999_v48 = vmul.f32 %v770_v60, %v770_v60  ;;  %v1338_v50 = vunpack.c.l.bf16 %v1482_v38 }
  0xfd   : > { %v769_v0 = vadd.f32 %v1323_v53, %v580_v62  ;;  %v1567_v2 = vpop.f32.mrb[0].mxu1  ;;  %v997_v6 = vmul.f32 %v768_v56, %v768_v56 }
  0xfe   : > { %v1392_v8 = vpack.c.bf16 %v771_v61, %v770_v60  ;;  %v1837_v14 = vadd.f32 %v1567_v2, %v1358_v55  ;;  %v641_v17 = vpop.f32.mrb[1].mxu1  ;;  %v1000_v20 = vmul.f32 %v771_v61, %v771_v61 }
  0xff   : > { %v1387_v18 = vpack.c.bf16 %v769_v0, %v768_v56  ;;  %v960_v19 = vadd.f32 %v769_v0, %v768_v56  ;;  %v998_v21 = vmul.f32 %v769_v0, %v769_v0  ;;  %v1839_v22 = vadd.f32 %v1354_v59, %v641_v17  ;;  %v1568_v15 = vpop.f32.mrb[2].mxu1  ;;  %v1490_v59 = vld [vmem:[%s1823_s28 + $0x60] sm:$0xff]  }
 0x100   : > { %1494 = vst [vmem:[%s1834_s8 + $0x8] sm:$0xff] %v1392_v8   ;;  %v1844_v26 = vadd.f32 %v1568_v15, %v1359_v63  ;;  %v644_v27 = vpop.f32.mrb[3].mxu1 }
 0x101   : > { %1388 = vst [vmem:[%s1834_s8] sm:$0xff] %v1387_v18   ;;  %v961_v7 = vadd.f32 %v960_v19, %v770_v60  ;;  %v1029_v28 = vadd.f32 %v998_v21, %v997_v6  ;;  %v1555_v29 = vpop.f32.mrb[4].mxu0  ;;  %v1847_v16 = vadd.f32 %v1355_v3, %v644_v27  ;;  %v1343_v60 = vunpack.c.h.bf16 %v1483_v37 }
 0x102   : > { %v593_v30 = vpop.f32.mrb[5].mxu0  ;;  %v1432_v4 = vpack.c.bf16 %v1844_v26, %v1837_v14  ;;  %v774_v13 = vadd.f32 %v1555_v29, %v1334_v24  ;;  %v1374_v19 = vunpack.c.l.bf16 %v1491_v58  ;;  %v1370_v21 = vunpack.c.l.bf16 %v1490_v59 }
 0x103   : > { %v1030_v33 = vadd.f32 %v1029_v28, %v999_v48  ;;  %v772_v34 = vadd.f32 %v1330_v9, %v593_v30  ;;  %v962_v35 = vadd.f32 %v961_v7, %v771_v61  ;;  %v1556_v36 = vpop.f32.mrb[6].mxu0  ;;  %v1427_v39 = vpack.c.bf16 %v1847_v16, %v1839_v22 }
 0x104   : > { %v775_v40 = vadd.f32 %v1556_v36, %v1335_v25  ;;  %v596_v41 = vpop.f32.mrb[7].mxu0  ;;  %1502 = vst [vmem:[%s1834_s8 + $0x48] sm:$0xff] %v1432_v4   ;;  %v1339_v61 = vunpack.c.h.bf16 %v1482_v38  ;;  %v1003_v1 = vmul.f32 %v774_v13, %v774_v13  ;;  %v1485_v25 = vld [vmem:[%s1823_s28 + $0x38] sm:$0xff]   ;;  %v1375_v29 = vunpack.c.h.bf16 %v1491_v58 }
 0x105   : > { %v963_v44 = vadd.f32 %v962_v35, %v772_v34  ;;  %v1001_v5 = vmul.f32 %v772_v34, %v772_v34  ;;  %v1031_v11 = vadd.f32 %v1030_v33, %v1000_v20  ;;  %v773_v45 = vadd.f32 %v1331_v10, %v596_v41  ;;  %1501 = vst [vmem:[%s1834_s8 + $0x40] sm:$0xff] %v1427_v39   ;;  %v1571_v46 = vpop.f32.mrb[4].mxu1  ;;  %v1484_v10 = vld [vmem:[%s1823_s28 + $0x30] sm:$0xff]  }
 0x106   : > { %v1402_v47 = vpack.c.bf16 %v775_v40, %v774_v13  ;;  %v1857_v51 = vadd.f32 %v1571_v46, %v1366_v31  ;;  %v657_v52 = vpop.f32.mrb[5].mxu1  ;;  %v1004_v9 = vmul.f32 %v775_v40, %v775_v40  ;;  %v1371_v20 = vunpack.c.h.bf16 %v1490_v59 }
 0x107   : > { %v1032_v53 = vadd.f32 %v1031_v11, %v1001_v5  ;;  %v1397_v54 = vpack.c.bf16 %v773_v45, %v772_v34  ;;  %v964_v55 = vadd.f32 %v963_v44, %v773_v45  ;;  %v1002_v56 = vmul.f32 %v773_v45, %v773_v45  ;;  %v1572_v57 = vpop.f32.mrb[6].mxu1  ;;  %v1492_v44 = vld [vmem:[%s1823_s28 + $0x70] sm:$0xff]  }
 0x108   : > { %1496 = vst [vmem:[%s1834_s8 + $0x18] sm:$0xff] %v1402_v47   ;;  %v1862_v62 = vadd.f32 %v1362_v32, %v657_v52  ;;  %v1864_v63 = vadd.f32 %v1572_v57, %v1367_v42  ;;  %v660_v0 = vpop.f32.mrb[7].mxu1  ;;  %v1350_v35 = vunpack.c.l.bf16 %v1485_v25  ;;  %v1346_v36 = vunpack.c.l.bf16 %v1484_v10 }
 0x109   : > { %1495 = vst [vmem:[%s1834_s8 + $0x10] sm:$0xff] %v1397_v54   ;;  %v965_v2 = vadd.f32 %v964_v55, %v774_v13  ;;  %v1033_v3 = vadd.f32 %v1032_v53, %v1002_v56  ;;  %v1559_v6 = vpop.f32.mrb[8].mxu0  ;;  %v1867_v8 = vadd.f32 %v1363_v43, %v660_v0  ;;  %v1493_v43 = vld [vmem:[%s1823_s28 + $0x78] sm:$0xff]   ;;  %v1351_v5 = vunpack.c.h.bf16 %v1485_v25 }
 0x10a   : > { %v609_v17 = vpop.f32.mrb[9].mxu0  ;;  %v1442_v18 = vpack.c.bf16 %v1864_v63, %v1857_v51  ;;  %v778_v48 = vadd.f32 %v1559_v6, %v1342_v49  ;;  %v1347_v11 = vunpack.c.h.bf16 %v1484_v10  ;;  %v1382_v58 = vunpack.c.l.bf16 %v1493_v43 }
 0x10b   : > { %v1034_v15 = vadd.f32 %v1033_v3, %v1003_v1  ;;  %v776_v23 = vadd.f32 %v1338_v50, %v609_v17  ;;  %v966_v12 = vadd.f32 %v965_v2, %v775_v40  ;;  %v1560_v24 = vpop.f32.mrb[10].mxu0  ;;  %v1437_v27 = vpack.c.bf16 %v1867_v8, %v1862_v62 }
 0x10c   : > { %v779_v7 = vadd.f32 %v1560_v24, %v1343_v60  ;;  %v612_v28 = vpop.f32.mrb[11].mxu0  ;;  %1504 = vst [vmem:[%s1834_s8 + $0x58] sm:$0xff] %v1442_v18   ;;  %v1007_v49 = vmul.f32 %v778_v48, %v778_v48  ;;  %v1378_v59 = vunpack.c.l.bf16 %v1492_v44  ;;  %v1383_v17 = vunpack.c.h.bf16 %v1493_v43 }
 0x10d   : > { %v967_v30 = vadd.f32 %v966_v12, %v776_v23  ;;  %v1005_v4 = vmul.f32 %v776_v23, %v776_v23  ;;  %v1035_v31 = vadd.f32 %v1034_v15, %v1004_v9  ;;  %v777_v32 = vadd.f32 %v1339_v61, %v612_v28  ;;  %1503 = vst [vmem:[%s1834_s8 + $0x50] sm:$0xff] %v1437_v27   ;;  %v1575_v33 = vpop.f32.mrb[8].mxu1 }
 0x10e   : > { %v1412_v34 = vpack.c.bf16 %v779_v7, %v778_v48  ;;  %v1877_v37 = vadd.f32 %v1575_v33, %v1374_v19  ;;  %v673_v38 = vpop.f32.mrb[9].mxu1  ;;  %v1008_v55 = vmul.f32 %v779_v7, %v779_v7  ;;  %v1379_v18 = vunpack.c.h.bf16 %v1492_v44 }
 0x10f   : > { %v1036_v39 = vadd.f32 %v1035_v31, %v1005_v4  ;;  %v1407_v13 = vpack.c.bf16 %v777_v32, %v776_v23  ;;  %v968_v40 = vadd.f32 %v967_v30, %v777_v32  ;;  %v1006_v41 = vmul.f32 %v777_v32, %v777_v32  ;;  %v1576_v42 = vpop.f32.mrb[10].mxu1 }
 0x110   : > { %1498 = vst [vmem:[%s1834_s8 + $0x28] sm:$0xff] %v1412_v34   ;;  %v1882_v45 = vadd.f32 %v1370_v21, %v673_v38  ;;  %v1884_v46 = vadd.f32 %v1576_v42, %v1375_v29  ;;  %v676_v47 = vpop.f32.mrb[11].mxu1 }
 0x111   : > { %1497 = vst [vmem:[%s1834_s8 + $0x20] sm:$0xff] %v1407_v13   ;;  %v969_v50 = vadd.f32 %v968_v40, %v778_v48  ;;  %v1037_v52 = vadd.f32 %v1036_v39, %v1006_v41  ;;  %v1563_v53 = vpop.f32.mrb[12].mxu0  ;;  %v1887_v54 = vadd.f32 %v1371_v20, %v676_v47 }
 0x112   : > { %v625_v56 = vpop.f32.mrb[13].mxu0  ;;  %v1452_v57 = vpack.c.bf16 %v1884_v46, %v1877_v37  ;;  %v782_v3 = vadd.f32 %v1563_v53, %v1350_v35  ;;  %v1013_v35 = vmul.f32 %v1839_v22, %v1839_v22  ;;  %v1017_v53 = vmul.f32 %v1862_v62, %v1862_v62 }
 0x113   : > { %v1038_v60 = vadd.f32 %v1037_v52, %v1007_v49  ;;  %v780_v61 = vadd.f32 %v1346_v36, %v625_v56  ;;  %v970_v0 = vadd.f32 %v969_v50, %v779_v7  ;;  %v1564_v1 = vpop.f32.mrb[14].mxu0  ;;  %v1447_v2 = vpack.c.bf16 %v1887_v54, %v1882_v45 }
 0x114   : > { %v783_v6 = vadd.f32 %v1564_v1, %v1351_v5  ;;  %v628_v9 = vpop.f32.mrb[15].mxu0  ;;  %1506 = vst [vmem:[%s1834_s8 + $0x68] sm:$0xff] %v1452_v57   ;;  %v1011_v31 = vmul.f32 %v782_v3, %v782_v3  ;;  %v1014_v5 = vmul.f32 %v1847_v16, %v1847_v16  ;;  %v1016_v50 = vmul.f32 %v1844_v26, %v1844_v26 }
 0x115   : > { %v971_v19 = vadd.f32 %v970_v0, %v780_v61  ;;  %v1009_v21 = vmul.f32 %v780_v61, %v780_v61  ;;  %v1039_v15 = vadd.f32 %v1038_v60, %v1008_v55  ;;  %v781_v23 = vadd.f32 %v1347_v11, %v628_v9  ;;  %1505 = vst [vmem:[%s1834_s8 + $0x60] sm:$0xff] %v1447_v2   ;;  %v1579_v12 = vpop.f32.mrb[12].mxu1 }
 0x116   : > { %v1422_v24 = vpack.c.bf16 %v783_v6, %v782_v3  ;;  %v1895_v25 = vadd.f32 %v1579_v12, %v1382_v58  ;;  %v689_v10 = vpop.f32.mrb[13].mxu1  ;;  %v1012_v38 = vmul.f32 %v783_v6, %v783_v6  ;;  %v1015_v11 = vmul.f32 %v1837_v14, %v1837_v14 }
 0x117   : > { %v1040_v27 = vadd.f32 %v1039_v15, %v1009_v21  ;;  %v1417_v48 = vpack.c.bf16 %v781_v23, %v780_v61  ;;  %v972_v7 = vadd.f32 %v971_v19, %v781_v23  ;;  %v1010_v28 = vmul.f32 %v781_v23, %v781_v23  ;;  %v1580_v29 = vpop.f32.mrb[14].mxu1 }
 0x118   : > { %1500 = vst [vmem:[%s1834_s8 + $0x38] sm:$0xff] %v1422_v24   ;;  %v796_v20 = vadd.f32 %v1378_v59, %v689_v10  ;;  %v799_v30 = vadd.f32 %v1580_v29, %v1383_v17  ;;  %v692_v4 = vpop.f32.mrb[15].mxu1  ;;  %v1018_v58 = vmul.f32 %v1867_v8, %v1867_v8  ;;  %v1027_v24 = vmul.f32 %v1895_v25, %v1895_v25 }
 0x119   : > { %1499 = vst [vmem:[%s1834_s8 + $0x30] sm:$0xff] %v1417_v48   ;;  %v973_v32 = vadd.f32 %v972_v7, %v782_v3  ;;  %v1041_v33 = vadd.f32 %v1040_v27, %v1010_v28  ;;  %v797_v34 = vadd.f32 %v1379_v18, %v692_v4 }
 0x11a   : > { %v1462_v36 = vpack.c.bf16 %v799_v30, %v1895_v25  ;;  %v1025_v19 = vmul.f32 %v796_v20, %v796_v20  ;;  %v1028_v27 = vmul.f32 %v799_v30, %v799_v30 }
 0x11b   : > { %v1042_v39 = vadd.f32 %v1041_v33, %v1011_v31  ;;  %v974_v13 = vadd.f32 %v973_v32, %v783_v6  ;;  %v1457_v40 = vpack.c.bf16 %v797_v34, %v796_v20  ;;  %v1022_v6 = vmul.f32 %v1887_v54, %v1887_v54 }
 0x11c   : > { %1508 = vst [vmem:[%s1834_s8 + $0x78] sm:$0xff] %v1462_v36  }
 0x11d   : > { %v975_v41 = vadd.f32 %v974_v13, %v1839_v22  ;;  %v1043_v42 = vadd.f32 %v1042_v39, %v1012_v38  ;;  %1507 = vst [vmem:[%s1834_s8 + $0x70] sm:$0xff] %v1457_v40  }
 0x11f   : > { %v1044_v43 = vadd.f32 %v1043_v42, %v1013_v35  ;;  %v976_v44 = vadd.f32 %v975_v41, %v1847_v16 }
 0x121   : > { %v977_v47 = vadd.f32 %v976_v44, %v1837_v14  ;;  %v1045_v49 = vadd.f32 %v1044_v43, %v1014_v5  ;;  %v1019_v14 = vmul.f32 %v1857_v51, %v1857_v51 }
 0x123   : > { %v1046_v52 = vadd.f32 %v1045_v49, %v1015_v11  ;;  %v978_v22 = vadd.f32 %v977_v47, %v1844_v26  ;;  %v1020_v26 = vmul.f32 %v1864_v63, %v1864_v63 }
 0x125   : > { %v979_v55 = vadd.f32 %v978_v22, %v1862_v62  ;;  %v1047_v56 = vadd.f32 %v1046_v52, %v1016_v50  ;;  %v1021_v62 = vmul.f32 %v1882_v45, %v1882_v45 }
 0x127   : > { %v1048_v57 = vadd.f32 %v1047_v56, %v1017_v53  ;;  %v980_v16 = vadd.f32 %v979_v55, %v1867_v8 }
 0x129   : > { %v981_v59 = vadd.f32 %v980_v16, %v1857_v51  ;;  %v1049_v60 = vadd.f32 %v1048_v57, %v1018_v58  ;;  %v1023_v51 = vmul.f32 %v1877_v37, %v1877_v37 }
 0x12b   : > { %v1050_v61 = vadd.f32 %v1049_v60, %v1019_v14  ;;  %v982_v0 = vadd.f32 %v981_v59, %v1864_v63  ;;  %v1024_v63 = vmul.f32 %v1884_v46, %v1884_v46 }
 0x12d   : > { %v983_v1 = vadd.f32 %v982_v0, %v1882_v45  ;;  %v1051_v2 = vadd.f32 %v1050_v61, %v1020_v26 }
 0x12f   : > { %v1052_v3 = vadd.f32 %v1051_v2, %v1021_v62  ;;  %v984_v8 = vadd.f32 %v983_v1, %v1887_v54  ;;  %v1026_v54 = vmul.f32 %v797_v34, %v797_v34 }
 0x131   : > { %v985_v9 = vadd.f32 %v984_v8, %v1877_v37  ;;  %v1053_v17 = vadd.f32 %v1052_v3, %v1022_v6 }
 0x133   : > { %v1054_v18 = vadd.f32 %v1053_v17, %v1023_v51  ;;  %v986_v45 = vadd.f32 %v985_v9, %v1884_v46 }
 0x135   : > { %v987_v21 = vadd.f32 %v986_v45, %v796_v20  ;;  %v1055_v15 = vadd.f32 %v1054_v18, %v1024_v63 }
 0x137   : > { %v1056_v23 = vadd.f32 %v1055_v15, %v1025_v19  ;;  %v988_v12 = vadd.f32 %v987_v21, %v797_v34 }
 0x139   : > { %v989_v37 = vadd.f32 %v988_v12, %v1895_v25  ;;  %v1057_v10 = vadd.f32 %v1056_v23, %v1026_v54 }
 0x13b   : > { %v990_v48 = vadd.f32 %v989_v37, %v799_v30  ;;  %v1058_v7 = vadd.f32 %v1057_v10, %v1027_v24 }
 0x13d   : > { %v991_v28 = vrot.slane %v990_v48, 4  ;;  %v1059_v29 = vadd.f32 %v1058_v7, %v1028_v27 }
 0x13f   : > { %v992_v46 = vadd.f32 %v991_v28, %v990_v48  ;;  %v1060_v4 = vrot.slane %v1059_v29, 4 }
 0x141   : > { %v993_v20 = vrot.slane %v992_v46, 2  ;;  %v1061_v31 = vadd.f32 %v1060_v4, %v1059_v29 }
 0x143   : > { %v994_v32 = vadd.f32 %v993_v20, %v992_v46  ;;  %v1062_v33 = vrot.slane %v1061_v31, 2 }
 0x145   : > { %v995_v34 = vrot.slane %v994_v32, 1  ;;  %v1063_v35 = vadd.f32 %v1062_v33, %v1061_v31 }
 0x147   : > { %v1064_v36 = vrot.slane %v1063_v35, 1  ;;  %v996_v25 = vadd.f32 %v995_v34, %v994_v32 }
 0x149   : > { %v1065_v30 = vadd.f32 %v1064_v36, %v1063_v35 }
 0x14b   : > { %v1067_v38 = vsel %vm1066_vm0, %v996_v25, %v1065_v30 }
 0x14c   : > { %1068 = vst [vmem:[%s287_s11] sm:$0x3] %v1067_v38 }
 0x14d PF: > { %s17_s21 = sadd.s32 1, %s1619_s21  }
 0x14e   : > { %p14_p5 = scmp.ge.s32.totalorder %s17_s21, 4  }
 0x150   :  { %16 = sbr.rel (!%p14_p5) target bundleno = 1 (0x1), region = 85 }

// kernel: res_block_forward.6
= control target key start
LH: loop header
LB: loop body
LE: loop exit
PB: predicated region body
PF: predicated region fallthrough
CT: control target
= control target key end

     0   :  { %s3502_s12 = smov 0   ;;  %s4189_s0 = inlined_call_operand.vmem [shape: bf16[4,10,18,128], index: 0, kind: input, shape index: {}]   ;;  %s4190_s1 = inlined_call_operand.vmem [shape: bf16[9,128,128], index: 1, kind: input, shape index: {}]   ;;  %s4191_s2 = inlined_call_operand.vmem [shape: bf16[512,128], index: 2, kind: output, shape index: {0}]   ;;  %s4192_s3 = inlined_call_operand.vmem [shape: f32[4,2,128], index: 3, kind: output, shape index: {1}]  }
   0x1 LB: > { %s3508_s13 = sadd.s32 4294967295, %s3480_s12   ;;  %p2481_p0 = scmp.ge.s32.totalorder %s3480_s12, 1  ;;  %s3480_s12 = sphi %s3502_s12, %s14_s12  }
   0x2   : > { %p140_p1 = scmp.lt.s32.totalorder %s3480_s12, 5 }
   0x4   : > { %p141_p2 = pnand %p2481_p0, %p140_p1 }
   0x5   : > { %v3392_v0 = vld [vmem:[%s4190_s1 + $0x40] sm:$0xff] (!%p141_p2)   ;;  %p168_p3 = scmp.lt.s32.totalorder (!%p141_p2), %s3508_s13, 3  ;;  %v3394_v2 = vld [vmem:[%s4190_s1 + $0x48] sm:$0xff] (!%p141_p2)   ;;  %v3396_v4 = vld [vmem:[%s4190_s1 + $0x50] sm:$0xff] (!%p141_p2)   ;;  %vm230_vm0 = vsmask.f32 (!%p141_p2), 3328 }
   0x6   : > { %144 = sbr.rel (%p141_p2) target bundleno = 433 (0x1b1), region = 28  ;;  %v3393_v1 = vld [vmem:[%s4190_s1 + $0x100] sm:$0xff] (!%p141_p2)   ;;  %2951 = vmatprep.subr.bf16.mxu1 (!%p141_p2), %v3392_v0  ;;  %v3395_v3 = vld [vmem:[%s4190_s1 + $0x108] sm:$0xff] (!%p141_p2)   ;;  %v3397_v5 = vld [vmem:[%s4190_s1 + $0x110] sm:$0xff] (!%p141_p2)   ;;  %vm231_vm1 = vsmask.f32 (!%p141_p2), 7440 }
   0x7   : > { %3079 = vmatprep.subr.bf16.mxu0 (!%p141_p2), %v3393_v1  ;;  %2952 = vmatpush3.bf16.msra.mxu1 (!%p141_p2), %v3392_v0  ;;  %v3398_v6 = vld [vmem:[%s4190_s1 + $0x58] sm:$0xff] (!%p141_p2)   ;;  %v3400_v8 = vld [vmem:[%s4190_s1 + $0x60] sm:$0xff] (!%p141_p2)   ;;  %v3402_v10 = vld [vmem:[%s4190_s1 + $0x68] sm:$0xff] (!%p141_p2)   ;;  %vm820_vm3 = vcmask (!%p141_p2), 1042432   ;;  %vm821_vm4 = vcmask (!%p141_p2), 1046532   ;;  %s2483_s22 = sshll.u32 (!%p141_p2), %s3508_s13, 4 }
   0x8   : > { %3080 = vmatpush3.bf16.msra.mxu0 (!%p141_p2), %v3393_v1  ;;  %2953 = vmatprep.subr.bf16.mxu1 (!%p141_p2), %v3394_v2  ;;  %v3399_v7 = vld [vmem:[%s4190_s1 + $0x118] sm:$0xff] (!%p141_p2)   ;;  %v3401_v9 = vld [vmem:[%s4190_s1 + $0x120] sm:$0xff] (!%p141_p2)   ;;  %v3403_v11 = vld [vmem:[%s4190_s1 + $0x128] sm:$0xff] (!%p141_p2)   ;;  %p174_p4 = scmp.lt.s32.totalorder (!%p141_p2), %s2483_s22, 63  ;;  %vm2387_vm6 = vcmask (!%p141_p2), 1040384  }
   0x9   : > { %3081 = vmatprep.subr.bf16.mxu0 (!%p141_p2), %v3395_v3  ;;  %v3404_v17 = vld [vmem:[%s4190_s1 + $0x70] sm:$0xff] (!%p141_p2)   ;;  %v3406_v35 = vld [vmem:[%s4190_s1 + $0x78] sm:$0xff] (!%p141_p2)   ;;  %vm3596_vm2 = vmor (!%p141_p2), %vm230_vm0, %vm231_vm1 }
   0xa   : > { %v3405_v30 = vld [vmem:[%s4190_s1 + $0x130] sm:$0xff] (!%p141_p2)   ;;  %v3407_v51 = vld [vmem:[%s4190_s1 + $0x138] sm:$0xff] (!%p141_p2)   ;;  %v3408_v0 = vld [vmem:[%s4190_s1] sm:$0xff] (!%p141_p2)  }
   0xb   : > { %2954 = vmatpush3.bf16.msra.mxu1 (!%p141_p2), %v3394_v2  ;;  %vm3797_vm5 = vmor (!%p141_p2), %vm820_vm3, %vm821_vm4 }
   0xc   : > { %3082 = vmatpush3.bf16.msra.mxu0 (!%p141_p2), %v3395_v3  ;;  %2955 = vmatprep.subr.bf16.mxu1 (!%p141_p2), %v3396_v4 }
   0xd   : > { %s3532_s26 = scalar_select %p168_p3, %s3508_s13, 3  ;;  %3083 = vmatprep.subr.bf16.mxu0 %v3397_v5 }
   0xe   : > { %s4198_s22 = smov (!%p174_p4, %s2483_s22), 63 }
   0xf   : > { %s3383_s4 = smul.u32 120, %s3532_s26  ;;  %2956 = vmatpush3.bf16.msra.mxu1 %v3396_v4  ;;  %v3409_v4 = vld [vmem:[%s4190_s1 + $0x140] sm:$0xff]   ;;  %s2484_s13 = sshll.u32 %s4198_s22, 2 }
  0x10   : > { %3084 = vmatpush3.bf16.msra.mxu0 %v3397_v5  ;;  %2957 = vmatprep.subr.bf16.mxu1 %v3398_v6  ;;  %s4144_s25 = scalar_lea.vmem %s4191_s2, %s2484_s13  ;;  %s2485_s27 = sshll.u32 %s3532_s26, 1 }
  0x11   : > { %3085 = vmatprep.subr.bf16.mxu0 %v3399_v7  ;;  %s3550_s11 = scalar_lea.vmem %s4189_s0, %s3383_s4  ;;  %s182_s30 = scalar_lea.vmem %s4192_s3, %s2485_s27 }
  0x12   : > { %v3559_v12 = vld [vmem:[%s3550_s11] sm:$0xf]  ;;  %v3562_v13 = vld [vmem:[%s3550_s11 + $0x4] sm:$0xf]  ;;  %v3565_v14 = vld [vmem:[%s3550_s11 + $0x8] sm:$0x1] }
  0x13   : > { %2958 = vmatpush3.bf16.msra.mxu1 %v3398_v6  ;;  %v234_v15 = vshrl.u32 %v3559_v12, 16  ;;  %v237_v16 = vshll.u32 %v3559_v12, 16  ;;  %v243_v18 = vshll.u32 %v3562_v13, 16  ;;  %v247_v19 = vshrl.u32 %v3562_v13, 16  ;;  %v3576_v21 = vld [vmem:[%s3550_s11 + $0xc] sm:$0xf] }
  0x14   : > { %3086 = vmatpush3.bf16.msra.mxu0 %v3399_v7  ;;  %2959 = vmatprep.subr.bf16.mxu1 %v3400_v8  ;;  %v253_v20 = vshll.u32 %v3565_v14, 16  ;;  %v3579_v24 = vld [vmem:[%s3550_s11 + $0x10] sm:$0xf]  ;;  %v3582_v25 = vld [vmem:[%s3550_s11 + $0x14] sm:$0x1]  ;;  %v258_v29 = vshrl.u32 %v3576_v21, 16 }
  0x15   : > { %3087 = vmatprep.subr.bf16.mxu0 %v3401_v9  ;;  %v236_v22 = vrot.slane %v234_v15, 4  ;;  %v239_v23 = vrot.slane %v237_v16, 5  ;;  %v245_v26 = vrot.slane %v243_v18, 5  ;;  %v249_v27 = vrot.slane %v247_v19, 4  ;;  %v3602_v40 = vld [vmem:[%s3550_s11 + $0x18] sm:$0xf] }
  0x16   : > { %v255_v28 = vrot.slane %v253_v20, 5  ;;  %v261_v32 = vshll.u32 %v3576_v21, 16  ;;  %v267_v33 = vshll.u32 %v3579_v24, 16  ;;  %v271_v34 = vshrl.u32 %v3579_v24, 16  ;;  %v3605_v41 = vld [vmem:[%s3550_s11 + $0x1c] sm:$0xf] }
  0x17   : > { %2960 = vmatpush3.bf16.msra.mxu1 %v3400_v8  ;;  %v240_v31 = vor.u32 %v239_v23, %v236_v22  ;;  %v250_v37 = vor.u32 %v249_v27, %v245_v26  ;;  %v260_v38 = vrot.slane %v258_v29, 4  ;;  %v277_v39 = vshll.u32 %v3582_v25, 16  ;;  %v3608_v46 = vld [vmem:[%s3550_s11 + $0x20] sm:$0x1]  ;;  %v3633_v7 = vld [vmem:[%s3550_s11 + $0x24] sm:$0xf] }
  0x18   : > { %3088 = vmatpush3.bf16.msra.mxu0 %v3401_v9  ;;  %2961 = vmatprep.subr.bf16.mxu1 %v3402_v10  ;;  %v263_v43 = vrot.slane %v261_v32, 5  ;;  %v269_v44 = vrot.slane %v267_v33, 5  ;;  %v273_v45 = vrot.slane %v271_v34, 4  ;;  %v282_v49 = vshrl.u32 %v3602_v40, 16  ;;  %v3636_v8 = vld [vmem:[%s3550_s11 + $0x28] sm:$0xf] }
  0x19   : > { %3089 = vmatprep.subr.bf16.mxu0 %v3403_v11  ;;  %v241_v42 = vrot.slane %v240_v31, 4  ;;  %v251_v47 = vrot.slane %v250_v37, 4  ;;  %v279_v48 = vrot.slane %v277_v39, 5  ;;  %v285_v50 = vshll.u32 %v3602_v40, 16  ;;  %v3639_v9 = vld [vmem:[%s3550_s11 + $0x2c] sm:$0x1] }
  0x1a   : > { %v264_v53 = vor.u32 %v263_v43, %v260_v38  ;;  %v274_v54 = vor.u32 %v273_v45, %v269_v44  ;;  %v291_v55 = vshll.u32 %v3605_v41, 16  ;;  %v284_v57 = vrot.slane %v282_v49, 4  ;;  %v3649_v23 = vld [vmem:[%s3550_s11 + $0x30] sm:$0xf]  ;;  %v3655_v29 = vld [vmem:[%s3550_s11 + $0x34] sm:$0xf] }
  0x1b   : > { %2962 = vmatpush3.bf16.msra.mxu1 %v3402_v10  ;;  %v246_v52 = vsel %vm3596_vm2, %v241_v42, %v245_v26  ;;  %v256_v56 = vsel %vm3596_vm2, %v251_v47, %v255_v28  ;;  %v287_v58 = vrot.slane %v285_v50, 5  ;;  %v295_v59 = vshrl.u32 %v3605_v41, 16  ;;  %v3411_v37 = vld [vmem:[%s4190_s1 + $0x148] sm:$0xff]   ;;  %v3412_v47 = vld [vmem:[%s4190_s1 + $0x10] sm:$0xff]  }
  0x1c   : > { %3090 = vmatpush3.bf16.msra.mxu0 %v3403_v11  ;;  %2963 = vmatprep.subr.bf16.mxu1 %v3404_v17  ;;  %v2502_v60 = vcombine.low %v246_v52, %v256_v56  ;;  %v265_v61 = vrot.slane %v264_v53, 4  ;;  %v275_v62 = vrot.slane %v274_v54, 4  ;;  %v293_v63 = vrot.slane %v291_v55, 5  ;;  %v3413_v56 = vld [vmem:[%s4190_s1 + $0x150] sm:$0xff]  }
  0x1d   : > { %3091 = vmatprep.subr.bf16.mxu0 %v3405_v30  ;;  %v288_v1 = vor.u32 %v287_v58, %v284_v57  ;;  %v297_v2 = vrot.slane %v295_v59, 4  ;;  %v301_v3 = vshll.u32 %v3608_v46, 16  ;;  %v306_v18 = vshrl.u32 %v3633_v7, 16 }
  0x1e   : > { %2967 = vmatprep.mubr.bf16.mxu1 %v2502_v60  ;;  %v270_v5 = vsel %vm3596_vm2, %v265_v61, %v269_v44  ;;  %v280_v6 = vsel %vm3596_vm2, %v275_v62, %v279_v48  ;;  %v309_v19 = vshll.u32 %v3633_v7, 16  ;;  %v315_v20 = vshll.u32 %v3636_v8, 16  ;;  %v3681_v60 = vld [vmem:[%s3550_s11 + $0x3c] sm:$0xf]  ;;  %v3684_v61 = vld [vmem:[%s3550_s11 + $0x40] sm:$0xf] }
  0x1f   : > { %2964 = vmatpush3.bf16.msra.mxu1 %v3404_v17  ;;  %v2503_v10 = vcombine.low %v270_v5, %v280_v6  ;;  %v289_v11 = vrot.slane %v288_v1, 4  ;;  %v298_v15 = vor.u32 %v297_v2, %v293_v63  ;;  %v303_v16 = vrot.slane %v301_v3, 5  ;;  %v3410_v17 = vld [vmem:[%s4190_s1 + $0x8] sm:$0xff]   ;;  %v3414_v6 = vld [vmem:[%s4190_s1 + $0x18] sm:$0xff]  }
  0x20   : > { %3092 = vmatpush3.bf16.msra.mxu0 %v3405_v30  ;;  %2965 = vmatprep.subr.bf16.mxu1 %v3406_v35  ;;  %v319_v22 = vshrl.u32 %v3636_v8, 16  ;;  %v325_v28 = vshll.u32 %v3639_v9, 16  ;;  %v3658_v30 = vld [vmem:[%s3550_s11 + $0x38] sm:$0x1]  ;;  %v308_v31 = vrot.slane %v306_v18, 4  ;;  %v311_v32 = vrot.slane %v309_v19, 5 }
  0x21   : > { %3093 = vmatprep.subr.bf16.mxu0 %v3407_v51  ;;  %3095 = vmatprep.mubr.bf16.mxu0 %v2503_v10  ;;  %v294_v26 = vsel %vm3596_vm2, %v289_v11, %v293_v63  ;;  %v299_v27 = vrot.slane %v298_v15, 4  ;;  %v317_v33 = vrot.slane %v315_v20, 5  ;;  %v330_v39 = vshrl.u32 %v3649_v23, 16  ;;  %v3704_v18 = vld [vmem:[%s3550_s11 + $0x48] sm:$0xf] }
  0x22   : > { %v321_v34 = vrot.slane %v319_v22, 4  ;;  %v327_v38 = vrot.slane %v325_v28, 5  ;;  %v333_v42 = vshll.u32 %v3649_v23, 16  ;;  %v312_v44 = vor.u32 %v311_v32, %v308_v31  ;;  %v3415_v28 = vld [vmem:[%s4190_s1 + $0x158] sm:$0xff]  }
  0x23   : > { %2966 = vmatpush3.bf16.msra.mxu1 %v3406_v35  ;;  %v304_v35 = vsel %vm3596_vm2, %v299_v27, %v303_v16  ;;  %v339_v48 = vshll.u32 %v3655_v29, 16  ;;  %v332_v49 = vrot.slane %v330_v39, 4  ;;  %v349_v52 = vshll.u32 %v3658_v30, 16  ;;  %v3713_v27 = vld [vmem:[%s3550_s11 + $0x50] sm:$0x1] }
  0x24   : > { %3094 = vmatpush3.bf16.msra.mxu0 %v3407_v51  ;;  %2983 = vmatprep.subr.bf16.mxu1 %v3408_v0  ;;  %v3667_v43 = vcombine.low %v294_v26, %v304_v35  ;;  %v322_v45 = vor.u32 %v321_v34, %v317_v33  ;;  %v335_v50 = vrot.slane %v333_v42, 5  ;;  %v343_v51 = vshrl.u32 %v3655_v29, 16  ;;  %v3710_v26 = vld [vmem:[%s3550_s11 + $0x4c] sm:$0xf] }
  0x25   : > { %3111 = vmatprep.subr.bf16.mxu0 %v3409_v4  ;;  %v313_v53 = vrot.slane %v312_v44, 4  ;;  %v341_v55 = vrot.slane %v339_v48, 5  ;;  %v351_v59 = vrot.slane %v349_v52, 5  ;;  %v354_v1 = vshrl.u32 %v3681_v60, 16 }
  0x26   : > { %2968 = vmatmul.mubr.bf16.vlgmr.msra.gmra.mrb[0].mxu1 %v2503_v10  ;;  %v323_v54 = vrot.slane %v322_v45, 4  ;;  %v336_v57 = vor.u32 %v335_v50, %v332_v49  ;;  %v345_v58 = vrot.slane %v343_v51, 4  ;;  %v357_v2 = vshll.u32 %v3681_v60, 16 }
  0x27   : > { %2984 = vmatpush3.bf16.msra.mxu1 %v3408_v0  ;;  %3096 = vmatmul.mubr.bf16.vlgmr.msra.gmra.mrb[0].mxu0 %v3667_v43  ;;  %v318_v62 = vsel %vm3596_vm2, %v313_v53, %v317_v33  ;;  %v3691_v0 = vld [vmem:[%s3550_s11 + $0x44] sm:$0x1]  ;;  %v363_v10 = vshll.u32 %v3684_v61, 16  ;;  %v356_v11 = vrot.slane %v354_v1, 4  ;;  %v367_v16 = vshrl.u32 %v3684_v61, 16 }
  0x28   : > { %2985 = vmatprep.subr.bf16.mxu1 %v3410_v17  ;;  %2971 = vmatprep.mubr.bf16.mxu1 %v3667_v43  ;;  %v328_v63 = vsel %vm3596_vm2, %v323_v54, %v327_v38  ;;  %v346_v5 = vor.u32 %v345_v58, %v341_v55  ;;  %v359_v15 = vrot.slane %v357_v2, 5  ;;  %v378_v34 = vshrl.u32 %v3704_v18, 16 }
  0x29   : > { %3112 = vmatpush3.bf16.msra.mxu0 %v3409_v4  ;;  %v3695_v3 = vcombine.low %v318_v62, %v328_v63  ;;  %v337_v4 = vrot.slane %v336_v57, 4  ;;  %v365_v22 = vrot.slane %v363_v10, 5  ;;  %v369_v32 = vrot.slane %v367_v16, 4  ;;  %v3738_v57 = vld [vmem:[%s3550_s11 + $0x54] sm:$0xf] }
  0x2a   : > { %3113 = vmatprep.subr.bf16.mxu0 %v3411_v37  ;;  %v347_v20 = vrot.slane %v346_v5, 4  ;;  %v360_v31 = vor.u32 %v359_v15, %v356_v11  ;;  %v381_v38 = vshll.u32 %v3704_v18, 16  ;;  %v387_v39 = vshll.u32 %v3710_v26, 16  ;;  %v3742_v62 = vld [vmem:[%s3550_s11 + $0x58] sm:$0xf] }
  0x2b   : > { %2986 = vmatpush3.bf16.msra.mxu1 %v3410_v17  ;;  %v373_v17 = vshll.u32 %v3691_v0, 16  ;;  %3099 = vmatprep.mubr.bf16.mxu0 %v3695_v3  ;;  %v342_v19 = vsel %vm3596_vm2, %v337_v4, %v341_v55  ;;  %v391_v42 = vshrl.u32 %v3710_v26, 16  ;;  %v370_v48 = vor.u32 %v369_v32, %v365_v22  ;;  %v3417_v55 = vld [vmem:[%s4190_s1 + $0x160] sm:$0xff]   ;;  %v3745_v63 = vld [vmem:[%s3550_s11 + $0x5c] sm:$0x1]  ;;  %v3418_v4 = vld [vmem:[%s4190_s1 + $0x28] sm:$0xff]  }
  0x2c   : > { %2987 = vmatprep.subr.bf16.mxu1 %v3412_v47  ;;  %v352_v35 = vsel %vm3596_vm2, %v347_v20, %v351_v59  ;;  %v361_v45 = vrot.slane %v360_v31, 4  ;;  %v380_v49 = vrot.slane %v378_v34, 4  ;;  %v389_v50 = vrot.slane %v387_v39, 5  ;;  %v3778_v39 = vld [vmem:[%s3550_s11 + $0x68] sm:$0x1] }
  0x2d   : > { %3114 = vmatpush3.bf16.msra.mxu0 %v3411_v37  ;;  %v375_v33 = vrot.slane %v373_v17, 5  ;;  %v3416_v37 = vld [vmem:[%s4190_s1 + $0x20] sm:$0xff]   ;;  %v3728_v44 = vcombine.low %v342_v19, %v352_v35  ;;  %v393_v51 = vrot.slane %v391_v42, 4  ;;  %v397_v52 = vshll.u32 %v3713_v27, 16  ;;  %v3419_v17 = vld [vmem:[%s4190_s1 + $0x168] sm:$0xff]   ;;  %v3420_v35 = vld [vmem:[%s4190_s1 + $0x30] sm:$0xff]  }
  0x2e   : > { %2972 = vmatmul.mubr.bf16.gmra.mrb[4].mxu1 %v3695_v3  ;;  %3115 = vmatprep.subr.bf16.mxu0 %v3413_v56  ;;  %v366_v53 = vsel %vm3596_vm2, %v361_v45, %v365_v22  ;;  %v371_v54 = vrot.slane %v370_v48, 4  ;;  %v402_v1 = vshrl.u32 %v3738_v57, 16  ;;  %v405_v5 = vshll.u32 %v3738_v57, 16 }
  0x2f   : > { %2988 = vmatpush3.bf16.msra.mxu1 %v3412_v47  ;;  %v383_v47 = vrot.slane %v381_v38, 5  ;;  %3100 = vmatmul.mubr.bf16.gmra.mrb[4].mxu0 %v3728_v44  ;;  %v394_v58 = vor.u32 %v393_v51, %v389_v50  ;;  %v399_v59 = vrot.slane %v397_v52, 5  ;;  %v415_v10 = vshrl.u32 %v3742_v62, 16  ;;  %v3775_v38 = vld [vmem:[%s3550_s11 + $0x64] sm:$0xf]  ;;  %v3421_v51 = vld [vmem:[%s4190_s1 + $0x170] sm:$0xff]  }
  0x30   : > { %2989 = vmatprep.subr.bf16.mxu1 %v3414_v6  ;;  %2975 = vmatprep.mubr.bf16.mxu1 %v3728_v44  ;;  %v376_v2 = vsel %vm3596_vm2, %v371_v54, %v375_v33  ;;  %v404_v19 = vrot.slane %v402_v1, 4  ;;  %v407_v20 = vrot.slane %v405_v5, 5  ;;  %v421_v32 = vshll.u32 %v3745_v63, 16  ;;  %v3763_v33 = vld [vmem:[%s3550_s11 + $0x60] sm:$0xf] }
  0x31   : > { %3116 = vmatpush3.bf16.msra.mxu0 %v3413_v56  ;;  %v384_v56 = vor.u32 %v383_v47, %v380_v49  ;;  %v3756_v11 = vcombine.low %v366_v53, %v376_v2  ;;  %v395_v16 = vrot.slane %v394_v58, 4  ;;  %v417_v31 = vrot.slane %v415_v10, 4 }
  0x32   : > { %3117 = vmatprep.subr.bf16.mxu0 %v3415_v28  ;;  %v1274_v42 = vshrl.u32 %v3763_v33, 16  ;;  %v1277_v45 = vshll.u32 %v3763_v33, 16  ;;  %v408_v49 = vor.u32 %v407_v20, %v404_v19  ;;  %v1283_v54 = vshll.u32 %v3775_v38, 16 }
  0x33   : > { %2990 = vmatpush3.bf16.msra.mxu1 %v3414_v6  ;;  %v411_v6 = vshll.u32 %v3742_v62, 16  ;;  %v385_v15 = vrot.slane %v384_v56, 4  ;;  %3103 = vmatprep.mubr.bf16.mxu0 %v3756_v11  ;;  %v400_v34 = vsel %vm3596_vm2, %v395_v16, %v399_v59  ;;  %v1287_v56 = vshrl.u32 %v3775_v38, 16 }
  0x34   : > { %2991 = vmatprep.subr.bf16.mxu1 %v3416_v37  ;;  %v1276_v52 = vrot.slane %v1274_v42, 4  ;;  %v1279_v53 = vrot.slane %v1277_v45, 5  ;;  %v409_v58 = vrot.slane %v408_v49, 4  ;;  %v1293_v59 = vshll.u32 %v3778_v39, 16 }
  0x35   : > { %3118 = vmatpush3.bf16.msra.mxu0 %v3415_v28  ;;  %v413_v22 = vrot.slane %v411_v6, 5  ;;  %v390_v28 = vsel %vm3596_vm2, %v385_v15, %v389_v50  ;;  %v423_v50 = vrot.slane %v421_v32, 5  ;;  %v2535_v1 = vrot.slane %v3576_v21, 9 }
  0x36   : > { %3119 = vmatprep.subr.bf16.mxu0 %v3417_v55  ;;  %2976 = vmatmul.mubr.bf16.gmra.mrb[8].mxu1 %v3756_v11  ;;  %v3782_v48 = vcombine.low %v390_v28, %v400_v34  ;;  %v1280_v2 = vor.u32 %v1279_v53, %v1276_v52  ;;  %v1289_v5 = vrot.slane %v1287_v56, 4  ;;  %v2518_v6 = vcombine.low %v3559_v12, %v3562_v13  ;;  %v3422_v34 = vld [vmem:[%s4190_s1 + $0x38] sm:$0xff]  }
  0x37   : > { %2992 = vmatpush3.bf16.msra.mxu1 %v3416_v37  ;;  %v418_v47 = vor.u32 %v417_v31, %v413_v22  ;;  %v414_v15 = vsel %vm3596_vm2, %v409_v58, %v413_v22  ;;  %v1295_v19 = vrot.slane %v1293_v59, 5  ;;  %v832_v20 = vrot.slane %v3579_v24, 5  ;;  %v3423_v22 = vld [vmem:[%s4190_s1 + $0x178] sm:$0xff]  }
  0x38   : > { %2993 = vmatprep.subr.bf16.mxu1 %v3418_v4  ;;  %3104 = vmatmul.mubr.bf16.gmra.mrb[8].mxu0 %v3782_v48  ;;  %v1281_v32 = vrot.slane %v1280_v2, 4  ;;  %v839_v45 = vrot.slane %v3605_v41, 5  ;;  %v2536_v53 = vrot.slane %v3602_v40, 9  ;;  %v3847_v2 = vcombine.low %v3576_v21, %v3579_v24  ;;  %v3428_v21 = vld [vmem:[%s4190_s1 + $0x88] sm:$0xff]  }
  0x39   : > { %3120 = vmatpush3.bf16.msra.mxu0 %v3417_v55  ;;  %v419_v37 = vrot.slane %v418_v47, 4  ;;  %2979 = vmatprep.mubr.bf16.mxu1 %v3782_v48  ;;  %v1285_v55 = vrot.slane %v1283_v54, 5  ;;  %v833_v42 = vsel %vm3797_vm5, %v2535_v1, %v832_v20  ;;  %v2537_v1 = vrot.slane %v3633_v7, 9 }
  0x3a   : > { %3121 = vmatprep.subr.bf16.mxu0 %v3419_v17  ;;  %v841_v58 = vrot.slane %v839_v45, 4  ;;  %v853_v24 = vrot.slane %v3655_v29, 5 }
  0x3b   : > { %2994 = vmatpush3.bf16.msra.mxu1 %v3418_v4  ;;  %v424_v16 = vsel %vm3596_vm2, %v419_v37, %v423_v50  ;;  %v1290_v28 = vor.u32 %v1289_v5, %v1285_v55  ;;  %v835_v4 = vrot.slane %v3582_v25, 5  ;;  %v1286_v49 = vsel %vm3596_vm2, %v1281_v32, %v1285_v55 }
  0x3c   : > { %v3806_v31 = vcombine.low %v414_v15, %v424_v16  ;;  %2995 = vmatprep.subr.bf16.mxu1 %v3420_v35  ;;  %v3824_v25 = vcombine.low %v3763_v33, %v3775_v38  ;;  %v842_v50 = vrot.slane %v3608_v46, 5  ;;  %v846_v37 = vrot.slane %v3636_v8, 5  ;;  %v3426_v46 = vld [vmem:[%s4190_s1 + $0x80] sm:$0xff]  }
  0x3d   : > { %3122 = vmatpush3.bf16.msra.mxu0 %v3419_v17  ;;  %v834_v17 = vrot.slane %v832_v20, 4  ;;  %v1291_v47 = vrot.slane %v1290_v28, 4  ;;  %v3852_v5 = vcombine.low %v3602_v40, %v3605_v41  ;;  %v860_v15 = vrot.slane %v3684_v61, 5 }
  0x3e   : > { %3123 = vmatprep.subr.bf16.mxu0 %v3421_v51  ;;  %3107 = vmatprep.mubr.bf16.mxu0 %v3806_v31  ;;  %v848_v55 = vrot.slane %v846_v37, 4  ;;  %v847_v40 = vsel %vm3797_vm5, %v2537_v1, %v846_v37  ;;  %v2538_v20 = vrot.slane %v3649_v23, 9  ;;  %v855_v28 = vrot.slane %v853_v24, 4  ;;  %v3435_v37 = vld [vmem:[%s4190_s1 + $0x198] sm:$0xff]  }
  0x3f   : > { %2980 = vmatmul.mubr.bf16.gmra.mrb[12].mxu1 %v3806_v31  ;;  %v836_v52 = vsel %vm3797_vm5, %v834_v17, %v835_v4  ;;  %v1296_v54 = vsel %vm3596_vm2, %v1291_v47, %v1295_v19  ;;  %v3429_v19 = vld [vmem:[%s4190_s1 + $0x188] sm:$0xff]   ;;  %v3432_v4 = vld [vmem:[%s4190_s1 + $0x90] sm:$0xff]   ;;  %v863_v17 = vrot.slane %v3691_v0, 5  ;;  %v867_v47 = vrot.slane %v3710_v26, 5  ;;  %v3434_v0 = vld [vmem:[%s4190_s1 + $0x98] sm:$0xff]  }
  0x40   : > { %2996 = vmatpush3.bf16.msra.mxu1 %v3420_v35  ;;  %2999 = vmatprep.mubr.bf16.mxu1 %v2518_v6  ;;  %v3832_v56 = vcombine.low %v833_v42, %v836_v52  ;;  %v3835_v59 = vcombine.low %v1286_v49, %v1296_v54  ;;  %v3427_v35 = vld [vmem:[%s4190_s1 + $0x180] sm:$0xff]   ;;  %v840_v6 = vsel %vm3797_vm5, %v2536_v53, %v839_v45  ;;  %v862_v42 = vrot.slane %v860_v15, 4 }
  0x41   : > { %3124 = vmatpush3.bf16.msra.mxu0 %v3421_v51  ;;  %2997 = vmatprep.subr.bf16.mxu1 %v3422_v34  ;;  %v849_v51 = vrot.slane %v3639_v9, 5  ;;  %v843_v9 = vsel %vm3797_vm5, %v841_v58, %v842_v50  ;;  %v3886_v45 = vcombine.low %v3633_v7, %v3636_v8  ;;  %v3894_v49 = vcombine.low %v3649_v23, %v3655_v29 }
  0x42   : > { %3125 = vmatprep.subr.bf16.mxu0 %v3423_v22  ;;  %3108 = vmatmul.mubr.bf16.gmra.mrb[12].mxu0 %v3835_v59  ;;  %v3869_v16 = vcombine.low %v840_v6, %v843_v9  ;;  %v828_v50 = vrot.slane %v3565_v14, 5  ;;  %v854_v7 = vsel %vm3797_vm5, %v2538_v20, %v853_v24  ;;  %v864_v14 = vsel %vm3797_vm5, %v862_v42, %v863_v17  ;;  %v3446_v17 = vld [vmem:[%s4190_s1 + $0xb8] sm:$0xff]  }
  0x43   : > { %3127 = vmatprep.mubr.bf16.mxu0 %v3832_v56  ;;  %v850_v41 = vsel %vm3797_vm5, %v848_v55, %v849_v51  ;;  %v874_v29 = vrot.slane %v3742_v62, 5  ;;  %v2534_v52 = vrot.slane %v3559_v12, 9  ;;  %v2540_v53 = vrot.slane %v3704_v18, 9 }
  0x44   : > { %2998 = vmatpush3.bf16.msra.mxu1 %v3422_v34  ;;  %v3876_v32 = vcombine.low %v847_v40, %v850_v41  ;;  %v856_v34 = vrot.slane %v3658_v30, 5  ;;  %v3433_v30 = vld [vmem:[%s4190_s1 + $0x190] sm:$0xff]   ;;  %v825_v54 = vrot.slane %v3562_v13, 5  ;;  %v869_v12 = vrot.slane %v867_v47, 4 }
  0x45   : > { %3126 = vmatpush3.bf16.msra.mxu0 %v3423_v22  ;;  %3015 = vmatprep.subr.bf16.mxu1 %v3426_v46  ;;  %v2539_v22 = vrot.slane %v3681_v60, 9  ;;  %v2541_v13 = vrot.slane %v3738_v57, 9  ;;  %v876_v6 = vrot.slane %v874_v29, 4  ;;  %v877_v9 = vrot.slane %v3745_v63, 5 }
  0x46   : > { %3143 = vmatprep.subr.bf16.mxu0 %v3427_v35  ;;  %v857_v8 = vsel %vm3797_vm5, %v855_v28, %v856_v34  ;;  %v826_v51 = vsel %vm3797_vm5, %v2534_v52, %v825_v54  ;;  %v827_v55 = vrot.slane %v825_v54, 4  ;;  %v3940_v24 = vcombine.low %v3704_v18, %v3710_v26  ;;  %v3439_v18 = vld [vmem:[%s4190_s1 + $0x1a0] sm:$0xff]   ;;  %v3458_v52 = vld [vmem:[%s4190_s1 + $0xe8] sm:$0xff]  }
  0x47   : > { %3000 = vmatmul.mubr.bf16.vlgmr.msra.gmra.mrb[0].mxu1 %v3847_v2  ;;  %v861_v23 = vsel %vm3797_vm5, %v2539_v22, %v860_v15  ;;  %v3915_v58 = vcombine.low %v854_v7, %v857_v8  ;;  %v868_v63 = vsel %vm3797_vm5, %v2540_v53, %v867_v47  ;;  %v1482_v41 = vrot.slane %v3775_v38, 5  ;;  %v3441_v38 = vld [vmem:[%s4190_s1 + $0x1a8] sm:$0xff]   ;;  %v3444_v22 = vld [vmem:[%s4190_s1 + $0xb0] sm:$0xff]   ;;  %v3448_v47 = vld [vmem:[%s4190_s1 + $0xc0] sm:$0xff]  }
  0x48   : > { %3016 = vmatpush3.bf16.msra.mxu1 %v3426_v46  ;;  %3003 = vmatprep.mubr.bf16.mxu1 %v3852_v5  ;;  %v3438_v46 = vld [vmem:[%s4190_s1 + $0xa0] sm:$0xff]   ;;  %v3925_v1 = vcombine.low %v861_v23, %v864_v14  ;;  %v875_v26 = vsel %vm3797_vm5, %v2541_v13, %v874_v29  ;;  %v878_v15 = vsel %vm3797_vm5, %v876_v6, %v877_v9  ;;  %v2624_v20 = vrot.slane %v3763_v33, 9  ;;  %v3451_v8 = vld [vmem:[%s4190_s1 + $0x1c8] sm:$0xff]   ;;  %v3453_v23 = vld [vmem:[%s4190_s1 + $0x1d0] sm:$0xff]  }
  0x49   : > { %3017 = vmatprep.subr.bf16.mxu1 %v3428_v21  ;;  %v3966_v28 = vcombine.low %v875_v26, %v878_v15  ;;  %v1484_v34 = vrot.slane %v1482_v41, 4  ;;  %v3974_v42 = vcombine.low %v3738_v57, %v3742_v62  ;;  %v3445_v57 = vld [vmem:[%s4190_s1 + $0x1b0] sm:$0xff]   ;;  %v3449_v7 = vld [vmem:[%s4190_s1 + $0x1c0] sm:$0xff]   ;;  %v3455_v14 = vld [vmem:[%s4190_s1 + $0x1d8] sm:$0xff]  }
  0x4a   : > { %3128 = vmatmul.mubr.bf16.vlgmr.msra.gmra.mrb[0].mxu0 %v3869_v16  ;;  %v1483_v33 = vsel %vm3797_vm5, %v2624_v20, %v1482_v41  ;;  %v3456_v29 = vld [vmem:[%s4190_s1 + $0xe0] sm:$0xff]   ;;  %v3459_v54 = vld [vmem:[%s4190_s1 + $0x1e8] sm:$0xff]   ;;  %v3463_v13 = vld [vmem:[%s4190_s1 + $0x1f0] sm:$0xff]  }
  0x4b   : > { %3144 = vmatpush3.bf16.msra.mxu0 %v3427_v35  ;;  %3131 = vmatprep.mubr.bf16.mxu0 %v3876_v32  ;;  %v870_v35 = vrot.slane %v3713_v27, 5  ;;  %v829_v27 = vsel %vm3797_vm5, %v827_v55, %v828_v50  ;;  %v3450_v50 = vld [vmem:[%s4190_s1 + $0xc8] sm:$0xff]   ;;  %v3457_v53 = vld [vmem:[%s4190_s1 + $0x1e0] sm:$0xff]   ;;  %v3465_v55 = vld [vmem:[%s4190_s1 + $0x1f8] sm:$0xff]  }
  0x4c   : > { %3018 = vmatpush3.bf16.msra.mxu1 %v3428_v21  ;;  %3145 = vmatprep.subr.bf16.mxu0 %v3429_v19  ;;  %v3933_v21 = vcombine.low %v3681_v60, %v3684_v61  ;;  %v2558_v40 = vcombine.low %v826_v51, %v829_v27  ;;  %v3440_v61 = vld [vmem:[%s4190_s1 + $0xa8] sm:$0xff]   ;;  %v3466_v6 = vld [vmem:[%s4190_s1 + $0x200] sm:$0xff]   ;;  %v3468_v9 = vld [vmem:[%s4190_s1 + $0x210] sm:$0xff]  }
  0x4d   : > { %3019 = vmatprep.subr.bf16.mxu1 %v3432_v4  ;;  %v871_v60 = vsel %vm3797_vm5, %v869_v12, %v870_v35  ;;  %v4051_v12 = vld [vmem:[%s3550_s11 + $0x70] sm:$0xf]  ;;  %v3464_v35 = vld [vmem:[%s4190_s1 + $0xf8] sm:$0xff]   ;;  %v213_v41 = vld [vmem:[%s3550_s11 + $0x74] sm:$0x1] }
  0x4e   : > { %v1873_v26 = vshll.u32 %v213_v41, 16 }
  0x4f   : > { %3004 = vmatmul.mubr.bf16.gmra.mrb[4].mxu1 %v3886_v45  ;;  %3146 = vmatpush3.bf16.msra.mxu0 %v3429_v19  ;;  %v3959_v19 = vcombine.low %v868_v63, %v871_v60 }
  0x50   : > { %3020 = vmatpush3.bf16.msra.mxu1 %v3432_v4  ;;  %3007 = vmatprep.mubr.bf16.mxu1 %v3894_v49  ;;  %v1485_v4 = vrot.slane %v3778_v39, 5 }
  0x51   : > { %3021 = vmatprep.subr.bf16.mxu1 %v3434_v0  ;;  %3147 = vmatprep.subr.bf16.mxu0 %v3433_v30 }
  0x52   : > { %3132 = vmatmul.mubr.bf16.gmra.mrb[4].mxu0 %v3915_v58  ;;  %v1486_v39 = vsel %vm3797_vm5, %v1484_v34, %v1485_v4  ;;  %v3473_v34 = vld [vmem:[%s4190_s1 + $0x238] sm:$0xff]  }
  0x53   : > { %3148 = vmatpush3.bf16.msra.mxu0 %v3433_v30  ;;  %3135 = vmatprep.mubr.bf16.mxu0 %v3925_v1  ;;  %v3989_v62 = vcombine.low %v1483_v33, %v1486_v39  ;;  %v3447_v30 = vld [vmem:[%s4190_s1 + $0x1b8] sm:$0xff]  }
  0x54   : > { %3022 = vmatpush3.bf16.msra.mxu1 %v3434_v0  ;;  %3149 = vmatprep.subr.bf16.mxu0 %v3435_v37  ;;  %v3452_v0 = vld [vmem:[%s4190_s1 + $0xd0] sm:$0xff]  }
  0x55   : > { %3023 = vmatprep.subr.bf16.mxu1 %v3438_v46 }
  0x57   : > { %3008 = vmatmul.mubr.bf16.gmra.mrb[8].mxu1 %v3933_v21  ;;  %3150 = vmatpush3.bf16.msra.mxu0 %v3435_v37  ;;  %v3461_v37 = vld [vmem:[%s4190_s1 + $0xf0] sm:$0xff]  }
  0x58   : > { %3024 = vmatpush3.bf16.msra.mxu1 %v3438_v46  ;;  %3011 = vmatprep.mubr.bf16.mxu1 %v3940_v24  ;;  %v4048_v46 = vld [vmem:[%s3550_s11 + $0x6c] sm:$0xf] }
  0x59   : > { %3025 = vmatprep.subr.bf16.mxu1 %v3440_v61  ;;  %3151 = vmatprep.subr.bf16.mxu0 %v3439_v18  ;;  %v2666_v51 = vcombine.low %v4048_v46, %v4051_v12  ;;  %v1857_v27 = vshll.u32 %v4048_v46, 16  ;;  %v2700_v36 = vrot.slane %v4048_v46, 9 }
  0x5a   : > { %3136 = vmatmul.mubr.bf16.gmra.mrb[8].mxu0 %v3959_v19 }
  0x5b   : > { %3152 = vmatpush3.bf16.msra.mxu0 %v3439_v18  ;;  %3139 = vmatprep.mubr.bf16.mxu0 %v3966_v28  ;;  %v1859_v63 = vrot.slane %v1857_v27, 5 }
  0x5c   : > { %3026 = vmatpush3.bf16.msra.mxu1 %v3440_v61  ;;  %3153 = vmatprep.subr.bf16.mxu0 %v3441_v38  ;;  %v3470_v61 = vld [vmem:[%s4190_s1 + $0x220] sm:$0xff]  }
  0x5d   : > { %3027 = vmatprep.subr.bf16.mxu1 %v3444_v22 }
  0x5f   : > { %3012 = vmatmul.mubr.bf16.gmra.mrb[12].mxu1 %v3974_v42  ;;  %3154 = vmatpush3.bf16.msra.mxu0 %v3441_v38  ;;  %v1875_v38 = vrot.slane %v1873_v26, 5 }
  0x60   : > { %3028 = vmatpush3.bf16.msra.mxu1 %v3444_v22  ;;  %3031 = vmatprep.mubr.bf16.mxu1 %v2558_v40  ;;  %v1867_v40 = vshrl.u32 %v4051_v12, 16  ;;  %v2065_v22 = vrot.slane %v213_v41, 5 }
  0x61   : > { %3029 = vmatprep.subr.bf16.mxu1 %v3446_v17  ;;  %3155 = vmatprep.subr.bf16.mxu0 %v3445_v57 }
  0x62   : > { %3140 = vmatmul.mubr.bf16.gmra.mrb[12].mxu0 %v3989_v62 }
  0x63   : > { %3156 = vmatpush3.bf16.msra.mxu0 %v3445_v57  ;;  %3159 = vmatprep.mubr.bf16.mxu0 %v3852_v5 }
  0x64   : > { %3030 = vmatpush3.bf16.msra.mxu1 %v3446_v17  ;;  %3157 = vmatprep.subr.bf16.mxu0 %v3447_v30 }
  0x65   : > { %3047 = vmatprep.subr.bf16.mxu1 %v3448_v47 }
  0x67   : > { %3032 = vmatmul.mubr.bf16.vlgmr.msra.gmra.mrb[0].mxu1 %v3832_v56  ;;  %3158 = vmatpush3.bf16.msra.mxu0 %v3447_v30  ;;  %v3454_v56 = vld [vmem:[%s4190_s1 + $0xd8] sm:$0xff]  }
  0x68   : > { %3048 = vmatpush3.bf16.msra.mxu1 %v3448_v47  ;;  %3035 = vmatprep.mubr.bf16.mxu1 %v3869_v16 }
  0x69   : > { %3049 = vmatprep.subr.bf16.mxu1 %v3450_v50  ;;  %3175 = vmatprep.subr.bf16.mxu0 %v3449_v7 }
  0x6a   : > { %3160 = vmatmul.mubr.bf16.vlgmr.msra.gmra.mrb[0].mxu0 %v3886_v45 }
  0x6b   : > { %3176 = vmatpush3.bf16.msra.mxu0 %v3449_v7  ;;  %3163 = vmatprep.mubr.bf16.mxu0 %v3894_v49 }
  0x6c   : > { %3050 = vmatpush3.bf16.msra.mxu1 %v3450_v50  ;;  %3177 = vmatprep.subr.bf16.mxu0 %v3451_v8 }
  0x6d   : > { %3051 = vmatprep.subr.bf16.mxu1 %v3452_v0 }
  0x6f   : > { %3036 = vmatmul.mubr.bf16.gmra.mrb[4].mxu1 %v3876_v32  ;;  %3178 = vmatpush3.bf16.msra.mxu0 %v3451_v8 }
  0x70   : > { %3052 = vmatpush3.bf16.msra.mxu1 %v3452_v0  ;;  %3039 = vmatprep.mubr.bf16.mxu1 %v3915_v58 }
  0x71   : > { %3053 = vmatprep.subr.bf16.mxu1 %v3454_v56  ;;  %3179 = vmatprep.subr.bf16.mxu0 %v3453_v23 }
  0x72   : > { %3164 = vmatmul.mubr.bf16.gmra.mrb[4].mxu0 %v3933_v21 }
  0x73   : > { %3180 = vmatpush3.bf16.msra.mxu0 %v3453_v23  ;;  %3167 = vmatprep.mubr.bf16.mxu0 %v3940_v24 }
  0x74   : > { %3054 = vmatpush3.bf16.msra.mxu1 %v3454_v56  ;;  %3181 = vmatprep.subr.bf16.mxu0 %v3455_v14 }
  0x75   : > { %3055 = vmatprep.subr.bf16.mxu1 %v3456_v29 }
  0x77   : > { %3040 = vmatmul.mubr.bf16.gmra.mrb[8].mxu1 %v3925_v1  ;;  %3182 = vmatpush3.bf16.msra.mxu0 %v3455_v14 }
  0x78   : > { %3056 = vmatpush3.bf16.msra.mxu1 %v3456_v29  ;;  %3043 = vmatprep.mubr.bf16.mxu1 %v3959_v19 }
  0x79   : > { %3057 = vmatprep.subr.bf16.mxu1 %v3458_v52  ;;  %3183 = vmatprep.subr.bf16.mxu0 %v3457_v53 }
  0x7a   : > { %3168 = vmatmul.mubr.bf16.gmra.mrb[8].mxu0 %v3974_v42 }
  0x7b   : > { %3184 = vmatpush3.bf16.msra.mxu0 %v3457_v53  ;;  %3171 = vmatprep.mubr.bf16.mxu0 %v3824_v25 }
  0x7c   : > { %3058 = vmatpush3.bf16.msra.mxu1 %v3458_v52  ;;  %3185 = vmatprep.subr.bf16.mxu0 %v3459_v54 }
  0x7d   : > { %3059 = vmatprep.subr.bf16.mxu1 %v3461_v37 }
  0x7f   : > { %3044 = vmatmul.mubr.bf16.gmra.mrb[12].mxu1 %v3966_v28  ;;  %3186 = vmatpush3.bf16.msra.mxu0 %v3459_v54 }
  0x80   : > { %3060 = vmatpush3.bf16.msra.mxu1 %v3461_v37  ;;  %3063 = vmatprep.mubr.bf16.mxu1 %v3847_v2  ;;  %v3467_v2 = vld [vmem:[%s4190_s1 + $0x208] sm:$0xff]  }
  0x81   : > { %3061 = vmatprep.subr.bf16.mxu1 %v3464_v35  ;;  %3187 = vmatprep.subr.bf16.mxu0 %v3463_v13 }
  0x82   : > { %3172 = vmatmul.mubr.bf16.gmra.mrb[12].mxu0 %v2666_v51 }
  0x83   : > { %3188 = vmatpush3.bf16.msra.mxu0 %v3463_v13  ;;  %3191 = vmatprep.mubr.bf16.mxu0 %v3667_v43  ;;  %v1854_v43 = vshrl.u32 %v4048_v46, 16 }
  0x84   : > { %3062 = vmatpush3.bf16.msra.mxu1 %v3464_v35  ;;  %3189 = vmatprep.subr.bf16.mxu0 %v3465_v55 }
  0x85   : > { %3239 = vmatprep.subr.bf16.mxu1 %v3466_v6 }
  0x87   : > { %3064 = vmatmul.mubr.bf16.vlgmr.msra.gmra.mrb[0].mxu1 %v3852_v5  ;;  %3190 = vmatpush3.bf16.msra.mxu0 %v3465_v55  ;;  %v3469_v5 = vld [vmem:[%s4190_s1 + $0x218] sm:$0xff]  }
  0x88   : > { %3247 = vmatpush3.bf16.msra.mxu1 %v3466_v6  ;;  %3067 = vmatprep.mubr.bf16.mxu1 %v3886_v45  ;;  %v1863_v45 = vshll.u32 %v4051_v12, 16 }
  0x89   : > { %3240 = vmatprep.subr.bf16.mxu1 %v3467_v2  ;;  %3207 = vmatprep.subr.bf16.mxu0 %v3466_v6 }
  0x8a   : > { %3192 = vmatmul.mubr.bf16.vlgmr.msra.gmra.mrb[0].mxu0 %v3695_v3  ;;  %v1856_v3 = vrot.slane %v1854_v43, 4  ;;  %v1865_v60 = vrot.slane %v1863_v45, 5 }
  0x8b   : > { %3208 = vmatpush3.bf16.msra.mxu0 %v3466_v6  ;;  %3195 = vmatprep.mubr.bf16.mxu0 %v3728_v44  ;;  %v1869_v44 = vrot.slane %v1867_v40, 4 }
  0x8c   : > { %3248 = vmatpush3.bf16.msra.mxu1 %v3467_v2  ;;  %3209 = vmatprep.subr.bf16.mxu0 %v3467_v2 }
  0x8d   : > { %3241 = vmatprep.subr.bf16.mxu1 %v3468_v9  ;;  %v1870_v18 = vor.u32 %v1869_v44, %v1865_v60 }
  0x8f   : > { %3068 = vmatmul.mubr.bf16.gmra.mrb[4].mxu1 %v3894_v49  ;;  %3210 = vmatpush3.bf16.msra.mxu0 %v3467_v2  ;;  %v3471_v49 = vld [vmem:[%s4190_s1 + $0x228] sm:$0xff]   ;;  %v1871_v15 = vrot.slane %v1870_v18, 4 }
  0x90   : > { %3249 = vmatpush3.bf16.msra.mxu1 %v3468_v9  ;;  %3071 = vmatprep.mubr.bf16.mxu1 %v3933_v21  ;;  %v1860_v21 = vor.u32 %v1859_v63, %v1856_v3 }
  0x91   : > { %3242 = vmatprep.subr.bf16.mxu1 %v3469_v5  ;;  %3211 = vmatprep.subr.bf16.mxu0 %v3468_v9  ;;  %v1876_v20 = vsel %vm3596_vm2, %v1871_v15, %v1875_v38 }
  0x92   : > { %3196 = vmatmul.mubr.bf16.gmra.mrb[4].mxu0 %v3756_v11  ;;  %v1861_v11 = vrot.slane %v1860_v21, 4 }
  0x93   : > { %3212 = vmatpush3.bf16.msra.mxu0 %v3468_v9  ;;  %3199 = vmatprep.mubr.bf16.mxu0 %v3782_v48  ;;  %v3472_v48 = vld [vmem:[%s4190_s1 + $0x230] sm:$0xff]  }
  0x94   : > { %3250 = vmatpush3.bf16.msra.mxu1 %v3469_v5  ;;  %3213 = vmatprep.subr.bf16.mxu0 %v3469_v5 }
  0x95   : > { %3243 = vmatprep.subr.bf16.mxu1 %v3470_v61 }
  0x97   : > { %3072 = vmatmul.mubr.bf16.gmra.mrb[8].mxu1 %v3940_v24  ;;  %3214 = vmatpush3.bf16.msra.mxu0 %v3469_v5  ;;  %v1866_v24 = vsel %vm3596_vm2, %v1861_v11, %v1865_v60 }
  0x98   : > { %3251 = vmatpush3.bf16.msra.mxu1 %v3470_v61  ;;  %3075 = vmatprep.mubr.bf16.mxu1 %v3974_v42  ;;  %v2691_v4 = vcombine.low %v1866_v24, %v1876_v20 }
  0x99   : > { %3244 = vmatprep.subr.bf16.mxu1 %v3471_v49  ;;  %3215 = vmatprep.subr.bf16.mxu0 %v3470_v61 }
  0x9a   : > { %3200 = vmatmul.mubr.bf16.gmra.mrb[8].mxu0 %v3806_v31  ;;  %v2062_v31 = vrot.slane %v4051_v12, 5 }
  0x9b   : > { %3216 = vmatpush3.bf16.msra.mxu0 %v3470_v61  ;;  %3203 = vmatprep.mubr.bf16.mxu0 %v3835_v59 }
  0x9c   : > { %3252 = vmatpush3.bf16.msra.mxu1 %v3471_v49  ;;  %3217 = vmatprep.subr.bf16.mxu0 %v3471_v49  ;;  %v2064_v59 = vrot.slane %v2062_v31, 4 }
  0x9d   : > { %3245 = vmatprep.subr.bf16.mxu1 %v3472_v48 }
  0x9f   : > { %3076 = vmatmul.mubr.bf16.gmra.mrb[12].mxu1 %v3824_v25  ;;  %3218 = vmatpush3.bf16.msra.mxu0 %v3471_v49  ;;  %v2063_v25 = vsel %vm3797_vm5, %v2700_v36, %v2062_v31 }
  0xa0   : > { %3253 = vmatpush3.bf16.msra.mxu1 %v3472_v48  ;;  %3231 = vmatprep.mubr.bf16.mxu1 %v3959_v19  ;;  %v2066_v19 = vsel %vm3797_vm5, %v2064_v59, %v2065_v22 }
  0xa1   : > { %3246 = vmatprep.subr.bf16.mxu1 %v3473_v34  ;;  %3219 = vmatprep.subr.bf16.mxu0 %v3472_v48  ;;  %v2717_v42 = vcombine.low %v2063_v25, %v2066_v19 }
  0xa2   : > { %3204 = vmatmul.mubr.bf16.gmra.mrb[12].mxu0 %v2691_v4 }
  0xa3   : > { %3220 = vmatpush3.bf16.msra.mxu0 %v3472_v48  ;;  %3223 = vmatprep.mubr.bf16.mxu0 %v3869_v16 }
  0xa4   : > { %3254 = vmatpush3.bf16.msra.mxu1 %v3473_v34  ;;  %3221 = vmatprep.subr.bf16.mxu0 %v3473_v34 }
  0xa7   : > { %3232 = vmatmul.mubr.bf16.vlgmr.msra.gmra.mrb[16].mxu1 %v3966_v28  ;;  %3222 = vmatpush3.bf16.msra.mxu0 %v3473_v34 }
  0xa8   : > { %3235 = vmatprep.mubr.bf16.mxu1 %v3989_v62 }
  0xaa   : > { %3224 = vmatmul.mubr.bf16.vlgmr.msra.gmra.mrb[0].mxu0 %v3876_v32 }
  0xab   : > { %3227 = vmatprep.mubr.bf16.mxu0 %v3915_v58 }
  0xaf   : > { %3236 = vmatmul.mubr.bf16.gmra.mrb[20].mxu1 %v2717_v42 }
  0xb2   : > { %3228 = vmatmul.mubr.bf16.gmra.mrb[4].mxu0 %v3925_v1 }
 0x15a   : > { %v3065_v16 = vpop.f32.mrb[0].mxu1 }
 0x15b   : > { %v1194_v28 = vpop.f32.mrb[1].mxu1 }
 0x15c   : > { %v3066_v33 = vpop.f32.mrb[2].mxu1 }
 0x15d   : > { %v1197_v39 = vpop.f32.mrb[3].mxu1 }
 0x162   : > { %v4126_v17 = vpop.f32.mrb[4].mxu1 }
 0x163   : > { %v4128_v57 = vpop.f32.mrb[5].mxu1 }
 0x164   : > { %v4130_v10 = vpop.f32.mrb[6].mxu1 }
 0x165   : > { %v4132_v62 = vpop.f32.mrb[7].mxu1 }
 0x16a   : > { %v3073_v30 = vpop.f32.mrb[8].mxu1 }
 0x16b   : > { %v1226_v32 = vpop.f32.mrb[9].mxu1 }
 0x16c   : > { %v3074_v47 = vpop.f32.mrb[10].mxu1 }
 0x16d   : > { %v1229_v58 = vpop.f32.mrb[11].mxu1  ;;  %v3201_v50 = vpop.f32.mrb[8].mxu0 }
 0x16e   : > { %v3263_v7 = vadd.f32 %v3201_v50, %v3073_v30  ;;  %v2012_v1 = vpop.f32.mrb[9].mxu0 }
 0x16f   : > { %v3265_v8 = vadd.f32 %v2012_v1, %v1226_v32  ;;  %v3202_v0 = vpop.f32.mrb[10].mxu0 }
 0x170   : > { %v3267_v56 = vadd.f32 %v3202_v0, %v3074_v47  ;;  %v2015_v23 = vpop.f32.mrb[11].mxu0 }
 0x171   : > { %v3269_v29 = vadd.f32 %v2015_v23, %v1229_v58 }
 0x172   : > { %v3077_v14 = vpop.f32.mrb[12].mxu1 }
 0x173   : > { %v1242_v52 = vpop.f32.mrb[13].mxu1 }
 0x174   : > { %v3078_v53 = vpop.f32.mrb[14].mxu1 }
 0x175   : > { %v1245_v54 = vpop.f32.mrb[15].mxu1  ;;  %v3205_v37 = vpop.f32.mrb[12].mxu0 }
 0x176   : > { %v3271_v46 = vadd.f32 %v3205_v37, %v3077_v14  ;;  %v2028_v12 = vpop.f32.mrb[13].mxu0 }
 0x177   : > { %v3273_v35 = vadd.f32 %v2028_v12, %v1242_v52  ;;  %v3206_v13 = vpop.f32.mrb[14].mxu0 }
 0x178   : > { %v3275_v51 = vadd.f32 %v3206_v13, %v3078_v53  ;;  %v2031_v55 = vpop.f32.mrb[15].mxu0 }
 0x179   : > { %v3277_v2 = vadd.f32 %v2031_v55, %v1245_v54 }
 0x17a   : > { %v3233_v6 = vpop.f32.mrb[16].mxu1 }
 0x17b   : > { %v4135_v9 = vadd.f32 %v3263_v7, %v3233_v6  ;;  %v2202_v43 = vpop.f32.mrb[17].mxu1 }
 0x17c   : > { %v4137_v27 = vadd.f32 %v3265_v8, %v2202_v43  ;;  %v3234_v40 = vpop.f32.mrb[18].mxu1 }
 0x17d   : > { %v4139_v5 = vadd.f32 %v3267_v56, %v3234_v40  ;;  %v2205_v45 = vpop.f32.mrb[19].mxu1  ;;  %v3225_v63 = vpop.f32.mrb[0].mxu0 }
 0x17e   : > { %v4146_v3 = vadd.f32 %v3269_v29, %v2205_v45  ;;  %v3255_v44 = vadd.f32 %v3225_v63, %v3065_v16  ;;  %v2170_v61 = vpop.f32.mrb[1].mxu0  ;;  %v2358_v55 = vmul.f32 %v4137_v27, %v4137_v27  ;;  %v2360_v45 = vmul.f32 %v4135_v9, %v4135_v9 }
 0x17f   : > { %v2788_v60 = vpack.c.bf16 %v4139_v5, %v4135_v9  ;;  %v3256_v49 = vadd.f32 %v2170_v61, %v1194_v28  ;;  %v3226_v21 = vpop.f32.mrb[2].mxu0 }
 0x180   : > { %v2783_v41 = vpack.c.bf16 %v4146_v3, %v4137_v27  ;;  %v3257_v18 = vadd.f32 %v3226_v21, %v3066_v33  ;;  %v2173_v26 = vpop.f32.mrb[3].mxu0  ;;  %v2352_v42 = vmul.f32 %v3255_v44, %v3255_v44 }
 0x181   : > { %2804 = vst [vmem:[%s4144_s25 + $0x28] sm:$0xff] %v2788_v60   ;;  %v3258_v15 = vadd.f32 %v2173_v26, %v1197_v39  ;;  %v2350_v4 = vmul.f32 %v3256_v49, %v3256_v49 }
 0x182   : > { %2803 = vst [vmem:[%s4144_s25 + $0x20] sm:$0xff] %v2783_v41   ;;  %v3237_v11 = vpop.f32.mrb[20].mxu1  ;;  %v2768_v24 = vpack.c.bf16 %v3257_v18, %v3255_v44  ;;  %v2353_v58 = vmul.f32 %v3257_v18, %v3257_v18 }
 0x183   : > { %v4154_v38 = vadd.f32 %v3271_v46, %v3237_v11  ;;  %v2218_v48 = vpop.f32.mrb[21].mxu1  ;;  %v2763_v31 = vpack.c.bf16 %v3258_v15, %v3256_v49  ;;  %v2329_v36 = vadd.f32 %v3258_v15, %v3256_v49  ;;  %v2351_v59 = vmul.f32 %v3258_v15, %v3258_v15 }
 0x184   : > { %v3274_v20 = vadd.f32 %v3273_v35, %v2218_v48  ;;  %v3238_v34 = vpop.f32.mrb[22].mxu1  ;;  %2800 = vst [vmem:[%s4144_s25 + $0x8] sm:$0xff] %v2768_v24  }
 0x185   : > { %v2221_v22 = vpop.f32.mrb[23].mxu1  ;;  %v3276_v25 = vadd.f32 %v3275_v51, %v3238_v34  ;;  %2764 = vst [vmem:[%s4144_s25] sm:$0xff] %v2763_v31   ;;  %v2330_v16 = vadd.f32 %v3255_v44, %v2329_v36  ;;  %v2366_v28 = vadd.f32 %v2351_v59, %v2350_v4  ;;  %v3229_v33 = vpop.f32.mrb[4].mxu0  ;;  %v2361_v44 = vmul.f32 %v4139_v5, %v4139_v5 }
 0x186   : > { %v3278_v19 = vadd.f32 %v3277_v2, %v2221_v22  ;;  %v3259_v39 = vadd.f32 %v3229_v33, %v4126_v17  ;;  %v2186_v30 = vpop.f32.mrb[5].mxu0 }
 0x187   : > { %v2798_v32 = vpack.c.bf16 %v3276_v25, %v4154_v38  ;;  %v2367_v50 = vadd.f32 %v2366_v28, %v2352_v42  ;;  %v3260_v7 = vadd.f32 %v2186_v30, %v4128_v57  ;;  %v2331_v1 = vadd.f32 %v3257_v18, %v2330_v16  ;;  %v3230_v8 = vpop.f32.mrb[6].mxu0 }
 0x188   : > { %v2793_v47 = vpack.c.bf16 %v3278_v19, %v3274_v20  ;;  %v3261_v0 = vadd.f32 %v3230_v8, %v4130_v10  ;;  %v2189_v56 = vpop.f32.mrb[7].mxu0  ;;  %v2356_v57 = vmul.f32 %v3259_v39, %v3259_v39  ;;  %v2363_v26 = vmul.f32 %v3278_v19, %v3278_v19 }
 0x189   : > { %2806 = vst [vmem:[%s4144_s25 + $0x38] sm:$0xff] %v2798_v32   ;;  %v2332_v23 = vadd.f32 %v3260_v7, %v2331_v1  ;;  %v2354_v14 = vmul.f32 %v3260_v7, %v3260_v7  ;;  %v2368_v17 = vadd.f32 %v2367_v50, %v2353_v58  ;;  %v3262_v29 = vadd.f32 %v2189_v56, %v4132_v62 }
 0x18a   : > { %2805 = vst [vmem:[%s4144_s25 + $0x30] sm:$0xff] %v2793_v47   ;;  %v2778_v52 = vpack.c.bf16 %v3261_v0, %v3259_v39  ;;  %v2357_v13 = vmul.f32 %v3261_v0, %v3261_v0  ;;  %v2359_v62 = vmul.f32 %v4146_v3, %v4146_v3  ;;  %v2365_v48 = vmul.f32 %v3276_v25, %v3276_v25 }
 0x18b   : > { %v2369_v53 = vadd.f32 %v2368_v17, %v2354_v14  ;;  %v2773_v54 = vpack.c.bf16 %v3262_v29, %v3260_v7  ;;  %v2333_v37 = vadd.f32 %v3262_v29, %v2332_v23  ;;  %v2355_v46 = vmul.f32 %v3262_v29, %v3262_v29 }
 0x18c   : > { %2802 = vst [vmem:[%s4144_s25 + $0x18] sm:$0xff] %v2778_v52  }
 0x18d   : > { %2801 = vst [vmem:[%s4144_s25 + $0x10] sm:$0xff] %v2773_v54   ;;  %v2334_v12 = vadd.f32 %v3259_v39, %v2333_v37  ;;  %v2370_v35 = vadd.f32 %v2369_v53, %v2355_v46 }
 0x18f   : > { %v2335_v10 = vadd.f32 %v3261_v0, %v2334_v12  ;;  %v2371_v51 = vadd.f32 %v2370_v35, %v2356_v57 }
 0x191   : > { %v2336_v6 = vadd.f32 %v4137_v27, %v2335_v10  ;;  %v2372_v2 = vadd.f32 %v2371_v51, %v2357_v13  ;;  %v2362_v27 = vmul.f32 %v3274_v20, %v3274_v20 }
 0x193   : > { %v2373_v43 = vadd.f32 %v2372_v2, %v2358_v55  ;;  %v2337_v40 = vadd.f32 %v4146_v3, %v2336_v6  ;;  %v2364_v3 = vmul.f32 %v4154_v38, %v4154_v38 }
 0x195   : > { %v2338_v63 = vadd.f32 %v4135_v9, %v2337_v40  ;;  %v2374_v60 = vadd.f32 %v2373_v43, %v2359_v62 }
 0x197   : > { %v2339_v61 = vadd.f32 %v4139_v5, %v2338_v63  ;;  %v2375_v41 = vadd.f32 %v2374_v60, %v2360_v45 }
 0x199   : > { %v2340_v49 = vadd.f32 %v3274_v20, %v2339_v61  ;;  %v2376_v21 = vadd.f32 %v2375_v41, %v2361_v44 }
 0x19b   : > { %v2341_v18 = vadd.f32 %v3278_v19, %v2340_v49  ;;  %v2377_v11 = vadd.f32 %v2376_v21, %v2362_v27 }
 0x19d   : > { %v2342_v15 = vadd.f32 %v4154_v38, %v2341_v18  ;;  %v2378_v9 = vadd.f32 %v2377_v11, %v2363_v26 }
 0x19f   : > { %v2343_v24 = vadd.f32 %v3276_v25, %v2342_v15  ;;  %v2379_v34 = vadd.f32 %v2378_v9, %v2364_v3 }
 0x1a1   : > { %v2344_v4 = vrot.slane %v2343_v24, 4  ;;  %v2380_v31 = vadd.f32 %v2379_v34, %v2365_v48 }
 0x1a3   : > { %v2345_v5 = vadd.f32 %v2344_v4, %v2343_v24  ;;  %v2381_v36 = vrot.slane %v2380_v31, 4 }
 0x1a5   : > { %v2346_v59 = vrot.slane %v2345_v5, 2  ;;  %v2382_v20 = vadd.f32 %v2381_v36, %v2380_v31 }
 0x1a7   : > { %v2347_v22 = vadd.f32 %v2346_v59, %v2345_v5  ;;  %v2383_v42 = vrot.slane %v2382_v20, 2 }
 0x1a9   : > { %v2348_v19 = vrot.slane %v2347_v22, 1  ;;  %v2384_v16 = vadd.f32 %v2383_v42, %v2382_v20 }
 0x1ab   : > { %v2385_v28 = vrot.slane %v2384_v16, 1  ;;  %v2349_v38 = vadd.f32 %v2348_v19, %v2347_v22 }
 0x1ad   : > { %v2386_v25 = vadd.f32 %v2385_v28, %v2384_v16 }
 0x1af   : > { %v2388_v33 = vsel %vm2387_vm6, %v2349_v38, %v2386_v25 }
 0x1b0   : > { %2389 = vst [vmem:[%s182_s30] sm:$0x3] %v2388_v33 }
 0x1b1 PF: > { %s14_s12 = sadd.s32 1, %s3480_s12  }
 0x1b2   : > { %p11_p5 = scmp.ge.s32.totalorder %s14_s12, 6  }
 0x1b4   :  { %13 = sbr.rel (!%p11_p5) target bundleno = 1 (0x1), region = 78 }

// kernel: res_block_forward.9
= control target key start
LH: loop header
LB: loop body
LE: loop exit
PB: predicated region body
PF: predicated region fallthrough
CT: control target
= control target key end

     0   :  { %s564_s12 = smov 0   ;;  %s711_s0 = inlined_call_operand.vmem [shape: bf16[512,128], index: 0, kind: input, shape index: {}]   ;;  %s712_s1 = inlined_call_operand.vmem [shape: f32[1,128], index: 1, kind: input, shape index: {}]   ;;  %s713_s2 = inlined_call_operand.vmem [shape: f32[1,128], index: 2, kind: input, shape index: {}]   ;;  %s714_s3 = inlined_call_operand.vmem [shape: f32[512,128], index: 3, kind: output, shape index: {}]  }
   0x1 LB: > { %s436_s13 = sadd.s32 4294967295, %s542_s12   ;;  %p440_p0 = scmp.ge.s32.totalorder %s542_s12, 1  ;;  %s542_s12 = sphi %s564_s12, %s13_s12  }
   0x2   : > { %p138_p1 = scmp.lt.s32.totalorder %s542_s12, 3 }
   0x4   : > { %p139_p2 = pnand %p440_p0, %p138_p1 }
   0x5   : > { %s441_s14 = sshll.u32 (!%p139_p2), %s436_s13, 5  ;;  %v583_v0 = vld [vmem:[%s712_s1] ss:$0 sm:$0xff] (!%p139_p2) }
   0x6   : > { %142 = sbr.rel (%p139_p2) target bundleno = 53 (0x35), region = 32  ;;  %p163_p3 = scmp.lt.s32.totalorder (!%p139_p2), %s441_s14, 63  ;;  %v592_v9 = vld [vmem:[%s713_s2] ss:$0 sm:$0xff] (!%p139_p2) }
   0xd   : > { %s716_s14 = smov (!%p163_p3, %s441_s14), 63 }
   0xe   : > { %s442_s15 = sshll.u32 %s716_s14, 2  ;;  %s444_s23 = sshll.u32 %s716_s14, 3 }
   0xf   : > { %s578_s18 = scalar_lea.vmem %s711_s0, %s442_s15  ;;  %s610_s26 = scalar_lea.vmem %s714_s3, %s444_s23 }
  0x10   : > { %v450_v1 = vld [vmem:[%s578_s18] sm:$0xff]   ;;  %v513_v2 = vld [vmem:[%s578_s18 + $0x8] sm:$0xff]   ;;  %v514_v3 = vld [vmem:[%s578_s18 + $0x10] sm:$0xff]  }
  0x11   : > { %v451_v4 = vunpack.c.l.bf16 %v450_v1  ;;  %v452_v5 = vunpack.c.h.bf16 %v450_v1  ;;  %v455_v6 = vunpack.c.l.bf16 %v513_v2  ;;  %v456_v7 = vunpack.c.h.bf16 %v513_v2  ;;  %v515_v8 = vld [vmem:[%s578_s18 + $0x18] sm:$0xff]   ;;  %v516_v30 = vld [vmem:[%s578_s18 + $0x20] sm:$0xff]   ;;  %v517_v31 = vld [vmem:[%s578_s18 + $0x28] sm:$0xff]  }
  0x12   : > { %v459_v10 = vunpack.c.l.bf16 %v514_v3  ;;  %v460_v11 = vunpack.c.h.bf16 %v514_v3  ;;  %v463_v12 = vunpack.c.l.bf16 %v515_v8  ;;  %v464_v13 = vunpack.c.h.bf16 %v515_v8  ;;  %v518_v36 = vld [vmem:[%s578_s18 + $0x30] sm:$0xff]   ;;  %v519_v37 = vld [vmem:[%s578_s18 + $0x38] sm:$0xff]   ;;  %v520_v3 = vld [vmem:[%s578_s18 + $0x40] sm:$0xff]  }
  0x13   : > { %v245_v14 = vmul.f32 %v451_v4, %v583_v0  ;;  %v246_v15 = vmul.f32 %v452_v5, %v583_v0  ;;  %v247_v16 = vmul.f32 %v455_v6, %v583_v0  ;;  %v248_v17 = vmul.f32 %v456_v7, %v583_v0  ;;  %v521_v4 = vld [vmem:[%s578_s18 + $0x48] sm:$0xff]  }
  0x14   : > { %v249_v18 = vmul.f32 %v459_v10, %v583_v0  ;;  %v250_v19 = vmul.f32 %v460_v11, %v583_v0  ;;  %v251_v20 = vmul.f32 %v463_v12, %v583_v0  ;;  %v252_v21 = vmul.f32 %v464_v13, %v583_v0  ;;  %v522_v10 = vld [vmem:[%s578_s18 + $0x50] sm:$0xff]   ;;  %v523_v11 = vld [vmem:[%s578_s18 + $0x58] sm:$0xff]  }
  0x15   : > { %v284_v22 = vadd.f32 %v592_v9, %v245_v14  ;;  %v285_v23 = vadd.f32 %v592_v9, %v246_v15  ;;  %v286_v24 = vadd.f32 %v592_v9, %v247_v16  ;;  %v287_v25 = vadd.f32 %v592_v9, %v248_v17 }
  0x16   : > { %v288_v26 = vadd.f32 %v592_v9, %v249_v18  ;;  %v289_v27 = vadd.f32 %v592_v9, %v250_v19  ;;  %v290_v28 = vadd.f32 %v592_v9, %v251_v20  ;;  %v291_v29 = vadd.f32 %v592_v9, %v252_v21 }
  0x17   : > { %v316_v32 = vmax.f32 %v284_v22, 0.0  ;;  %v317_v33 = vmax.f32 %v285_v23, 0.0  ;;  %v318_v34 = vmax.f32 %v286_v24, 0.0  ;;  %v319_v35 = vmax.f32 %v287_v25, 0.0 }
  0x18   : > { %v320_v38 = vmax.f32 %v288_v26, 0.0  ;;  %v321_v39 = vmax.f32 %v289_v27, 0.0  ;;  %v322_v40 = vmax.f32 %v290_v28, 0.0  ;;  %v323_v41 = vmax.f32 %v291_v29, 0.0 }
  0x19   : > { %348 = vst [vmem:[%s610_s26] sm:$0xff] %v316_v32  ;;  %349 = vst [vmem:[%s610_s26 + $0x8] sm:$0xff] %v317_v33  ;;  %v467_v42 = vunpack.c.l.bf16 %v516_v30  ;;  %v468_v43 = vunpack.c.h.bf16 %v516_v30  ;;  %v471_v44 = vunpack.c.l.bf16 %v517_v31  ;;  %v472_v45 = vunpack.c.h.bf16 %v517_v31 }
  0x1a   : > { %350 = vst [vmem:[%s610_s26 + $0x10] sm:$0xff] %v318_v34  ;;  %351 = vst [vmem:[%s610_s26 + $0x18] sm:$0xff] %v319_v35  ;;  %v475_v46 = vunpack.c.l.bf16 %v518_v36  ;;  %v476_v47 = vunpack.c.h.bf16 %v518_v36  ;;  %v479_v48 = vunpack.c.l.bf16 %v519_v37  ;;  %v480_v49 = vunpack.c.h.bf16 %v519_v37 }
  0x1b   : > { %352 = vst [vmem:[%s610_s26 + $0x20] sm:$0xff] %v320_v38  ;;  %353 = vst [vmem:[%s610_s26 + $0x28] sm:$0xff] %v321_v39  ;;  %v253_v50 = vmul.f32 %v467_v42, %v583_v0  ;;  %v254_v51 = vmul.f32 %v468_v43, %v583_v0  ;;  %v255_v52 = vmul.f32 %v471_v44, %v583_v0  ;;  %v483_v16 = vunpack.c.l.bf16 %v520_v3 }
  0x1c   : > { %354 = vst [vmem:[%s610_s26 + $0x30] sm:$0xff] %v322_v40  ;;  %355 = vst [vmem:[%s610_s26 + $0x38] sm:$0xff] %v323_v41  ;;  %v256_v53 = vmul.f32 %v472_v45, %v583_v0  ;;  %v257_v54 = vmul.f32 %v475_v46, %v583_v0  ;;  %v258_v55 = vmul.f32 %v476_v47, %v583_v0  ;;  %v484_v17 = vunpack.c.h.bf16 %v520_v3  ;;  %v524_v40 = vld [vmem:[%s578_s18 + $0x60] sm:$0xff]   ;;  %v525_v41 = vld [vmem:[%s578_s18 + $0x68] sm:$0xff]  }
  0x1d   : > { %v259_v56 = vmul.f32 %v479_v48, %v583_v0  ;;  %v260_v57 = vmul.f32 %v480_v49, %v583_v0  ;;  %v292_v58 = vadd.f32 %v592_v9, %v253_v50  ;;  %v293_v59 = vadd.f32 %v592_v9, %v254_v51  ;;  %v526_v46 = vld [vmem:[%s578_s18 + $0x70] sm:$0xff]   ;;  %v527_v47 = vld [vmem:[%s578_s18 + $0x78] sm:$0xff]  }
  0x1e   : > { %v294_v60 = vadd.f32 %v592_v9, %v255_v52  ;;  %v295_v61 = vadd.f32 %v592_v9, %v256_v53  ;;  %v296_v62 = vadd.f32 %v592_v9, %v257_v54  ;;  %v297_v63 = vadd.f32 %v592_v9, %v258_v55 }
  0x1f   : > { %v298_v1 = vadd.f32 %v592_v9, %v259_v56  ;;  %v299_v2 = vadd.f32 %v592_v9, %v260_v57  ;;  %v324_v5 = vmax.f32 %v292_v58, 0.0  ;;  %v325_v6 = vmax.f32 %v293_v59, 0.0 }
  0x20   : > { %v326_v7 = vmax.f32 %v294_v60, 0.0  ;;  %v327_v8 = vmax.f32 %v295_v61, 0.0  ;;  %v328_v12 = vmax.f32 %v296_v62, 0.0  ;;  %v329_v13 = vmax.f32 %v297_v63, 0.0 }
  0x21   : > { %v330_v14 = vmax.f32 %v298_v1, 0.0  ;;  %v331_v15 = vmax.f32 %v299_v2, 0.0  ;;  %356 = vst [vmem:[%s610_s26 + $0x40] sm:$0xff] %v324_v5  ;;  %357 = vst [vmem:[%s610_s26 + $0x48] sm:$0xff] %v325_v6  ;;  %v487_v18 = vunpack.c.l.bf16 %v521_v4  ;;  %v488_v19 = vunpack.c.h.bf16 %v521_v4 }
  0x22   : > { %358 = vst [vmem:[%s610_s26 + $0x50] sm:$0xff] %v326_v7  ;;  %359 = vst [vmem:[%s610_s26 + $0x58] sm:$0xff] %v327_v8  ;;  %v491_v20 = vunpack.c.l.bf16 %v522_v10  ;;  %v492_v21 = vunpack.c.h.bf16 %v522_v10  ;;  %v495_v22 = vunpack.c.l.bf16 %v523_v11  ;;  %v496_v23 = vunpack.c.h.bf16 %v523_v11 }
  0x23   : > { %360 = vst [vmem:[%s610_s26 + $0x60] sm:$0xff] %v328_v12  ;;  %361 = vst [vmem:[%s610_s26 + $0x68] sm:$0xff] %v329_v13  ;;  %v261_v24 = vmul.f32 %v483_v16, %v583_v0  ;;  %v262_v25 = vmul.f32 %v484_v17, %v583_v0  ;;  %v263_v26 = vmul.f32 %v487_v18, %v583_v0  ;;  %v499_v52 = vunpack.c.l.bf16 %v524_v40 }
  0x24   : > { %362 = vst [vmem:[%s610_s26 + $0x70] sm:$0xff] %v330_v14  ;;  %363 = vst [vmem:[%s610_s26 + $0x78] sm:$0xff] %v331_v15  ;;  %v264_v27 = vmul.f32 %v488_v19, %v583_v0  ;;  %v265_v28 = vmul.f32 %v491_v20, %v583_v0  ;;  %v266_v29 = vmul.f32 %v492_v21, %v583_v0  ;;  %v500_v53 = vunpack.c.h.bf16 %v524_v40 }
  0x25   : > { %v267_v30 = vmul.f32 %v495_v22, %v583_v0  ;;  %v268_v31 = vmul.f32 %v496_v23, %v583_v0  ;;  %v300_v32 = vadd.f32 %v592_v9, %v261_v24  ;;  %v301_v33 = vadd.f32 %v592_v9, %v262_v25 }
  0x26   : > { %v302_v34 = vadd.f32 %v592_v9, %v263_v26  ;;  %v303_v35 = vadd.f32 %v592_v9, %v264_v27  ;;  %v304_v36 = vadd.f32 %v592_v9, %v265_v28  ;;  %v305_v37 = vadd.f32 %v592_v9, %v266_v29 }
  0x27   : > { %v306_v38 = vadd.f32 %v592_v9, %v267_v30  ;;  %v307_v39 = vadd.f32 %v592_v9, %v268_v31  ;;  %v332_v42 = vmax.f32 %v300_v32, 0.0  ;;  %v333_v43 = vmax.f32 %v301_v33, 0.0 }
  0x28   : > { %v334_v44 = vmax.f32 %v302_v34, 0.0  ;;  %v335_v45 = vmax.f32 %v303_v35, 0.0  ;;  %v336_v48 = vmax.f32 %v304_v36, 0.0  ;;  %v337_v49 = vmax.f32 %v305_v37, 0.0 }
  0x29   : > { %v338_v50 = vmax.f32 %v306_v38, 0.0  ;;  %v339_v51 = vmax.f32 %v307_v39, 0.0  ;;  %364 = vst [vmem:[%s610_s26 + $0x80] sm:$0xff] %v332_v42  ;;  %365 = vst [vmem:[%s610_s26 + $0x88] sm:$0xff] %v333_v43  ;;  %v503_v54 = vunpack.c.l.bf16 %v525_v41  ;;  %v504_v55 = vunpack.c.h.bf16 %v525_v41 }
  0x2a   : > { %366 = vst [vmem:[%s610_s26 + $0x90] sm:$0xff] %v334_v44  ;;  %367 = vst [vmem:[%s610_s26 + $0x98] sm:$0xff] %v335_v45  ;;  %v507_v56 = vunpack.c.l.bf16 %v526_v46  ;;  %v508_v57 = vunpack.c.h.bf16 %v526_v46  ;;  %v511_v58 = vunpack.c.l.bf16 %v527_v47  ;;  %v512_v59 = vunpack.c.h.bf16 %v527_v47 }
  0x2b   : > { %368 = vst [vmem:[%s610_s26 + $0xa0] sm:$0xff] %v336_v48  ;;  %369 = vst [vmem:[%s610_s26 + $0xa8] sm:$0xff] %v337_v49  ;;  %v269_v60 = vmul.f32 %v499_v52, %v583_v0  ;;  %v270_v61 = vmul.f32 %v500_v53, %v583_v0  ;;  %v271_v62 = vmul.f32 %v503_v54, %v583_v0 }
  0x2c   : > { %370 = vst [vmem:[%s610_s26 + $0xb0] sm:$0xff] %v338_v50  ;;  %371 = vst [vmem:[%s610_s26 + $0xb8] sm:$0xff] %v339_v51  ;;  %v272_v63 = vmul.f32 %v504_v55, %v583_v0  ;;  %v273_v1 = vmul.f32 %v507_v56, %v583_v0  ;;  %v274_v2 = vmul.f32 %v508_v57, %v583_v0 }
  0x2d   : > { %v275_v3 = vmul.f32 %v511_v58, %v583_v0  ;;  %v276_v4 = vmul.f32 %v512_v59, %v583_v0  ;;  %v308_v5 = vadd.f32 %v592_v9, %v269_v60  ;;  %v309_v6 = vadd.f32 %v592_v9, %v270_v61 }
  0x2e   : > { %v310_v7 = vadd.f32 %v592_v9, %v271_v62  ;;  %v311_v8 = vadd.f32 %v592_v9, %v272_v63  ;;  %v312_v10 = vadd.f32 %v592_v9, %v273_v1  ;;  %v313_v11 = vadd.f32 %v592_v9, %v274_v2 }
  0x2f   : > { %v314_v0 = vadd.f32 %v592_v9, %v275_v3  ;;  %v315_v12 = vadd.f32 %v592_v9, %v276_v4  ;;  %v340_v13 = vmax.f32 %v308_v5, 0.0  ;;  %v341_v14 = vmax.f32 %v309_v6, 0.0 }
  0x30   : > { %v342_v15 = vmax.f32 %v310_v7, 0.0  ;;  %v343_v16 = vmax.f32 %v311_v8, 0.0  ;;  %v344_v17 = vmax.f32 %v312_v10, 0.0  ;;  %v345_v18 = vmax.f32 %v313_v11, 0.0 }
  0x31   : > { %v346_v19 = vmax.f32 %v314_v0, 0.0  ;;  %v347_v20 = vmax.f32 %v315_v12, 0.0  ;;  %372 = vst [vmem:[%s610_s26 + $0xc0] sm:$0xff] %v340_v13  ;;  %373 = vst [vmem:[%s610_s26 + $0xc8] sm:$0xff] %v341_v14 }
  0x32   : > { %374 = vst [vmem:[%s610_s26 + $0xd0] sm:$0xff] %v342_v15  ;;  %375 = vst [vmem:[%s610_s26 + $0xd8] sm:$0xff] %v343_v16 }
  0x33   : > { %376 = vst [vmem:[%s610_s26 + $0xe0] sm:$0xff] %v344_v17  ;;  %377 = vst [vmem:[%s610_s26 + $0xe8] sm:$0xff] %v345_v18 }
  0x34   : > { %378 = vst [vmem:[%s610_s26 + $0xf0] sm:$0xff] %v346_v19  ;;  %379 = vst [vmem:[%s610_s26 + $0xf8] sm:$0xff] %v347_v20 }
  0x35 PF: > { %s13_s12 = sadd.s32 1, %s542_s12  }
  0x36   : > { %p10_p4 = scmp.ge.s32.totalorder %s13_s12, 4  }
  0x38   :  { %12 = sbr.rel (!%p10_p4) target bundleno = 1 (0x1), region = 62 }

</bundles_post_ra>
